<compile_context>
chip_gen: v7x
topology: tpu7x:2x2x1
jax: 0.10.0
libtpu: 0.0.40
codegen_flags: <defaults>
</compile_context>

<pallas_src>
import jax
import jax.numpy as jnp
from jax.experimental import pallas as pl
from jax.experimental.pallas import tpu as pltpu

HIDDEN = 400        # logical hidden width of the PyTorch module
HIDDEN_PAD = 512    # padded to a multiple of 128 for lane / MXU alignment
LANE = 128
MAX_BATCH_TILE = 512


def _round_up(n, m):
    return ((n + m - 1) // m) * m


def _pick_batch_tile(B, max_tile=MAX_BATCH_TILE):
    """Batch tile: multiple of 16 (bf16 sublane packing), preferably a multiple
    of 128 (MXU-friendly), capped at `max_tile`, and chosen so the grid has at
    least 2 steps whenever that is useful (keeps both v7x TensorCores busy)."""
    if B <= 32:
        return _round_up(B, 16)              # one tiny tile; splitting is useless
    half = pl.cdiv(B, 2)                     # guarantees >= 2 grid tiles
    if half >= 128:
        bb = _round_up(half, 128)
    else:
        bb = _round_up(half, 16)
    return min(max_tile, bb)


def _mlp_kernel(x_ref,
                w1_ref, b1_ref,
                w2_ref, b2_ref,
                w3_ref, b3_ref,
                w4_ref, b4_ref,
                w5_ref, b5_ref,
                o_ref):
    # Layer 1 in full f32 (unnormalized Black-Scholes features keep their
    # mantissa; K=128 so the f32 matmul cost is negligible).
    h = jnp.dot(x_ref[...], w1_ref[...],
                preferred_element_type=jnp.float32) + b1_ref[...]
    h = jnp.maximum(h, 0.0).astype(jnp.bfloat16)
    # Layers 2-4: bf16 MXU operands, f32 accumulation; bias-add / ReLU in f32.
    h = jnp.dot(h, w2_ref[...], preferred_element_type=jnp.float32) + b2_ref[...]
    h = jnp.maximum(h, 0.0).astype(jnp.bfloat16)
    h = jnp.dot(h, w3_ref[...], preferred_element_type=jnp.float32) + b3_ref[...]
    h = jnp.maximum(h, 0.0).astype(jnp.bfloat16)
    h = jnp.dot(h, w4_ref[...], preferred_element_type=jnp.float32) + b4_ref[...]
    h = jnp.maximum(h, 0.0).astype(jnp.bfloat16)
    out = jnp.dot(h, w5_ref[...], preferred_element_type=jnp.float32) + b5_ref[...]
    # bf16 store: lane-dense, half the vst / HBM writeback bytes.
    o_ref[...] = out.astype(o_ref.dtype)


def prepare_params(params, num_classes):
    """Zero-pad input dim -> 128, hidden 400 -> 512 and output -> 128 lanes.
    w1/b1 stay f32 (first layer runs in f32); the rest of the weights are
    bf16, biases f32.  Padded regions are exact zeros, so ReLU keeps them zero
    through every subsequent layer and the result matches the unpadded model."""
    out_pad = _round_up(max(num_classes, 1), LANE)

    def pad2(a, rows, cols):
        return jnp.pad(a, ((0, rows - a.shape[0]), (0, cols - a.shape[1])))

    in_size = params["w1"].shape[0]
    in_pad = _round_up(max(in_size, 1), LANE)
    return {
        "in_pad": in_pad,
        "w1": pad2(params["w1"], in_pad, HIDDEN_PAD).astype(jnp.float32),
        "b1": pad2(params["b1"], 1, HIDDEN_PAD).astype(jnp.float32),
        "w2": pad2(params["w2"], HIDDEN_PAD, HIDDEN_PAD).astype(jnp.bfloat16),
        "b2": pad2(params["b2"], 1, HIDDEN_PAD).astype(jnp.float32),
        "w3": pad2(params["w3"], HIDDEN_PAD, HIDDEN_PAD).astype(jnp.bfloat16),
        "b3": pad2(params["b3"], 1, HIDDEN_PAD).astype(jnp.float32),
        "w4": pad2(params["w4"], HIDDEN_PAD, HIDDEN_PAD).astype(jnp.bfloat16),
        "b4": pad2(params["b4"], 1, HIDDEN_PAD).astype(jnp.float32),
        "w5": pad2(params["w5"], HIDDEN_PAD, out_pad).astype(jnp.bfloat16),
        "b5": pad2(params["b5"], 1, out_pad).astype(jnp.float32),
    }


def ann_black_scholes_forward(x, prepared, num_classes, *, max_batch_tile=MAX_BATCH_TILE):
    """x: (B, input_size) f32. prepared: output of prepare_params (padded)."""
    B, in_size = x.shape
    in_pad = prepared["in_pad"]
    out_pad = prepared["w5"].shape[1]

    bb = _pick_batch_tile(B, max_batch_tile)
    B_pad = _round_up(B, bb)

    # Pad batch rows and feature columns (lane-dense (bb, 128) f32 x tile).
    x_p = jnp.pad(x, ((0, B_pad - B), (0, in_pad - in_size))).astype(jnp.float32)

    grid = (B_pad // bb,)

    # Weights / biases: whole arrays resident in VMEM once (no double-buffering).
    w_spec = pl.BlockSpec(memory_space=pltpu.MemorySpace.VMEM)
    in_specs = [pl.BlockSpec((bb, in_pad), lambda i: (i, 0))] + [w_spec] * 10
    out_specs = pl.BlockSpec((bb, out_pad), lambda i: (i, 0))

    args = (x_p,
            prepared["w1"], prepared["b1"],
            prepared["w2"], prepared["b2"],
            prepared["w3"], prepared["b3"],
            prepared["w4"], prepared["b4"],
            prepared["w5"], prepared["b5"])

    flops = 2 * B_pad * (in_pad * HIDDEN_PAD
                         + 3 * HIDDEN_PAD * HIDDEN_PAD
                         + HIDDEN_PAD * out_pad)
    bytes_accessed = (int(x_p.size) * x_p.dtype.itemsize
                      + B_pad * out_pad * 2                                   # bf16 out
                      + sum(int(a.size) * a.dtype.itemsize for a in args[1:]))

    out = pl.pallas_call(
        _mlp_kernel,
        out_shape=jax.ShapeDtypeStruct((B_pad, out_pad), jnp.bfloat16),
        grid_spec=pltpu.PrefetchScalarGridSpec(
            num_scalar_prefetch=0,
            grid=grid,
            in_specs=in_specs,
            out_specs=out_specs,
        ),
        compiler_params=pltpu.CompilerParams(
            # Batch tiles shard across TensorCores on v7x; loop on v5e/v6e.
            dimension_semantics=("parallel",),
            # Explicit headroom: ~2.1 MiB resident weights + double-buffered
            # x/out tiles + ~5 x (bb, 512) f32 intermediates stays well under
            # this on every generation (v5e scoped default is only 16 MiB).
            vmem_limit_bytes=40 * 1024 * 1024,
        ),
        cost_estimate=pl.CostEstimate(
            flops=int(flops), transcendentals=0, bytes_accessed=int(bytes_accessed)),
    )(*args)

    return out[:B, :num_classes].astype(jnp.float32)


def init_params(key, input_size, num_classes):
    """Mirror the PyTorch module: Xavier-uniform weights, PyTorch-default
    uniform(-1/sqrt(fan_in)) biases. Weights stored transposed (in, out), f32."""
    dims = [(input_size, HIDDEN), (HIDDEN, HIDDEN), (HIDDEN, HIDDEN),
            (HIDDEN, HIDDEN), (HIDDEN, num_classes)]
    params = {}
    keys = jax.random.split(key, 2 * len(dims))
    for idx, (fan_in, fan_out) in enumerate(dims):
        wkey, bkey = keys[2 * idx], keys[2 * idx + 1]
        limit = (6.0 / (fan_in + fan_out)) ** 0.5          # xavier_uniform_
        w = jax.random.uniform(wkey, (fan_in, fan_out), jnp.float32, -limit, limit)
        blim = 1.0 / (fan_in ** 0.5)                       # nn.Linear default bias init
        b = jax.random.uniform(bkey, (1, fan_out), jnp.float32, -blim, blim)
        params[f"w{idx + 1}"] = w
        params[f"b{idx + 1}"] = b
    return params


def reference_forward(x, params):
    """Pure-f32 reference (identical semantics to the PyTorch forward)."""
    h = x
    for i in range(1, 5):
        h = jnp.maximum(h @ params[f"w{i}"] + params[f"b{i}"], 0.0)
    return h @ params["w5"] + params["b5"]


def reference_forward_mixed(x, params):
    """Reference mirroring the kernel's numerics: f32 first layer, bf16 MXU
    operands + f32 accumulation for layers 2-5 (final bf16 store excluded)."""
    h = jnp.dot(x, params["w1"], preferred_element_type=jnp.float32) + params["b1"]
    h = jnp.maximum(h, 0.0).astype(jnp.bfloat16)
    for i in range(2, 5):
        w = params[f"w{i}"].astype(jnp.bfloat16)
        h = jnp.dot(h, w, preferred_element_type=jnp.float32) + params[f"b{i}"]
        h = jnp.maximum(h, 0.0).astype(jnp.bfloat16)
    w5 = params["w5"].astype(jnp.bfloat16)
    return jnp.dot(h, w5, preferred_element_type=jnp.float32) + params["b5"]


if __name__ == "__main__":
    input_size = 8      # Black-Scholes features (S, K, T, r, sigma, ...)
    num_classes = 1     # option price
    batch = 256         # -> 2 batch tiles of 128 rows (both v7x TensorCores busy)

    key = jax.random.PRNGKey(0)
    pkey, xkey = jax.random.split(key)
    params = init_params(pkey, input_size, num_classes)
    prepared = prepare_params(params, num_classes)
    x = jax.random.normal(xkey, (batch, input_size), jnp.float32)

    out = ann_black_scholes_forward(x, prepared, num_classes)
    out = jax.block_until_ready(out)
    assert out.shape == (batch, num_classes), out.shape

    # Tight check against a reference with the same numerics
    # (f32 first layer, bf16 MXU operands / f32 accum afterwards).
    ref_mixed = reference_forward_mixed(x, params)
    assert jnp.allclose(out, ref_mixed, atol=1e-2, rtol=1e-2), "mismatch vs mixed reference"

    # Looser semantic check against the pure-f32 PyTorch-equivalent forward.
    ref_f32 = reference_forward(x, params)
    assert jnp.allclose(out, ref_f32, atol=1e-1, rtol=1e-1), "mismatch vs f32 reference"

    print("KERNEL_OK")
</pallas_src>

<mosaic_0001>
module attributes {stable_mosaic.version = 11 : i64} {
  func.func @_mlp_kernel(%arg0: i32, %arg1: memref<128x128xf32, #tpu.memory_space<vmem>>, %arg2: memref<128x512xf32, #tpu.memory_space<vmem>>, %arg3: memref<1x512xf32, #tpu.memory_space<vmem>>, %arg4: memref<512x512xbf16, #tpu.memory_space<vmem>>, %arg5: memref<1x512xf32, #tpu.memory_space<vmem>>, %arg6: memref<512x512xbf16, #tpu.memory_space<vmem>>, %arg7: memref<1x512xf32, #tpu.memory_space<vmem>>, %arg8: memref<512x512xbf16, #tpu.memory_space<vmem>>, %arg9: memref<1x512xf32, #tpu.memory_space<vmem>>, %arg10: memref<512x128xbf16, #tpu.memory_space<vmem>>, %arg11: memref<1x128xf32, #tpu.memory_space<vmem>>, %arg12: memref<128x128xbf16, #tpu.memory_space<vmem>>) attributes {dimension_semantics = [#tpu.dimension_semantics<parallel>], iteration_bounds = array<i64: 2>, scalar_prefetch = 0 : i64, scratch_operands = 0 : i64, tpu.core_type = #tpu.core_type<tc>, window_params = [{transform_indices = @transform_0, window_bounds = array<i64: 128, 128>}, {pipeline_mode = #tpu.pipeline_mode<synchronous>, transform_indices = @transform_1, window_bounds = array<i64: 128, 512>}, {pipeline_mode = #tpu.pipeline_mode<synchronous>, transform_indices = @transform_2, window_bounds = array<i64: 1, 512>}, {pipeline_mode = #tpu.pipeline_mode<synchronous>, transform_indices = @transform_3, window_bounds = array<i64: 512, 512>}, {pipeline_mode = #tpu.pipeline_mode<synchronous>, transform_indices = @transform_4, window_bounds = array<i64: 1, 512>}, {pipeline_mode = #tpu.pipeline_mode<synchronous>, transform_indices = @transform_5, window_bounds = array<i64: 512, 512>}, {pipeline_mode = #tpu.pipeline_mode<synchronous>, transform_indices = @transform_6, window_bounds = array<i64: 1, 512>}, {pipeline_mode = #tpu.pipeline_mode<synchronous>, transform_indices = @transform_7, window_bounds = array<i64: 512, 512>}, {pipeline_mode = #tpu.pipeline_mode<synchronous>, transform_indices = @transform_8, window_bounds = array<i64: 1, 512>}, {pipeline_mode = #tpu.pipeline_mode<synchronous>, transform_indices = @transform_9, window_bounds = array<i64: 512, 128>}, {pipeline_mode = #tpu.pipeline_mode<synchronous>, transform_indices = @transform_10, window_bounds = array<i64: 1, 128>}, {transform_indices = @transform_11, window_bounds = array<i64: 128, 128>}]} {
    %c0 = arith.constant 0 : index
    %c0_0 = arith.constant 0 : index
    %0 = vector.load %arg1[%c0, %c0_0] : memref<128x128xf32, #tpu.memory_space<vmem>>, vector<128x128xf32>
    %c0_1 = arith.constant 0 : index
    %c0_2 = arith.constant 0 : index
    %1 = vector.load %arg2[%c0_1, %c0_2] : memref<128x512xf32, #tpu.memory_space<vmem>>, vector<128x512xf32>
    %cst = arith.constant dense<0.000000e+00> : vector<128x512xf32>
    %2 = tpu.matmul %0, %1, %cst {dimension_numbers = #tpu.dot_dimension_numbers<[1], [0], [0], [1], [0, 0, 1, 1], [], []>} : vector<128x128xf32>, vector<128x512xf32>, vector<128x512xf32> -> vector<128x512xf32>
    %c0_3 = arith.constant 0 : index
    %c0_4 = arith.constant 0 : index
    %3 = vector.load %arg3[%c0_3, %c0_4] : memref<1x512xf32, #tpu.memory_space<vmem>>, vector<1x512xf32>
    %4 = vector.broadcast %3 : vector<1x512xf32> to vector<128x512xf32>
    %5 = arith.addf %2, %4 : vector<128x512xf32>
    %cst_5 = arith.constant 0.000000e+00 : f32
    %6 = vector.broadcast %cst_5 : f32 to vector<128x512xf32>
    %7 = arith.maximumf %5, %6 : vector<128x512xf32>
    %8 = arith.truncf %7 : vector<128x512xf32> to vector<128x512xbf16>
    %c0_6 = arith.constant 0 : index
    %c0_7 = arith.constant 0 : index
    %9 = vector.load %arg4[%c0_6, %c0_7] : memref<512x512xbf16, #tpu.memory_space<vmem>>, vector<512x512xbf16>
    %cst_8 = arith.constant dense<0.000000e+00> : vector<128x512xf32>
    %10 = tpu.matmul %8, %9, %cst_8 {dimension_numbers = #tpu.dot_dimension_numbers<[1], [0], [0], [1], [0, 0, 1, 1], [], []>} : vector<128x512xbf16>, vector<512x512xbf16>, vector<128x512xf32> -> vector<128x512xf32>
    %c0_9 = arith.constant 0 : index
    %c0_10 = arith.constant 0 : index
    %11 = vector.load %arg5[%c0_9, %c0_10] : memref<1x512xf32, #tpu.memory_space<vmem>>, vector<1x512xf32>
    %12 = vector.broadcast %11 : vector<1x512xf32> to vector<128x512xf32>
    %13 = arith.addf %10, %12 : vector<128x512xf32>
    %cst_11 = arith.constant 0.000000e+00 : f32
    %14 = vector.broadcast %cst_11 : f32 to vector<128x512xf32>
    %15 = arith.maximumf %13, %14 : vector<128x512xf32>
    %16 = arith.truncf %15 : vector<128x512xf32> to vector<128x512xbf16>
    %c0_12 = arith.constant 0 : index
    %c0_13 = arith.constant 0 : index
    %17 = vector.load %arg6[%c0_12, %c0_13] : memref<512x512xbf16, #tpu.memory_space<vmem>>, vector<512x512xbf16>
    %cst_14 = arith.constant dense<0.000000e+00> : vector<128x512xf32>
    %18 = tpu.matmul %16, %17, %cst_14 {dimension_numbers = #tpu.dot_dimension_numbers<[1], [0], [0], [1], [0, 0, 1, 1], [], []>} : vector<128x512xbf16>, vector<512x512xbf16>, vector<128x512xf32> -> vector<128x512xf32>
    %c0_15 = arith.constant 0 : index
    %c0_16 = arith.constant 0 : index
    %19 = vector.load %arg7[%c0_15, %c0_16] : memref<1x512xf32, #tpu.memory_space<vmem>>, vector<1x512xf32>
    %20 = vector.broadcast %19 : vector<1x512xf32> to vector<128x512xf32>
    %21 = arith.addf %18, %20 : vector<128x512xf32>
    %cst_17 = arith.constant 0.000000e+00 : f32
    %22 = vector.broadcast %cst_17 : f32 to vector<128x512xf32>
    %23 = arith.maximumf %21, %22 : vector<128x512xf32>
    %24 = arith.truncf %23 : vector<128x512xf32> to vector<128x512xbf16>
    %c0_18 = arith.constant 0 : index
    %c0_19 = arith.constant 0 : index
    %25 = vector.load %arg8[%c0_18, %c0_19] : memref<512x512xbf16, #tpu.memory_space<vmem>>, vector<512x512xbf16>
    %cst_20 = arith.constant dense<0.000000e+00> : vector<128x512xf32>
    %26 = tpu.matmul %24, %25, %cst_20 {dimension_numbers = #tpu.dot_dimension_numbers<[1], [0], [0], [1], [0, 0, 1, 1], [], []>} : vector<128x512xbf16>, vector<512x512xbf16>, vector<128x512xf32> -> vector<128x512xf32>
    %c0_21 = arith.constant 0 : index
    %c0_22 = arith.constant 0 : index
    %27 = vector.load %arg9[%c0_21, %c0_22] : memref<1x512xf32, #tpu.memory_space<vmem>>, vector<1x512xf32>
    %28 = vector.broadcast %27 : vector<1x512xf32> to vector<128x512xf32>
    %29 = arith.addf %26, %28 : vector<128x512xf32>
    %cst_23 = arith.constant 0.000000e+00 : f32
    %30 = vector.broadcast %cst_23 : f32 to vector<128x512xf32>
    %31 = arith.maximumf %29, %30 : vector<128x512xf32>
    %32 = arith.truncf %31 : vector<128x512xf32> to vector<128x512xbf16>
    %c0_24 = arith.constant 0 : index
    %c0_25 = arith.constant 0 : index
    %33 = vector.load %arg10[%c0_24, %c0_25] : memref<512x128xbf16, #tpu.memory_space<vmem>>, vector<512x128xbf16>
    %cst_26 = arith.constant dense<0.000000e+00> : vector<128x128xf32>
    %34 = tpu.matmul %32, %33, %cst_26 {dimension_numbers = #tpu.dot_dimension_numbers<[1], [0], [0], [1], [0, 0, 1, 1], [], []>} : vector<128x512xbf16>, vector<512x128xbf16>, vector<128x128xf32> -> vector<128x128xf32>
    %c0_27 = arith.constant 0 : index
    %c0_28 = arith.constant 0 : index
    %35 = vector.load %arg11[%c0_27, %c0_28] : memref<1x128xf32, #tpu.memory_space<vmem>>, vector<1x128xf32>
    %36 = vector.broadcast %35 : vector<1x128xf32> to vector<128x128xf32>
    %37 = arith.addf %34, %36 : vector<128x128xf32>
    %38 = arith.truncf %37 : vector<128x128xf32> to vector<128x128xbf16>
    %c0_29 = arith.constant 0 : index
    %c0_30 = arith.constant 0 : index
    %39 = vector.load %arg12[%c0_29, %c0_30] : memref<128x128xbf16, #tpu.memory_space<vmem>>, vector<128x128xbf16>
    tpu.vector_store %arg12[%c0_29, %c0_30], %38 {strides = array<i32>} : memref<128x128xbf16, #tpu.memory_space<vmem>>, vector<128x128xbf16>,
    return
  }
  func.func @transform_0(%arg0: i32) -> (i32, i32) {
    %c0_i32 = arith.constant 0 : i32
    %c0_i32_0 = arith.constant 0 : i32
    return %arg0, %c0_i32 : i32, i32
  }
  func.func @transform_1(%arg0: i32) -> (i32, i32) {
    %c0_i32 = arith.constant 0 : i32
    %c0_i32_0 = arith.constant 0 : i32
    %c0_i32_1 = arith.constant 0 : i32
    return %c0_i32, %c0_i32_0 : i32, i32
  }
  func.func @transform_2(%arg0: i32) -> (i32, i32) {
    %c0_i32 = arith.constant 0 : i32
    %c0_i32_0 = arith.constant 0 : i32
    %c0_i32_1 = arith.constant 0 : i32
    return %c0_i32, %c0_i32_0 : i32, i32
  }
  func.func @transform_3(%arg0: i32) -> (i32, i32) {
    %c0_i32 = arith.constant 0 : i32
    %c0_i32_0 = arith.constant 0 : i32
    %c0_i32_1 = arith.constant 0 : i32
    return %c0_i32, %c0_i32_0 : i32, i32
  }
  func.func @transform_4(%arg0: i32) -> (i32, i32) {
    %c0_i32 = arith.constant 0 : i32
    %c0_i32_0 = arith.constant 0 : i32
    %c0_i32_1 = arith.constant 0 : i32
    return %c0_i32, %c0_i32_0 : i32, i32
  }
  func.func @transform_5(%arg0: i32) -> (i32, i32) {
    %c0_i32 = arith.constant 0 : i32
    %c0_i32_0 = arith.constant 0 : i32
    %c0_i32_1 = arith.constant 0 : i32
    return %c0_i32, %c0_i32_0 : i32, i32
  }
  func.func @transform_6(%arg0: i32) -> (i32, i32) {
    %c0_i32 = arith.constant 0 : i32
    %c0_i32_0 = arith.constant 0 : i32
    %c0_i32_1 = arith.constant 0 : i32
    return %c0_i32, %c0_i32_0 : i32, i32
  }
  func.func @transform_7(%arg0: i32) -> (i32, i32) {
    %c0_i32 = arith.constant 0 : i32
    %c0_i32_0 = arith.constant 0 : i32
    %c0_i32_1 = arith.constant 0 : i32
    return %c0_i32, %c0_i32_0 : i32, i32
  }
  func.func @transform_8(%arg0: i32) -> (i32, i32) {
    %c0_i32 = arith.constant 0 : i32
    %c0_i32_0 = arith.constant 0 : i32
    %c0_i32_1 = arith.constant 0 : i32
    return %c0_i32, %c0_i32_0 : i32, i32
  }
  func.func @transform_9(%arg0: i32) -> (i32, i32) {
    %c0_i32 = arith.constant 0 : i32
    %c0_i32_0 = arith.constant 0 : i32
    %c0_i32_1 = arith.constant 0 : i32
    return %c0_i32, %c0_i32_0 : i32, i32
  }
  func.func @transform_10(%arg0: i32) -> (i32, i32) {
    %c0_i32 = arith.constant 0 : i32
    %c0_i32_0 = arith.constant 0 : i32
    %c0_i32_1 = arith.constant 0 : i32
    return %c0_i32, %c0_i32_0 : i32, i32
  }
  func.func @transform_11(%arg0: i32) -> (i32, i32) {
    %c0_i32 = arith.constant 0 : i32
    %c0_i32_0 = arith.constant 0 : i32
    return %arg0, %c0_i32 : i32, i32
  }
}

</mosaic_0001>

<bundles_post_ra>
// kernel: tpu_custom_call.1
= control target key start
LH: loop header
LB: loop body
LE: loop exit
PB: predicated region body
PF: predicated region fallthrough
CT: control target
= control target key end

     0   :  { %s8734_s0 = inlined_call_operand.hbm [shape: f32[256,128], index: 0, kind: input, shape index: {}]   ;;  %s8735_s1 = inlined_call_operand.hbm [shape: f32[128,512], index: 1, kind: input, shape index: {}]   ;;  %s8736_s2 = inlined_call_operand.vmem [shape: f32[1,512], index: 2, kind: input, shape index: {}]   ;;  %s8737_s3 = inlined_call_operand.hbm [shape: bf16[512,512], index: 3, kind: input, shape index: {}]   ;;  %s8738_s4 = inlined_call_operand.vmem [shape: f32[1,512], index: 4, kind: input, shape index: {}]   ;;  %s8739_s5 = inlined_call_operand.hbm [shape: bf16[512,512], index: 5, kind: input, shape index: {}]   ;;  %s8740_s6 = inlined_call_operand.vmem [shape: f32[1,512], index: 6, kind: input, shape index: {}]   ;;  %s8741_s7 = inlined_call_operand.hbm [shape: bf16[512,512], index: 7, kind: input, shape index: {}]   ;;  %s8742_s8 = inlined_call_operand.vmem [shape: f32[1,512], index: 8, kind: input, shape index: {}]   ;;  %s8743_s9 = inlined_call_operand.hbm [shape: bf16[512,128], index: 9, kind: input, shape index: {}]   ;;  %s8744_s10 = inlined_call_operand.vmem [shape: f32[1,128], index: 10, kind: input, shape index: {}]   ;;  %s8745_s11 = inlined_call_operand.hbm [shape: bf16[256,128], index: 11, kind: output, shape index: {}]  }
   0x1   :  { %8750 = sst [smem:[#allocation19_spill]] %s8735_s1 }
   0x2   :  { %8751 = sst [smem:[#allocation20_spill]] %s8742_s8 }
   0x3   :  { %8752 = sst [smem:[#allocation21_spill]] %s8744_s10 }
   0x4   :  { %8753 = sst [smem:[#allocation22_spill]] %s8745_s11 }
   0x5   :  { %16 = vsyncpa [#allocation3], 0 }
   0x6   :  { %18 = vsyncpa [#allocation3 + $0x1], 0 }
   0x7   :  { %19 = vsyncpa [#allocation6], 0 }
   0x8   :  { %20 = vsyncpa [#allocation9], 0 }
   0x9   :  { %21 = vsyncpa [#allocation12], 0 }
   0xa   :  { %22 = vsyncpa [#allocation4], 0 }
   0xb   :  { %24 = vsyncpa [#allocation4 + $0x1], 0  ;;  %s7829_s17 = smov 0   ;;  %s7831_s18 = smov 0  }
   0xc   :  { %s7833_s19 = smov 0   ;;  %s7835_s20 = smov 0  }
   0xd LB: > { %s7751_s21 = smov [#allocation5]   ;;  %s7850_s23 = sadd.s32 4294967295, %s7749_s20   ;;  %s7749_s20 = sphi %s7835_s20, %s8779_s20   ;;  %s7745_s19 = sphi %s7833_s19, %s8778_s19   ;;  %s7741_s18 = sphi %s7831_s18, %s8777_s18   ;;  %s7737_s17 = sphi %s7829_s17, %s8776_s17  }
   0xe   : > { %s309_s22 = sshll.u32 %s7751_s21, 4  ;;  %p5688_p0 = scmp.ge.s32.totalorder %s7749_s20, 1  ;;  %s7855_s22 = int_to_ptr.vmem [resolvable:$true] %s309_s22 }
   0xf   : > { %p8747_p1 = scmp.eq.s32.totalorder %s7850_s23, 0  ;;  %p297_p2 = scmp.lt.s32.totalorder %s7749_s20, 3 }
  0x10   : > { %s7752_s26 = smov [#allocation8]   ;;  %s7753_s28 = smov [#allocation7]  }
  0x11   : > { %p7857_p3 = pnand %p5688_p0, %p297_p2  ;;  %s341_s27 = sshll.u32 %s7752_s26, 4  ;;  %s7870_s27 = int_to_ptr.vmem [resolvable:$true] %s341_s27 }
  0x12   : > { %s7872_s29 = sshll.u32 %s7753_s28, 4  ;;  %s8756_s1 = sld [smem:[#allocation19_spill]]  ;;  %s326_s29 = int_to_ptr.vmem [resolvable:$true] %s7872_s29 }
  0x13   : > { %s8754_s24 = scalar_select %p7857_p3, 1, 0 }
  0x14   : > { %p6809_p5 = pneg %p7857_p3 }
  0x16   : > { %p7866_p6 = pnand %p6809_p5, %p8747_p1 }
  0x18   : > { %s7501_s13 = scalar_lea.hbm %s8756_s1, 8192  ;;  %p7882_p8 = pneg %p7866_p6 }
  0x19   : > { %p7502_p7 = scmp.ne.s32.totalorder %s8756_s1, %s7501_s13  ;;  %p7508_p11 = scmp.lt.u32.totalorder %s7501_s13, %s8756_s1 }
  0x1b   : > { %p7504_p9 = pnand %p7882_p8, %p7502_p7 }
  0x1d   : > { %p7505_p10 = pneg %p7504_p9 }
  0x1f   : > { %p7510_p12 = pnand %p7508_p11, %p7505_p10 }
  0x21   : > { %7513 = shalt.err (!%p7510_p12)
}
  0x22   : > { %s7514_s28 = scalar_lea.vmem %s7855_s22, 8192  ;;  %p7522_p5 = scmp.lt.s32.totalorder %s7855_s22, %s7855_s22 }
  0x23   : > { %p7515_p13 = scmp.ne.s32.totalorder %s7855_s22, %s7514_s28  ;;  %p7523_p4 = scmp.lt.s32.totalorder %s7514_s28, %s7514_s28 }
  0x25   : > { %p7517_p0 = pnand %p7515_p13, %p7882_p8  ;;  %p7524_p7 = por %p7523_p4, %p7522_p5 }
  0x27   : > { %p7518_p2 = pneg %p7517_p0 }
  0x29   : > { %p7525_p9 = pnand %p7524_p7, %p7518_p2 }
  0x2b   : > { %7528 = shalt.err (!%p7525_p9)
}
  0x2c   : > { %s7754_s30 = smov 512   ;;  %s7755_s12 = smov 32  }
  0x2d   : > { %6812 = dma.hbm_to_vmem [thread:$0]  (!%p7866_p6), %s8756_s1, 8192, %s7855_s22, [#allocation6], %s7754_s30, %s7754_s30, %s7755_s12  }
  0x2e   : > { %s7529_s26 = scalar_lea.hbm %s8739_s5, 16384 }
  0x2f   : > { %p7530_p4 = scmp.ne.s32.totalorder %s8739_s5, %s7529_s26  ;;  %p7536_p12 = scmp.lt.u32.totalorder %s7529_s26, %s8739_s5 }
  0x31   : > { %p7532_p10 = pnand %p7530_p4, %p7882_p8 }
  0x33   : > { %p7533_p11 = pneg %p7532_p10 }
  0x35   : > { %p7538_p13 = pnand %p7536_p12, %p7533_p11 }
  0x37   : > { %7541 = shalt.err (!%p7538_p13)
}
  0x38   : > { %s7542_s22 = scalar_lea.vmem %s7870_s27, 16384  ;;  %p7550_p7 = scmp.lt.s32.totalorder %s7870_s27, %s7870_s27 }
  0x39   : > { %p7543_p0 = scmp.ne.s32.totalorder %s7870_s27, %s7542_s22  ;;  %p7551_p9 = scmp.lt.s32.totalorder %s7542_s22, %s7542_s22 }
  0x3b   : > { %p7545_p2 = pnand %p7543_p0, %p7882_p8  ;;  %p7552_p4 = por %p7551_p9, %p7550_p7 }
  0x3d   : > { %p7546_p5 = pneg %p7545_p2 }
  0x3f   : > { %p7553_p10 = pnand %p7552_p4, %p7546_p5 }
  0x41   : > { %7556 = shalt.err (!%p7553_p10)
}
  0x42   : > { %s7756_s10 = smov 256   ;;  %s7757_s8 = smov 16  }
  0x43   : > { %6818 = dma.hbm_to_vmem [thread:$0]  (!%p7866_p6), %s8739_s5, 16384, %s7870_s27, [#allocation9], %s7756_s10, %s7756_s10, %s7757_s8  }
  0x44   : > { %s7557_s14 = scalar_lea.hbm %s8737_s3, 16384 }
  0x45   : > { %p7558_p11 = scmp.ne.s32.totalorder %s8737_s3, %s7557_s14  ;;  %p7564_p0 = scmp.lt.u32.totalorder %s7557_s14, %s8737_s3 }
  0x47   : > { %p7560_p12 = pnand %p7558_p11, %p7882_p8 }
  0x49   : > { %p7561_p13 = pneg %p7560_p12 }
  0x4b   : > { %p7566_p2 = pnand %p7564_p0, %p7561_p13 }
  0x4d   : > { %7569 = shalt.err (!%p7566_p2)
}
  0x4e   : > { %s7570_s22 = scalar_lea.vmem %s326_s29, 16384  ;;  %p7578_p4 = scmp.lt.s32.totalorder %s326_s29, %s326_s29 }
  0x4f   : > { %p7571_p5 = scmp.ne.s32.totalorder %s326_s29, %s7570_s22  ;;  %p7579_p10 = scmp.lt.s32.totalorder %s7570_s22, %s7570_s22 }
  0x51   : > { %p7573_p7 = pnand %p7571_p5, %p7882_p8  ;;  %p7580_p1 = por %p7579_p10, %p7578_p4 }
  0x53   : > { %p7574_p9 = pneg %p7573_p7 }
  0x55   : > { %p7581_p3 = pnand %p7580_p1, %p7574_p9 }
  0x57   : > { %7584 = shalt.err (!%p7581_p3)
}
  0x58   : > { %6815 = dma.hbm_to_vmem [thread:$0]  (!%p7866_p6), %s8737_s3, 16384, %s326_s29, [#allocation6], %s7756_s10, %s7756_s10, %s7757_s8  }
  0x59   : > { %s7758_s30 = smov [#allocation10]   ;;  %s7759_s13 = smov [#allocation11]  }
  0x5a   : > { %s357_s12 = sshll.u32 %s7758_s30, 4  ;;  %s373_s14 = sshll.u32 %s7759_s13, 4  ;;  %s358_s12 = int_to_ptr.vmem [resolvable:$true] %s357_s12  ;;  %s374_s14 = int_to_ptr.vmem [resolvable:$true] %s373_s14 }
  0x5b   : > { %s7585_s26 = scalar_lea.hbm %s8741_s7, 16384 }
  0x5c   : > { %p7586_p1 = scmp.ne.s32.totalorder %s8741_s7, %s7585_s26  ;;  %p7592_p12 = scmp.lt.u32.totalorder %s7585_s26, %s8741_s7 }
  0x5e   : > { %p7588_p3 = pnand %p7586_p1, %p7882_p8 }
  0x60   : > { %p7589_p11 = pneg %p7588_p3 }
  0x62   : > { %p7594_p13 = pnand %p7592_p12, %p7589_p11 }
  0x64   : > { %7597 = shalt.err (!%p7594_p13)
}
  0x65   : > { %s7598_s29 = scalar_lea.vmem %s358_s12, 16384  ;;  %p7606_p7 = scmp.lt.s32.totalorder %s358_s12, %s358_s12 }
  0x66   : > { %p7599_p0 = scmp.ne.s32.totalorder %s358_s12, %s7598_s29  ;;  %p7607_p9 = scmp.lt.s32.totalorder %s7598_s29, %s7598_s29 }
  0x68   : > { %p7601_p2 = pnand %p7599_p0, %p7882_p8  ;;  %p7608_p4 = por %p7607_p9, %p7606_p7 }
  0x6a   : > { %p7602_p5 = pneg %p7601_p2 }
  0x6c   : > { %p7609_p10 = pnand %p7608_p4, %p7602_p5 }
  0x6e   : > { %7612 = shalt.err (!%p7609_p10)
}
  0x6f   : > { %6821 = dma.hbm_to_vmem [thread:$0]  (!%p7866_p6), %s8741_s7, 16384, %s358_s12, [#allocation9], %s7756_s10, %s7756_s10, %s7757_s8  }
  0x70   : > { %s7613_s15 = scalar_lea.hbm %s8743_s9, 4096 }
  0x71   : > { %p7614_p1 = scmp.ne.s32.totalorder %s8743_s9, %s7613_s15  ;;  %p7620_p12 = scmp.lt.u32.totalorder %s7613_s15, %s8743_s9 }
  0x73   : > { %p7616_p3 = pnand %p7614_p1, %p7882_p8 }
  0x75   : > { %p7617_p11 = pneg %p7616_p3 }
  0x77   : > { %p7622_p13 = pnand %p7620_p12, %p7617_p11 }
  0x79   : > { %7625 = shalt.err (!%p7622_p13)
}
  0x7a   : > { %s7626_s27 = scalar_lea.vmem %s374_s14, 4096  ;;  %p7634_p7 = scmp.lt.s32.totalorder %s374_s14, %s374_s14 }
  0x7b   : > { %p7627_p0 = scmp.ne.s32.totalorder %s374_s14, %s7626_s27  ;;  %p7635_p9 = scmp.lt.s32.totalorder %s7626_s27, %s7626_s27 }
  0x7d   : > { %p7629_p2 = pnand %p7627_p0, %p7882_p8  ;;  %p7636_p4 = por %p7635_p9, %p7634_p7 }
  0x7f   : > { %p7630_p5 = pneg %p7629_p2 }
  0x81   : > { %p7637_p10 = pnand %p7636_p4, %p7630_p5 }
  0x83   : > { %7640 = shalt.err (!%p7637_p10)
}
  0x84   : > { %s7760_s10 = smov 64   ;;  %s7761_s16 = smov 4  }
  0x85   : > { %6824 = dma.hbm_to_vmem [thread:$0]  (!%p7866_p6), %s8743_s9, 4096, %s374_s14, [#allocation12], %s7760_s10, %s7760_s10, %s7761_s16  }
  0x86   : > { %s5687_s29 = sadd.s32 4294967294, %s7749_s20   ;;  %s7992_s1 = sadd.s32 1, %s7749_s20  }
  0x87   : > { %s37_s11 = sadd.s32 1, %s7745_s19  ;;  %s34_s30 = ssub.s32 %s7749_s20, %s7992_s1 }
  0x88   : > { %p44_p8 = scmp.ne.s32.totalorder %s7745_s19, %s7741_s18  ;;  %p35_p1 = scmp.eq.s32.totalorder %s34_s30, 0 }
  0x89   : > { %p45_p3 = scmp.eq.s32.totalorder %s7749_s20, 0  ;;  %p50_p11 = scmp.ne.s32.totalorder %s7741_s18, %s7737_s17 }
  0x8a   : > { %p284_p12 = scmp.eq.s32.totalorder %s7850_s23, 1  ;;  %p8758_p0 = scmp.eq.s32.totalorder %s7850_s23, 0 }
  0x8b   : > { %s8004_s13 = scalar_select %p35_p1, %s7745_s19, %s37_s11  }
  0x8c   : > { %p46_p13 = por %p45_p3, %p44_p8  ;;  %p8008_p2 = por %p8758_p0, %p50_p11 }
  0x8d   : > { %p8012_p6 = por %p284_p12, %p44_p8  ;;  %p290_p5 = scmp.eq.s32.totalorder %s5687_s29, 1 }
  0x8e   : > { %p6838_p7 = scmp.lt.s32.totalorder %s7749_s20, 2  ;;  %s390_s15 = sand.u32 1, %s7745_s19  }
  0x8f   : > { %s8760_s14 = scalar_select %p8012_p6, 1, 0 }
  0x90   : > { %p8018_p9 = por %p290_p5, %p50_p11  ;;  %s5695_s26 = sshll.u32 %s390_s15, 7 }
  0x91   : > { %s6144_s28 = sshll.u32 %s7749_s20, 11  ;;  %s394_s16 = scalar_lea.vmem [#allocation2], %s5695_s26 }
  0x92   : > { %s8761_s21 = scalar_select %p8018_p9, 1, 0 }
  0x93   : > { %s8026_s10 = scalar_lea.hbm %s8734_s0, %s6144_s28  ;;  %s401_s8 = sshll.u32 %s394_s16, 4  ;;  %s8032_s8 = int_to_ptr.vmem [resolvable:$true] %s401_s8 }
  0x94   : > { %p8028_p4 = pnand %p6838_p7, %p46_p13  ;;  %s8034_s29 = scalar_lea.sflag [#allocation3], %s390_s15 }
  0x95   : > { %s7641_s11 = scalar_lea.hbm %s8026_s10, 2048  ;;  %s7646_s28 = scalar_lea.hbm %s8734_s0, 4096 }
  0x96   : > { %p7642_p10 = scmp.ne.s32.totalorder %s8026_s10, %s7641_s11  ;;  %p7643_p8 = pneg %p8028_p4 }
  0x97   : > { %p7647_p11 = scmp.lt.u32.totalorder %s8026_s10, %s8734_s0  ;;  %p7648_p12 = scmp.lt.u32.totalorder %s7646_s28, %s7641_s11 }
  0x98   : > { %p7644_p1 = pnand %p7643_p8, %p7642_p10  ;;  %p7650_p0 = scmp.lt.u32.totalorder %s7641_s11, %s8026_s10 }
  0x99   : > { %p7649_p13 = por %p7648_p12, %p7647_p11 }
  0x9a   : > { %p7645_p3 = pneg %p7644_p1 }
  0x9b   : > { %p7651_p5 = por %p7650_p0, %p7649_p13 }
  0x9d   : > { %p7652_p7 = pnand %p7651_p5, %p7645_p3 }
  0x9f   : > { %7655 = shalt.err (!%p7652_p7)
}
  0xa0   : > { %s7656_s15 = scalar_lea.vmem %s8032_s8, 2048  ;;  %s7762_s16 = smov [#allocation2]  }
  0xa1   : > { %p7657_p10 = scmp.ne.s32.totalorder %s8032_s8, %s7656_s15  ;;  %s7661_s30 = sshll.u32 %s7762_s16, 4  ;;  %s7662_s30 = int_to_ptr.vmem [resolvable:$false] %s7661_s30 }
  0xa2   : > { %s7663_s26 = scalar_lea.vmem %s7662_s30, 4096  ;;  %p7664_p6 = scmp.lt.s32.totalorder %s8032_s8, %s7662_s30 }
  0xa3   : > { %p7659_p1 = pnand %p7657_p10, %p7643_p8  ;;  %p7665_p11 = scmp.lt.s32.totalorder %s7663_s26, %s7656_s15 }
  0xa5   : > { %p7660_p9 = pneg %p7659_p1  ;;  %p7666_p12 = por %p7665_p11, %p7664_p6 }
  0xa7   : > { %p7667_p13 = pnand %p7666_p12, %p7660_p9 }
  0xa9   : > { %7670 = shalt.err (!%p7667_p13)
}
  0xaa   : > { %s7763_s11 = smov 128   ;;  %s7764_s28 = smov 8  }
  0xab   : > { %6828 = dma.hbm_to_vmem [thread:$0]  (!%p8028_p4), %s8026_s10, 2048, %s8032_s8, %s8034_s29, %s7763_s11, %s7763_s11, %s7764_s28  }
  0xac   : > { %p8763_p8 = scmp.ne.s32.totalorder %s8754_s24, 0 }
  0xad   : > { %s8065_s22 = sand.u32 (!%p8763_p8), 1, %s7741_s18  }
  0xae   : > { %413 = sbr.rel (%p8763_p8) target bundleno = 1604 (0x644), region = 64  ;;  %s5699_s27 = sshll.u32 (!%p8763_p8), %s8065_s22, 7 }
  0xaf   : > { %s416_s15 = scalar_lea.sflag (!%p8763_p8), [#allocation3], %s8065_s22  ;;  %s8069_s16 = scalar_lea.vmem (!%p8763_p8), [#allocation2], %s5699_s27 }
  0xb5   : > { %7716 = dma.done.wait (%p8008_p2), %s416_s15, 2048  }
  0xb6   : > { %7718 = vsyncadd (%p8008_p2), %s416_s15, 4294965248  ;;  %p8764_p6 = scmp.eq.s32.totalorder %s7850_s23, 0 }
  0xb8   : > { %7720 = dma.done.wait (%p8764_p6), [#allocation6], 24576   ;;  %p8765_p9 = pmov %p8764_p6 }
  0xb9   : > { %p8766_p4 = pmov %p8764_p6 }
  0xba   : > { %7722 = vsyncadd (%p8765_p9), [#allocation6], 4294942720 }
  0xbb   : > { %7724 = dma.done.wait (%p8766_p4), [#allocation9], 32768   ;;  %p8767_p3 = pmov %p8766_p4 }
  0xbd   : > { %7726 = vsyncadd (%p8767_p3), [#allocation9], 4294934528  ;;  %p8768_p0 = pmov %p8767_p3 }
  0xbf   : > { %7728 = dma.done.wait (%p8768_p0), [#allocation12], 4096   ;;  %p8769_p5 = pmov %p8768_p0 }
  0xc0   : > { %v7765_v0 = vmov 0.0   ;;  %v498_v1 = vld [vmem:[#allocation5 + $0x8] sm:$0xff]  ;;  %v497_v3 = vld [vmem:[#allocation5] sm:$0xff]  ;;  %v500_v32 = vld [vmem:[#allocation5 + $0x18] sm:$0xff]  ;;  %s8770_s11 = sld [smem:[#allocation20_spill]]  ;;  %s8771_s15 = sld [smem:[#allocation21_spill]] }
  0xc1   : > { %7730 = vsyncadd (%p8769_p5), [#allocation12], 4294963200  ;;  %647 = vmatprep.mubr.f32.mxu0 %v7765_v0  ;;  %808 = vmatprep.mubr.f32.mxu1 %v7765_v0  ;;  %v502_v2 = vld [vmem:[#allocation5 + $0x28] sm:$0xff]  ;;  %v501_v5 = vld [vmem:[#allocation5 + $0x20] sm:$0xff]  ;;  %s6161_s25 = sshll.u32 %s7850_s23, 10  ;;  %s8772_s29 = sld [smem:[#allocation22_spill]] }
  0xc2   : > { %v6337_v4 = vpack.c.bf16 %v502_v2, %v498_v1  ;;  %v506_v6 = vld [vmem:[#allocation5 + $0x48] sm:$0xff]  ;;  %v6339_v8 = vpack.c.bf16 %v501_v5, %v497_v3  ;;  %v505_v10 = vld [vmem:[#allocation5 + $0x40] sm:$0xff]  ;;  %v504_v33 = vld [vmem:[#allocation5 + $0x38] sm:$0xff]  ;;  %s5553_s26 = scalar_lea.sflag [#allocation4], %s8065_s22  ;;  %p8773_p7 = scmp.ne.s32.totalorder %s8760_s14, 0 }
  0xc3   : > { %v510_v7 = vld [vmem:[#allocation5 + $0x68] sm:$0xff]  ;;  %v509_v11 = vld [vmem:[#allocation5 + $0x60] sm:$0xff]  ;;  %v6369_v34 = vpack.c.bf16 %v504_v33, %v500_v32  ;;  %v499_v35 = vld [vmem:[#allocation5 + $0x10] sm:$0xff]  ;;  %s7766_s23 = smov [#allocation13]  }
  0xc4   : > { %v6341_v9 = vpack.c.bf16 %v510_v7, %v506_v6  ;;  %v514_v12 = vld [vmem:[#allocation5 + $0x88] sm:$0xff]  ;;  %6338 = vmatprep.subr.bf16.mxu0 %v6337_v4  ;;  %v6343_v14 = vpack.c.bf16 %v509_v11, %v505_v10  ;;  %v513_v16 = vld [vmem:[#allocation5 + $0x80] sm:$0xff]  ;;  %v503_v36 = vld [vmem:[#allocation5 + $0x30] sm:$0xff]  ;;  %s7675_s28 = sshll.u32 %s7766_s23, 4  ;;  %s7676_s28 = int_to_ptr.vmem [resolvable:$false] %s7675_s28 }
  0xc5   : > { %v518_v13 = vld [vmem:[#allocation5 + $0xa8] sm:$0xff]  ;;  %6340 = vmatpush1.bf16.msra.mxu0 %v6339_v8  ;;  %v517_v17 = vld [vmem:[#allocation5 + $0xa0] sm:$0xff]  ;;  %v508_v37 = vld [vmem:[#allocation5 + $0x58] sm:$0xff]  ;;  %v6371_v38 = vpack.c.bf16 %v503_v36, %v499_v35  ;;  %6370 = vmatprep.subr.bf16.mxu1 %v6369_v34  ;;  %s7677_s27 = scalar_lea.vmem %s7676_s28, 2048 }
  0xc6   : > { %6342 = vmatprep.subr.bf16.mxu0 %v6341_v9  ;;  %v6345_v15 = vpack.c.bf16 %v518_v13, %v514_v12  ;;  %v522_v18 = vld [vmem:[#allocation5 + $0xc8] sm:$0xff]  ;;  %v6347_v20 = vpack.c.bf16 %v517_v17, %v513_v16  ;;  %v521_v22 = vld [vmem:[#allocation5 + $0xc0] sm:$0xff]  ;;  %v512_v39 = vld [vmem:[#allocation5 + $0x78] sm:$0xff] }
  0xc7   : > { %v526_v19 = vld [vmem:[#allocation5 + $0xe8] sm:$0xff]  ;;  %v525_v23 = vld [vmem:[#allocation5 + $0xe0] sm:$0xff]  ;;  %v507_v40 = vld [vmem:[#allocation5 + $0x50] sm:$0xff]  ;;  %v6373_v42 = vpack.c.bf16 %v512_v39, %v508_v37  ;;  %6372 = vmatpush1.bf16.msra.mxu1 %v6371_v38  ;;  %s8687_s30 = scalar_lea.hbm %s8772_s29, %s6161_s25 }
  0xc8   : > { %v6349_v21 = vpack.c.bf16 %v526_v19, %v522_v18  ;;  %v530_v24 = vld [vmem:[#allocation5 + $0x108] sm:$0xff]  ;;  %v6351_v26 = vpack.c.bf16 %v525_v23, %v521_v22  ;;  %v529_v27 = vld [vmem:[#allocation5 + $0x100] sm:$0xff]  ;;  %v511_v43 = vld [vmem:[#allocation5 + $0x70] sm:$0xff] }
  0xc9   : > { %6344 = vmatpush1.bf16.msra.mxu0 %v6343_v14  ;;  %v534_v25 = vld [vmem:[#allocation5 + $0x128] sm:$0xff]  ;;  %v533_v28 = vld [vmem:[#allocation5 + $0x120] sm:$0xff]  ;;  %v516_v44 = vld [vmem:[#allocation5 + $0x98] sm:$0xff]  ;;  %v6375_v50 = vpack.c.bf16 %v511_v43, %v507_v40  ;;  %6374 = vmatprep.subr.bf16.mxu1 %v6373_v42 }
  0xca   : > { %6346 = vmatprep.subr.bf16.mxu0 %v6345_v15  ;;  %v538_v29 = vld [vmem:[#allocation5 + $0x148] sm:$0xff]  ;;  %v6353_v30 = vpack.c.bf16 %v534_v25, %v530_v24  ;;  %v6355_v41 = vpack.c.bf16 %v533_v28, %v529_v27  ;;  %v520_v45 = vld [vmem:[#allocation5 + $0xb8] sm:$0xff]  ;;  %v537_v47 = vld [vmem:[#allocation5 + $0x140] sm:$0xff] }
  0xcb   : > { %v542_v31 = vld [vmem:[#allocation5 + $0x168] sm:$0xff]  ;;  %v541_v48 = vld [vmem:[#allocation5 + $0x160] sm:$0xff]  ;;  %v6377_v52 = vpack.c.bf16 %v520_v45, %v516_v44  ;;  %v515_v53 = vld [vmem:[#allocation5 + $0x90] sm:$0xff]  ;;  %6376 = vmatpush1.bf16.msra.mxu1 %v6375_v50 }
  0xcc   : > { %v6357_v46 = vpack.c.bf16 %v542_v31, %v538_v29  ;;  %v546_v49 = vld [vmem:[#allocation5 + $0x188] sm:$0xff]  ;;  %v519_v54 = vld [vmem:[#allocation5 + $0xb0] sm:$0xff]  ;;  %v524_v55 = vld [vmem:[#allocation5 + $0xd8] sm:$0xff]  ;;  %v6359_v57 = vpack.c.bf16 %v541_v48, %v537_v47 }
  0xcd   : > { %6348 = vmatpush1.bf16.msra.mxu0 %v6347_v20  ;;  %v550_v51 = vld [vmem:[#allocation5 + $0x1a8] sm:$0xff]  ;;  %v528_v56 = vld [vmem:[#allocation5 + $0xf8] sm:$0xff]  ;;  %v545_v59 = vld [vmem:[#allocation5 + $0x180] sm:$0xff]  ;;  %v6379_v62 = vpack.c.bf16 %v519_v54, %v515_v53  ;;  %6378 = vmatprep.subr.bf16.mxu1 %v6377_v52 }
  0xce   : > { %6350 = vmatprep.subr.bf16.mxu0 %v6349_v21  ;;  %v6361_v58 = vpack.c.bf16 %v550_v51, %v546_v49  ;;  %v549_v60 = vld [vmem:[#allocation5 + $0x1a0] sm:$0xff]  ;;  %v554_v61 = vld [vmem:[#allocation5 + $0x1c8] sm:$0xff]  ;;  %v6381_v1 = vpack.c.bf16 %v528_v56, %v524_v55  ;;  %v523_v2 = vld [vmem:[#allocation5 + $0xd0] sm:$0xff] }
  0xcf   : > { %v558_v63 = vld [vmem:[#allocation5 + $0x1e8] sm:$0xff]  ;;  %v527_v3 = vld [vmem:[#allocation5 + $0xf0] sm:$0xff]  ;;  %v532_v4 = vld [vmem:[#allocation5 + $0x118] sm:$0xff]  ;;  %v6363_v6 = vpack.c.bf16 %v549_v60, %v545_v59  ;;  %6380 = vmatpush1.bf16.msra.mxu1 %v6379_v62 }
  0xd0   : > { %v536_v5 = vld [vmem:[#allocation5 + $0x138] sm:$0xff]  ;;  %v6365_v7 = vpack.c.bf16 %v558_v63, %v554_v61  ;;  %v553_v8 = vld [vmem:[#allocation5 + $0x1c0] sm:$0xff]  ;;  %v6383_v10 = vpack.c.bf16 %v527_v3, %v523_v2  ;;  %6382 = vmatprep.subr.bf16.mxu1 %v6381_v1  ;;  %v531_v12 = vld [vmem:[#allocation5 + $0x110] sm:$0xff] }
  0xd1   : > { %6352 = vmatpush1.bf16.msra.mxu0 %v6351_v26  ;;  %v557_v9 = vld [vmem:[#allocation5 + $0x1e0] sm:$0xff]  ;;  %v6385_v11 = vpack.c.bf16 %v536_v5, %v532_v4  ;;  %v535_v13 = vld [vmem:[#allocation5 + $0x130] sm:$0xff]  ;;  %v540_v14 = vld [vmem:[#allocation5 + $0x158] sm:$0xff] }
  0xd2   : > { %6354 = vmatprep.subr.bf16.mxu0 %v6353_v30  ;;  %v544_v15 = vld [vmem:[#allocation5 + $0x178] sm:$0xff]  ;;  %v6367_v16 = vpack.c.bf16 %v557_v9, %v553_v8  ;;  %v6387_v17 = vpack.c.bf16 %v535_v13, %v531_v12  ;;  %v6895_v18 = vld [vmem:[#allocation7 + $0x4] ss:$16 sps:$4 sm:$0xff]   ;;  %v6893_v25 = vld [vmem:[#allocation7] ss:$16 sps:$4 sm:$0xff]  }
  0xd3   : > { %6384 = vmatpush1.bf16.msra.mxu1 %v6383_v10  ;;  %v481_v19 = vld [vmem:[%s8069_s16] sm:$0xff]  ;;  %v6389_v20 = vpack.c.bf16 %v544_v15, %v540_v14  ;;  %v539_v21 = vld [vmem:[#allocation5 + $0x150] sm:$0xff]  ;;  %v548_v23 = vld [vmem:[#allocation5 + $0x198] sm:$0xff] }
  0xd4   : > { %6386 = vmatprep.subr.bf16.mxu1 %v6385_v11  ;;  %v543_v22 = vld [vmem:[#allocation5 + $0x170] sm:$0xff]  ;;  %v552_v24 = vld [vmem:[#allocation5 + $0x1b8] sm:$0xff]  ;;  %v482_v28 = vld [vmem:[%s8069_s16 + $0x8] sm:$0xff] }
  0xd5   : > { %6356 = vmatpush1.bf16.msra.mxu0 %v6355_v41  ;;  %v6391_v26 = vpack.c.bf16 %v543_v22, %v539_v21  ;;  %v6901_v27 = vld [vmem:[#allocation7 + $0x24] ss:$16 sps:$4 sm:$0xff]   ;;  %v6393_v29 = vpack.c.bf16 %v552_v24, %v548_v23  ;;  %v556_v32 = vld [vmem:[#allocation5 + $0x1d8] sm:$0xff]  ;;  %v6899_v34 = vld [vmem:[#allocation7 + $0x20] ss:$16 sps:$4 sm:$0xff]  }
  0xd6   : > { %6358 = vmatprep.subr.bf16.mxu0 %v6357_v46  ;;  %v547_v30 = vld [vmem:[#allocation5 + $0x190] sm:$0xff]  ;;  %v560_v33 = vld [vmem:[#allocation5 + $0x1f8] sm:$0xff]  ;;  %v485_v50 = vld [vmem:[%s8069_s16 + $0x20] sm:$0xff] }
  0xd7   : > { %6388 = vmatpush1.bf16.msra.mxu1 %v6387_v17  ;;  %v551_v31 = vld [vmem:[#allocation5 + $0x1b0] sm:$0xff]  ;;  %v6397_v37 = vpack.c.bf16 %v560_v33, %v556_v32  ;;  %v6898_v44 = vld [vmem:[#allocation7 + $0xc] ss:$16 sps:$4 sm:$0xff]   ;;  %v6896_v46 = vld [vmem:[#allocation7 + $0x8] ss:$16 sps:$4 sm:$0xff]  }
  0xd8   : > { %6390 = vmatprep.subr.bf16.mxu1 %v6389_v20  ;;  %v6395_v35 = vpack.c.bf16 %v551_v31, %v547_v30  ;;  %v6907_v36 = vld [vmem:[#allocation7 + $0x44] ss:$16 sps:$4 sm:$0xff]   ;;  %v6905_v41 = vld [vmem:[#allocation7 + $0x40] ss:$16 sps:$4 sm:$0xff]   ;;  %v484_v45 = vld [vmem:[%s8069_s16 + $0x18] sm:$0xff] }
  0xd9   : > { %6360 = vmatpush1.bf16.msra.mxu0 %v6359_v57  ;;  %v555_v38 = vld [vmem:[#allocation5 + $0x1d0] sm:$0xff]  ;;  %v6904_v47 = vld [vmem:[#allocation7 + $0x2c] ss:$16 sps:$4 sm:$0xff]   ;;  %v6902_v51 = vld [vmem:[#allocation7 + $0x28] ss:$16 sps:$4 sm:$0xff]  }
  0xda   : > { %6362 = vmatprep.subr.bf16.mxu0 %v6361_v58  ;;  %v559_v39 = vld [vmem:[#allocation5 + $0x1f0] sm:$0xff]  ;;  %v6910_v52 = vld [vmem:[#allocation7 + $0x4c] ss:$16 sps:$4 sm:$0xff]   ;;  %v6908_v56 = vld [vmem:[#allocation7 + $0x48] ss:$16 sps:$4 sm:$0xff]  }
  0xdb   : > { %6392 = vmatpush1.bf16.msra.mxu1 %v6391_v26  ;;  %v483_v40 = vld [vmem:[%s8069_s16 + $0x10] sm:$0xff]  ;;  %v6399_v42 = vpack.c.bf16 %v559_v39, %v555_v38  ;;  %v486_v55 = vld [vmem:[%s8069_s16 + $0x28] sm:$0xff]  ;;  %v488_v62 = vld [vmem:[%s8069_s16 + $0x38] sm:$0xff] }
  0xdc   : > { %6394 = vmatprep.subr.bf16.mxu1 %v6393_v29  ;;  %v6913_v43 = vld [vmem:[#allocation7 + $0x64] ss:$16 sps:$4 sm:$0xff]   ;;  %v6911_v48 = vld [vmem:[#allocation7 + $0x60] ss:$16 sps:$4 sm:$0xff]   ;;  %v6916_v57 = vld [vmem:[#allocation7 + $0x6c] ss:$16 sps:$4 sm:$0xff]  }
  0xdd   : > { %6364 = vmatpush1.bf16.msra.mxu0 %v6363_v6  ;;  %v6919_v49 = vld [vmem:[#allocation7 + $0x84] ss:$16 sps:$4 sm:$0xff]   ;;  %v6917_v53 = vld [vmem:[#allocation7 + $0x80] ss:$16 sps:$4 sm:$0xff]   ;;  %v6914_v61 = vld [vmem:[#allocation7 + $0x68] ss:$16 sps:$4 sm:$0xff]  }
  0xde   : > { %6366 = vmatprep.subr.bf16.mxu0 %v6365_v7  ;;  %v6925_v54 = vld [vmem:[#allocation7 + $0xa4] ss:$16 sps:$4 sm:$0xff]   ;;  %v6923_v58 = vld [vmem:[#allocation7 + $0xa0] ss:$16 sps:$4 sm:$0xff]   ;;  %v6922_v63 = vld [vmem:[#allocation7 + $0x8c] ss:$16 sps:$4 sm:$0xff]  }
  0xdf   : > { %6396 = vmatpush1.bf16.msra.mxu1 %v6395_v35  ;;  %v6931_v59 = vld [vmem:[#allocation7 + $0xc4] ss:$16 sps:$4 sm:$0xff]   ;;  %v6929_v1 = vld [vmem:[#allocation7 + $0xc0] ss:$16 sps:$4 sm:$0xff]   ;;  %v6920_v2 = vld [vmem:[#allocation7 + $0x88] ss:$16 sps:$4 sm:$0xff]  }
  0xe0   : > { %6398 = vmatprep.subr.bf16.mxu1 %v6397_v37  ;;  %v487_v60 = vld [vmem:[%s8069_s16 + $0x30] sm:$0xff]  ;;  %v6928_v4 = vld [vmem:[#allocation7 + $0xac] ss:$16 sps:$4 sm:$0xff]   ;;  %v489_v7 = vld [vmem:[%s8069_s16 + $0x40] sm:$0xff] }
  0xe1   : > { %6368 = vmatpush1.bf16.msra.mxu0 %v6367_v16  ;;  %v6937_v3 = vld [vmem:[#allocation7 + $0xe4] ss:$16 sps:$4 sm:$0xff]   ;;  %v6935_v5 = vld [vmem:[#allocation7 + $0xe0] ss:$16 sps:$4 sm:$0xff]   ;;  %v6926_v8 = vld [vmem:[#allocation7 + $0xa8] ss:$16 sps:$4 sm:$0xff]  }
  0xe2   : > { %1791 = vmatprep.subr.bf16.mxu0 %v6895_v18  ;;  %v6943_v6 = vld [vmem:[#allocation7 + $0x104] ss:$16 sps:$4 sm:$0xff]   ;;  %v6934_v9 = vld [vmem:[#allocation7 + $0xcc] ss:$16 sps:$4 sm:$0xff]   ;;  %v6941_v10 = vld [vmem:[#allocation7 + $0x100] ss:$16 sps:$4 sm:$0xff]  }
  0xe3   : > { %6400 = vmatpush1.bf16.msra.mxu1 %v6399_v42  ;;  %v6949_v11 = vld [vmem:[#allocation7 + $0x124] ss:$16 sps:$4 sm:$0xff]   ;;  %v490_v12 = vld [vmem:[%s8069_s16 + $0x48] sm:$0xff]  ;;  %v6947_v15 = vld [vmem:[#allocation7 + $0x120] ss:$16 sps:$4 sm:$0xff]  }
  0xe4   : > { %648 = vmatmul.mubr.f32.vlgmr.msra.gmra.mrb[0].mxu0 %v481_v19  ;;  %2017 = vmatprep.subr.bf16.mxu1 %v6898_v44  ;;  %v6932_v13 = vld [vmem:[#allocation7 + $0xc8] ss:$16 sps:$4 sm:$0xff]   ;;  %v6940_v14 = vld [vmem:[#allocation7 + $0xec] ss:$16 sps:$4 sm:$0xff]   ;;  %v6955_v16 = vld [vmem:[#allocation7 + $0x144] ss:$16 sps:$4 sm:$0xff]  }
  0xe5   : > { %653 = vmatprep.mubr.f32.mxu0 %v7765_v0  ;;  %1792 = vmatpush1.bf16.msra.mxu0 %v6893_v25  ;;  %v491_v17 = vld [vmem:[%s8069_s16 + $0x50] sm:$0xff]  ;;  %v6938_v18 = vld [vmem:[#allocation7 + $0xe8] ss:$16 sps:$4 sm:$0xff]   ;;  %v6952_v24 = vld [vmem:[#allocation7 + $0x12c] ss:$16 sps:$4 sm:$0xff]  }
  0xe6   : > { %1793 = vmatprep.subr.bf16.mxu0 %v6901_v27  ;;  %809 = vmatmul.mubr.f32.vlgmr.msra.gmra.mrb[0].mxu1 %v481_v19  ;;  %v6946_v19 = vld [vmem:[#allocation7 + $0x10c] ss:$16 sps:$4 sm:$0xff]   ;;  %v6953_v20 = vld [vmem:[#allocation7 + $0x140] ss:$16 sps:$4 sm:$0xff]   ;;  %v6961_v21 = vld [vmem:[#allocation7 + $0x164] ss:$16 sps:$4 sm:$0xff]  }
  0xe7   : > { %814 = vmatprep.mubr.f32.mxu1 %v7765_v0  ;;  %2018 = vmatpush1.bf16.msra.mxu1 %v6896_v46  ;;  %v492_v22 = vld [vmem:[%s8069_s16 + $0x58] sm:$0xff]  ;;  %v6959_v25 = vld [vmem:[#allocation7 + $0x160] ss:$16 sps:$4 sm:$0xff]   ;;  %v6967_v26 = vld [vmem:[#allocation7 + $0x184] ss:$16 sps:$4 sm:$0xff]  }
  0xe8   : > { %654 = vmatmul.mubr.f32.gmra.mrb[2].mxu0 %v482_v28  ;;  %2019 = vmatprep.subr.bf16.mxu1 %v6904_v47  ;;  %v6944_v23 = vld [vmem:[#allocation7 + $0x108] ss:$16 sps:$4 sm:$0xff]   ;;  %v493_v27 = vld [vmem:[%s8069_s16 + $0x60] sm:$0xff]  ;;  %v6958_v29 = vld [vmem:[#allocation7 + $0x14c] ss:$16 sps:$4 sm:$0xff]  }
  0xe9   : > { %659 = vmatprep.mubr.f32.mxu0 %v7765_v0  ;;  %1794 = vmatpush1.bf16.msra.mxu0 %v6899_v34  ;;  %v6965_v30 = vld [vmem:[#allocation7 + $0x180] ss:$16 sps:$4 sm:$0xff]   ;;  %v494_v31 = vld [vmem:[%s8069_s16 + $0x68] sm:$0xff]  ;;  %v496_v37 = vld [vmem:[%s8069_s16 + $0x78] sm:$0xff] }
  0xea   : > { %1795 = vmatprep.subr.bf16.mxu0 %v6907_v36  ;;  %815 = vmatmul.mubr.f32.gmra.mrb[2].mxu1 %v482_v28  ;;  %v6950_v28 = vld [vmem:[#allocation7 + $0x128] ss:$16 sps:$4 sm:$0xff]   ;;  %v6964_v33 = vld [vmem:[#allocation7 + $0x16c] ss:$16 sps:$4 sm:$0xff]   ;;  %v495_v34 = vld [vmem:[%s8069_s16 + $0x70] sm:$0xff]  ;;  %s5705_s16 = sshll.u32 %s8065_s22, 6 }
  0xeb   : > { %820 = vmatprep.mubr.f32.mxu1 %v7765_v0  ;;  %2020 = vmatpush1.bf16.msra.mxu1 %v6902_v51  ;;  %v6956_v32 = vld [vmem:[#allocation7 + $0x148] ss:$16 sps:$4 sm:$0xff]   ;;  %v6970_v36 = vld [vmem:[#allocation7 + $0x18c] ss:$16 sps:$4 sm:$0xff]   ;;  %v6973_v39 = vld [vmem:[#allocation7 + $0x1a4] ss:$16 sps:$4 sm:$0xff]  }
  0xec   : > { %660 = vmatmul.mubr.f32.gmra.mrb[4].mxu0 %v483_v40  ;;  %2021 = vmatprep.subr.bf16.mxu1 %v6910_v52  ;;  %v6962_v35 = vld [vmem:[#allocation7 + $0x168] ss:$16 sps:$4 sm:$0xff]   ;;  %v6982_v44 = vld [vmem:[#allocation7 + $0x1cc] ss:$16 sps:$4 sm:$0xff]   ;;  %v6985_v47 = vld [vmem:[#allocation7 + $0x1e4] ss:$16 sps:$4 sm:$0xff]   ;;  %v563_v52 = vlaneseq }
  0xed   : > { %665 = vmatprep.mubr.f32.mxu0 %v7765_v0  ;;  %1796 = vmatpush1.bf16.msra.mxu0 %v6905_v41  ;;  %v6968_v38 = vld [vmem:[#allocation7 + $0x188] ss:$16 sps:$4 sm:$0xff]   ;;  %v6971_v41 = vld [vmem:[#allocation7 + $0x1a0] ss:$16 sps:$4 sm:$0xff]   ;;  %v6994_v51 = vld [vmem:[#allocation7 + $0x20c] ss:$16 sps:$4 sm:$0xff]  }
  0xee   : > { %1797 = vmatprep.subr.bf16.mxu0 %v6913_v43  ;;  %821 = vmatmul.mubr.f32.gmra.mrb[4].mxu1 %v483_v40  ;;  %v6976_v40 = vld [vmem:[#allocation7 + $0x1ac] ss:$16 sps:$4 sm:$0xff]   ;;  %v6974_v42 = vld [vmem:[#allocation7 + $0x1a8] ss:$16 sps:$4 sm:$0xff]   ;;  %v6979_v43 = vld [vmem:[#allocation7 + $0x1c4] ss:$16 sps:$4 sm:$0xff]  }
  0xef   : > { %826 = vmatprep.mubr.f32.mxu1 %v7765_v0  ;;  %2022 = vmatpush1.bf16.msra.mxu1 %v6908_v56  ;;  %v6980_v46 = vld [vmem:[#allocation7 + $0x1c8] ss:$16 sps:$4 sm:$0xff]   ;;  %s8659_s24 = scalar_lea.vmem [#allocation13], %s5705_s16 }
  0xf0   : > { %666 = vmatmul.mubr.f32.gmra.mrb[6].mxu0 %v484_v45  ;;  %2023 = vmatprep.subr.bf16.mxu1 %v6916_v57  ;;  %s5566_s10 = sshll.u32 %s8659_s24, 4  ;;  %s8689_s10 = int_to_ptr.vmem [resolvable:$true] %s5566_s10 }
  0xf1   : > { %671 = vmatprep.mubr.f32.mxu0 %v7765_v0  ;;  %1798 = vmatpush1.bf16.msra.mxu0 %v6911_v48  ;;  %v6988_v48 = vld [vmem:[#allocation7 + $0x1ec] ss:$16 sps:$4 sm:$0xff]   ;;  %p7678_p11 = scmp.lt.s32.totalorder %s8689_s10, %s7676_s28 }
  0xf2   : > { %1799 = vmatprep.subr.bf16.mxu0 %v6919_v49  ;;  %827 = vmatmul.mubr.f32.gmra.mrb[6].mxu1 %v484_v45  ;;  %v6977_v45 = vld [vmem:[#allocation7 + $0x1c0] ss:$16 sps:$4 sm:$0xff]   ;;  %v6986_v49 = vld [vmem:[#allocation7 + $0x1e8] ss:$16 sps:$4 sm:$0xff]  }
  0xf3   : > { %832 = vmatprep.mubr.f32.mxu1 %v7765_v0  ;;  %2024 = vmatpush1.bf16.msra.mxu1 %v6914_v61 }
  0xf4   : > { %672 = vmatmul.mubr.f32.gmra.mrb[8].mxu0 %v485_v50  ;;  %2025 = vmatprep.subr.bf16.mxu1 %v6922_v63 }
  0xf5   : > { %677 = vmatprep.mubr.f32.mxu0 %v7765_v0  ;;  %1800 = vmatpush1.bf16.msra.mxu0 %v6917_v53  ;;  %v564_v53 = vshrl.u32 %v563_v52, 7 }
  0xf6   : > { %1801 = vmatprep.subr.bf16.mxu0 %v6925_v54  ;;  %833 = vmatmul.mubr.f32.gmra.mrb[8].mxu1 %v485_v50  ;;  %v6991_v50 = vld [vmem:[#allocation7 + $0x204] ss:$16 sps:$4 sm:$0xff]  }
  0xf7   : > { %838 = vmatprep.mubr.f32.mxu1 %v7765_v0  ;;  %2026 = vmatpush1.bf16.msra.mxu1 %v6920_v2  ;;  %v8135_v54 = vsub.s32 0, %v564_v53  ;;  %v8140_v56 = vsub.s32 1, %v564_v53 }
  0xf8   : > { %678 = vmatmul.mubr.f32.gmra.mrb[10].mxu0 %v486_v55  ;;  %2027 = vmatprep.subr.bf16.mxu1 %v6928_v4  ;;  %v8152_v4 = vsub.s32 2, %v564_v53 }
  0xf9   : > { %683 = vmatprep.mubr.f32.mxu0 %v7765_v0  ;;  %1802 = vmatpush1.bf16.msra.mxu0 %v6923_v58 }
  0xfa   : > { %1803 = vmatprep.subr.bf16.mxu0 %v6931_v59  ;;  %839 = vmatmul.mubr.f32.gmra.mrb[10].mxu1 %v486_v55  ;;  %v561_v55 = vld [vmem:[%s8736_s2] sm:$0xf] }
  0xfb   : > { %844 = vmatprep.mubr.f32.mxu1 %v7765_v0  ;;  %2028 = vmatpush1.bf16.msra.mxu1 %v6926_v8  ;;  %v8143_v57 = vrot.slane %v561_v55, %v8135_v54  ;;  %v8146_v59 = vrot.slane %v561_v55, %v8140_v56 }
  0xfc   : > { %684 = vmatmul.mubr.f32.gmra.mrb[12].mxu0 %v487_v60  ;;  %2029 = vmatprep.subr.bf16.mxu1 %v6934_v9 }
  0xfd   : > { %689 = vmatprep.mubr.f32.mxu0 %v7765_v0  ;;  %1804 = vmatpush1.bf16.msra.mxu0 %v6929_v1 }
  0xfe   : > { %1805 = vmatprep.subr.bf16.mxu0 %v6937_v3  ;;  %845 = vmatmul.mubr.f32.gmra.mrb[12].mxu1 %v487_v60 }
  0xff   : > { %850 = vmatprep.mubr.f32.mxu1 %v7765_v0  ;;  %2030 = vmatpush1.bf16.msra.mxu1 %v6932_v13 }
 0x100   : > { %690 = vmatmul.mubr.f32.gmra.mrb[14].mxu0 %v488_v62  ;;  %2031 = vmatprep.subr.bf16.mxu1 %v6940_v14  ;;  %v6989_v14 = vld [vmem:[#allocation7 + $0x200] ss:$16 sps:$4 sm:$0xff]  }
 0x101   : > { %695 = vmatprep.mubr.f32.mxu0 %v7765_v0  ;;  %1806 = vmatpush1.bf16.msra.mxu0 %v6935_v5 }
 0x102   : > { %1807 = vmatprep.subr.bf16.mxu0 %v6943_v6  ;;  %851 = vmatmul.mubr.f32.gmra.mrb[14].mxu1 %v488_v62 }
 0x103   : > { %856 = vmatprep.mubr.f32.mxu1 %v7765_v0  ;;  %2032 = vmatpush1.bf16.msra.mxu1 %v6938_v18  ;;  %v6997_v18 = vld [vmem:[#allocation7 + $0x224] ss:$16 sps:$4 sm:$0xff]  }
 0x104   : > { %696 = vmatmul.mubr.f32.gmra.mrb[16].mxu0 %v489_v7  ;;  %2033 = vmatprep.subr.bf16.mxu1 %v6946_v19  ;;  %v7000_v19 = vld [vmem:[#allocation7 + $0x22c] ss:$16 sps:$4 sm:$0xff]  }
 0x105   : > { %701 = vmatprep.mubr.f32.mxu0 %v7765_v0  ;;  %1808 = vmatpush1.bf16.msra.mxu0 %v6941_v10 }
 0x106   : > { %1809 = vmatprep.subr.bf16.mxu0 %v6949_v11  ;;  %857 = vmatmul.mubr.f32.gmra.mrb[16].mxu1 %v489_v7  ;;  %v8154_v7 = vsub.s32 3, %v564_v53 }
 0x107   : > { %862 = vmatprep.mubr.f32.mxu1 %v7765_v0  ;;  %2034 = vmatpush1.bf16.msra.mxu1 %v6944_v23 }
 0x108   : > { %702 = vmatmul.mubr.f32.gmra.mrb[18].mxu0 %v490_v12  ;;  %2035 = vmatprep.subr.bf16.mxu1 %v6952_v24 }
 0x109   : > { %707 = vmatprep.mubr.f32.mxu0 %v7765_v0  ;;  %1810 = vmatpush1.bf16.msra.mxu0 %v6947_v15  ;;  %v6992_v15 = vld [vmem:[#allocation7 + $0x208] ss:$16 sps:$4 sm:$0xff]  }
 0x10a   : > { %1811 = vmatprep.subr.bf16.mxu0 %v6955_v16  ;;  %863 = vmatmul.mubr.f32.gmra.mrb[18].mxu1 %v490_v12  ;;  %v8157_v16 = vrot.slane %v561_v55, %v8152_v4 }
 0x10b   : > { %868 = vmatprep.mubr.f32.mxu1 %v7765_v0  ;;  %2036 = vmatpush1.bf16.msra.mxu1 %v6950_v28  ;;  %v6998_v28 = vld [vmem:[#allocation7 + $0x228] ss:$16 sps:$4 sm:$0xff]  }
 0x10c   : > { %708 = vmatmul.mubr.f32.gmra.mrb[20].mxu0 %v491_v17  ;;  %2037 = vmatprep.subr.bf16.mxu1 %v6958_v29 }
 0x10d   : > { %713 = vmatprep.mubr.f32.mxu0 %v7765_v0  ;;  %1812 = vmatpush1.bf16.msra.mxu0 %v6953_v20  ;;  %v8161_v20 = vrot.slane %v561_v55, %v8154_v7 }
 0x10e   : > { %1813 = vmatprep.subr.bf16.mxu0 %v6961_v21  ;;  %869 = vmatmul.mubr.f32.gmra.mrb[20].mxu1 %v491_v17 }
 0x10f   : > { %874 = vmatprep.mubr.f32.mxu1 %v7765_v0  ;;  %2038 = vmatpush1.bf16.msra.mxu1 %v6956_v32 }
 0x110   : > { %714 = vmatmul.mubr.f32.gmra.mrb[22].mxu0 %v492_v22  ;;  %2039 = vmatprep.subr.bf16.mxu1 %v6964_v33  ;;  %v7003_v33 = vld [vmem:[#allocation7 + $0x244] ss:$16 sps:$4 sm:$0xff]  }
 0x111   : > { %719 = vmatprep.mubr.f32.mxu0 %v7765_v0  ;;  %1814 = vmatpush1.bf16.msra.mxu0 %v6959_v25 }
 0x112   : > { %1815 = vmatprep.subr.bf16.mxu0 %v6967_v26  ;;  %875 = vmatmul.mubr.f32.gmra.mrb[22].mxu1 %v492_v22 }
 0x113   : > { %880 = vmatprep.mubr.f32.mxu1 %v7765_v0  ;;  %2040 = vmatpush1.bf16.msra.mxu1 %v6962_v35 }
 0x114   : > { %720 = vmatmul.mubr.f32.gmra.mrb[24].mxu0 %v493_v27  ;;  %2041 = vmatprep.subr.bf16.mxu1 %v6970_v36 }
 0x115   : > { %725 = vmatprep.mubr.f32.mxu0 %v7765_v0  ;;  %1816 = vmatpush1.bf16.msra.mxu0 %v6965_v30 }
 0x116   : > { %881 = vmatmul.mubr.f32.gmra.mrb[24].mxu1 %v493_v27  ;;  %1817 = vmatprep.subr.bf16.mxu0 %v6973_v39  ;;  %v6995_v27 = vld [vmem:[#allocation7 + $0x220] ss:$16 sps:$4 sm:$0xff]  }
 0x117   : > { %886 = vmatprep.mubr.f32.mxu1 %v7765_v0  ;;  %2042 = vmatpush1.bf16.msra.mxu1 %v6968_v38 }
 0x118   : > { %726 = vmatmul.mubr.f32.gmra.mrb[26].mxu0 %v494_v31  ;;  %2043 = vmatprep.subr.bf16.mxu1 %v6976_v40 }
 0x119   : > { %731 = vmatprep.mubr.f32.mxu0 %v7765_v0  ;;  %1818 = vmatpush1.bf16.msra.mxu0 %v6971_v41 }
 0x11a   : > { %887 = vmatmul.mubr.f32.gmra.mrb[26].mxu1 %v494_v31  ;;  %1819 = vmatprep.subr.bf16.mxu0 %v6979_v43  ;;  %v7001_v43 = vld [vmem:[#allocation7 + $0x240] ss:$16 sps:$4 sm:$0xff]  }
 0x11b   : > { %892 = vmatprep.mubr.f32.mxu1 %v7765_v0  ;;  %2044 = vmatpush1.bf16.msra.mxu1 %v6974_v42 }
 0x11c   : > { %732 = vmatmul.mubr.f32.gmra.mrb[28].mxu0 %v495_v34  ;;  %2045 = vmatprep.subr.bf16.mxu1 %v6982_v44  ;;  %v7004_v44 = vld [vmem:[#allocation7 + $0x248] ss:$16 sps:$4 sm:$0xff]  }
 0x11d   : > { %737 = vmatprep.mubr.f32.mxu0 %v7765_v0  ;;  %1820 = vmatpush1.bf16.msra.mxu0 %v6977_v45 }
 0x11e   : > { %893 = vmatmul.mubr.f32.gmra.mrb[28].mxu1 %v495_v34  ;;  %1821 = vmatprep.subr.bf16.mxu0 %v6985_v47  ;;  %v7006_v34 = vld [vmem:[#allocation7 + $0x24c] ss:$16 sps:$4 sm:$0xff]  }
 0x11f   : > { %898 = vmatprep.mubr.f32.mxu1 %v7765_v0  ;;  %2046 = vmatpush1.bf16.msra.mxu1 %v6980_v46  ;;  %v6983_v0 = vld [vmem:[#allocation7 + $0x1e0] ss:$16 sps:$4 sm:$0xff]  }
 0x120   : > { %738 = vmatmul.mubr.f32.gmra.mrb[30].mxu0 %v496_v37  ;;  %2047 = vmatprep.subr.bf16.mxu1 %v6988_v48 }
 0x121   : > { %1822 = vmatpush1.bf16.msra.mxu0 %v6983_v0  ;;  %v7009_v0 = vld [vmem:[#allocation7 + $0x264] ss:$16 sps:$4 sm:$0xff]  }
 0x122   : > { %899 = vmatmul.mubr.f32.gmra.mrb[30].mxu1 %v496_v37  ;;  %1904 = vmatprep.subr.bf16.mxu0 %v6991_v50 }
 0x123   : > { %2048 = vmatpush1.bf16.msra.mxu1 %v6986_v49  ;;  %v7012_v49 = vld [vmem:[#allocation7 + $0x26c] ss:$16 sps:$4 sm:$0xff]  }
 0x124   : > { %2130 = vmatprep.subr.bf16.mxu1 %v6994_v51 }
 0x1b7   : > { %v649_v58 = vpop.f32.mrb[0].mxu0 }
 0x1b8   : > { %v651_v60 = vpop.f32.mrb[1].mxu0  ;;  %v650_v61 = vadd.f32 %v649_v58, %v8143_v57 }
 0x1b9   : > { %v652_v62 = vadd.f32 %v651_v60, %v8146_v59  ;;  %v810_v25 = vpop.f32.mrb[0].mxu1 }
 0x1ba   : > { %v905_v5 = vmax.f32 %v650_v61, 0.0  ;;  %v811_v29 = vadd.f32 %v810_v25, %v8157_v16  ;;  %v812_v30 = vpop.f32.mrb[1].mxu1 }
 0x1bb   : > { %v655_v63 = vpop.f32.mrb[2].mxu0  ;;  %v906_v8 = vmax.f32 %v652_v62, 0.0  ;;  %v813_v35 = vadd.f32 %v812_v30, %v8161_v20  ;;  %v7024_v30 = vld [vmem:[#allocation7 + $0x2ac] ss:$16 sps:$4 sm:$0xff]  }
 0x1bc   : > { %v656_v1 = vadd.f32 %v655_v63, %v8143_v57  ;;  %v657_v2 = vpop.f32.mrb[3].mxu0  ;;  %v907_v45 = vmax.f32 %v811_v29, 0.0  ;;  %v7021_v29 = vld [vmem:[#allocation7 + $0x2a4] ss:$16 sps:$4 sm:$0xff]  }
 0x1bd   : > { %v658_v3 = vadd.f32 %v657_v2, %v8146_v59  ;;  %v816_v41 = vpop.f32.mrb[2].mxu1  ;;  %v908_v50 = vmax.f32 %v813_v35, 0.0  ;;  %v7010_v2 = vld [vmem:[#allocation7 + $0x268] ss:$16 sps:$4 sm:$0xff]  }
 0x1be   : > { %v909_v6 = vmax.f32 %v656_v1, 0.0  ;;  %v817_v46 = vadd.f32 %v816_v41, %v8157_v16  ;;  %v818_v47 = vpop.f32.mrb[3].mxu1  ;;  %v7007_v1 = vld [vmem:[#allocation7 + $0x260] ss:$16 sps:$4 sm:$0xff]  }
 0x1bf   : > { %v910_v9 = vmax.f32 %v658_v3, 0.0  ;;  %v661_v10 = vpop.f32.mrb[4].mxu0  ;;  %v819_v51 = vadd.f32 %v818_v47, %v8161_v20  ;;  %v7019_v41 = vld [vmem:[#allocation7 + $0x2a0] ss:$16 sps:$4 sm:$0xff]  }
 0x1c0   : > { %v969_v11 = vpack.c.bf16 %v909_v6, %v905_v5  ;;  %v663_v12 = vpop.f32.mrb[5].mxu0  ;;  %v662_v17 = vadd.f32 %v661_v10, %v8143_v57  ;;  %v911_v55 = vmax.f32 %v817_v46, 0.0  ;;  %v7015_v10 = vld [vmem:[#allocation7 + $0x284] ss:$16 sps:$4 sm:$0xff]  }
 0x1c1   : > { %v970_v13 = vpack.c.bf16 %v910_v9, %v906_v8  ;;  %v664_v21 = vadd.f32 %v663_v12, %v8146_v59  ;;  %v912_v61 = vmax.f32 %v819_v51, 0.0  ;;  %v822_v62 = vpop.f32.mrb[4].mxu1 }
 0x1c2   : > { %v913_v31 = vmax.f32 %v662_v17, 0.0  ;;  %v8174_v3 = vpack.c.bf16 %v911_v55, %v907_v45  ;;  %v823_v5 = vadd.f32 %v822_v62, %v8157_v16  ;;  %v824_v6 = vpop.f32.mrb[5].mxu1  ;;  %v7025_v62 = vld [vmem:[#allocation7 + $0x2c0] ss:$16 sps:$4 sm:$0xff]  }
 0x1c3   : > { %v667_v22 = vpop.f32.mrb[6].mxu0  ;;  %1823 = vmatprep.mubr.bf16.mxu0 %v970_v13  ;;  %2049 = vmatprep.mubr.bf16.mxu1 %v970_v13  ;;  %v914_v36 = vmax.f32 %v664_v21, 0.0  ;;  %v8177_v12 = vpack.c.bf16 %v912_v61, %v908_v50  ;;  %v825_v13 = vadd.f32 %v824_v6, %v8161_v20 }
 0x1c4   : > { %v668_v23 = vadd.f32 %v667_v22, %v8143_v57  ;;  %v669_v24 = vpop.f32.mrb[7].mxu0  ;;  %1824 = vmatmul.mubr.bf16.vlgmr.msra.gmra.mrb[32].mxu0 %v969_v11  ;;  %2050 = vmatmul.mubr.bf16.vlgmr.msra.gmra.mrb[32].mxu1 %v969_v11  ;;  %v7018_v11 = vld [vmem:[#allocation7 + $0x28c] ss:$16 sps:$4 sm:$0xff]   ;;  %v915_v25 = vmax.f32 %v823_v5, 0.0 }
 0x1c5   : > { %v670_v26 = vadd.f32 %v669_v24, %v8146_v59  ;;  %1905 = vmatpush1.bf16.msra.mxu0 %v6989_v14  ;;  %2131 = vmatpush1.bf16.msra.mxu1 %v6992_v15  ;;  %v828_v21 = vpop.f32.mrb[6].mxu1  ;;  %v7016_v24 = vld [vmem:[#allocation7 + $0x288] ss:$16 sps:$4 sm:$0xff]  }
 0x1c6   : > { %v917_v32 = vmax.f32 %v668_v23, 0.0  ;;  %1906 = vmatprep.subr.bf16.mxu0 %v6997_v18  ;;  %2132 = vmatprep.subr.bf16.mxu1 %v7000_v19  ;;  %v7013_v23 = vld [vmem:[#allocation7 + $0x280] ss:$16 sps:$4 sm:$0xff]  }
 0x1c7   : > { %v918_v37 = vmax.f32 %v670_v26, 0.0  ;;  %v673_v38 = vpop.f32.mrb[8].mxu0  ;;  %v829_v26 = vadd.f32 %v828_v21, %v8157_v16 }
 0x1c8   : > { %v973_v39 = vpack.c.bf16 %v917_v32, %v913_v31  ;;  %v675_v40 = vpop.f32.mrb[9].mxu0  ;;  %v674_v48 = vadd.f32 %v673_v38, %v8143_v57  ;;  %v916_v31 = vmax.f32 %v825_v13, 0.0 }
 0x1c9   : > { %v974_v42 = vpack.c.bf16 %v918_v37, %v914_v36  ;;  %1907 = vmatpush1.bf16.msra.mxu0 %v6995_v27  ;;  %2133 = vmatpush1.bf16.msra.mxu1 %v6998_v28  ;;  %v676_v52 = vadd.f32 %v675_v40, %v8146_v59  ;;  %v830_v27 = vpop.f32.mrb[7].mxu1  ;;  %v919_v35 = vmax.f32 %v829_v26, 0.0 }
 0x1ca   : > { %1908 = vmatprep.subr.bf16.mxu0 %v7003_v33  ;;  %2134 = vmatprep.subr.bf16.mxu1 %v7006_v34  ;;  %v921_v8 = vmax.f32 %v674_v48, 0.0  ;;  %v831_v32 = vadd.f32 %v830_v27, %v8161_v20  ;;  %v7027_v48 = vld [vmem:[#allocation7 + $0x2c4] ss:$16 sps:$4 sm:$0xff]  }
 0x1cb   : > { %v679_v53 = vpop.f32.mrb[10].mxu0  ;;  %1833 = vmatprep.mubr.bf16.mxu0 %v974_v42  ;;  %2059 = vmatprep.mubr.bf16.mxu1 %v974_v42  ;;  %v922_v14 = vmax.f32 %v676_v52, 0.0  ;;  %v7022_v42 = vld [vmem:[#allocation7 + $0x2a8] ss:$16 sps:$4 sm:$0xff]  }
 0x1cc   : > { %v680_v58 = vadd.f32 %v679_v53, %v8143_v57  ;;  %v681_v60 = vpop.f32.mrb[11].mxu0  ;;  %1834 = vmatmul.mubr.bf16.gmra.mrb[36].mxu0 %v973_v39  ;;  %2060 = vmatmul.mubr.bf16.gmra.mrb[36].mxu1 %v973_v39  ;;  %v920_v38 = vmax.f32 %v831_v32, 0.0  ;;  %v834_v39 = vpop.f32.mrb[8].mxu1 }
 0x1cd   : > { %v682_v63 = vadd.f32 %v681_v60, %v8146_v59  ;;  %1909 = vmatpush1.bf16.msra.mxu0 %v7001_v43  ;;  %2135 = vmatpush1.bf16.msra.mxu1 %v7004_v44  ;;  %v8186_v43 = vpack.c.bf16 %v919_v35, %v915_v25  ;;  %v835_v44 = vadd.f32 %v834_v39, %v8157_v16  ;;  %v836_v45 = vpop.f32.mrb[9].mxu1 }
 0x1ce   : > { %v925_v9 = vmax.f32 %v680_v58, 0.0  ;;  %1910 = vmatprep.subr.bf16.mxu0 %v7009_v0  ;;  %2136 = vmatprep.subr.bf16.mxu1 %v7012_v49  ;;  %v7030_v0 = vld [vmem:[#allocation7 + $0x2cc] ss:$16 sps:$4 sm:$0xff]   ;;  %v8189_v49 = vpack.c.bf16 %v920_v38, %v916_v31  ;;  %v837_v50 = vadd.f32 %v836_v45, %v8161_v20  ;;  %v840_v60 = vpop.f32.mrb[10].mxu1 }
 0x1cf   : > { %v926_v15 = vmax.f32 %v682_v63, 0.0  ;;  %v685_v17 = vpop.f32.mrb[12].mxu0  ;;  %v7028_v63 = vld [vmem:[#allocation7 + $0x2c8] ss:$16 sps:$4 sm:$0xff]   ;;  %v842_v5 = vpop.f32.mrb[11].mxu1 }
 0x1d0   : > { %v977_v18 = vpack.c.bf16 %v925_v9, %v921_v8  ;;  %v687_v19 = vpop.f32.mrb[13].mxu0  ;;  %v686_v28 = vadd.f32 %v685_v17, %v8143_v57  ;;  %v7033_v8 = vld [vmem:[#allocation7 + $0x2e4] ss:$16 sps:$4 sm:$0xff]   ;;  %v7036_v9 = vld [vmem:[#allocation7 + $0x2ec] ss:$16 sps:$4 sm:$0xff]  }
 0x1d1   : > { %v978_v22 = vpack.c.bf16 %v926_v15, %v922_v14  ;;  %1911 = vmatpush1.bf16.msra.mxu0 %v7007_v1  ;;  %2137 = vmatpush1.bf16.msra.mxu1 %v7010_v2  ;;  %v688_v33 = vadd.f32 %v687_v19, %v8146_v59  ;;  %v923_v1 = vmax.f32 %v835_v44, 0.0  ;;  %v841_v2 = vadd.f32 %v840_v60, %v8157_v16  ;;  %v846_v21 = vpop.f32.mrb[12].mxu1  ;;  %v7042_v31 = vld [vmem:[#allocation7 + $0x30c] ss:$16 sps:$4 sm:$0xff]  }
 0x1d2   : > { %1912 = vmatprep.subr.bf16.mxu0 %v7015_v10  ;;  %2138 = vmatprep.subr.bf16.mxu1 %v7018_v11  ;;  %v929_v46 = vmax.f32 %v686_v28, 0.0  ;;  %v924_v10 = vmax.f32 %v837_v50, 0.0  ;;  %v843_v11 = vadd.f32 %v842_v5, %v8161_v20  ;;  %v847_v26 = vadd.f32 %v846_v21, %v8157_v16  ;;  %v848_v27 = vpop.f32.mrb[13].mxu1 }
 0x1d3   : > { %v691_v34 = vpop.f32.mrb[14].mxu0  ;;  %1843 = vmatprep.mubr.bf16.mxu0 %v978_v22  ;;  %2069 = vmatprep.mubr.bf16.mxu1 %v978_v22  ;;  %v930_v51 = vmax.f32 %v688_v33, 0.0  ;;  %v927_v15 = vmax.f32 %v841_v2, 0.0  ;;  %v849_v33 = vadd.f32 %v848_v27, %v8161_v20  ;;  %v7046_v2 = vld [vmem:[#allocation7 + $0x328] ss:$16 sps:$4 sm:$0xff]  }
 0x1d4   : > { %v692_v36 = vadd.f32 %v691_v34, %v8143_v57  ;;  %v693_v37 = vpop.f32.mrb[15].mxu0  ;;  %1844 = vmatmul.mubr.bf16.gmra.mrb[40].mxu0 %v977_v18  ;;  %2070 = vmatmul.mubr.bf16.gmra.mrb[40].mxu1 %v977_v18  ;;  %v928_v19 = vmax.f32 %v843_v11, 0.0  ;;  %v931_v44 = vmax.f32 %v847_v26, 0.0  ;;  %v7051_v11 = vld [vmem:[#allocation7 + $0x344] ss:$16 sps:$4 sm:$0xff]  }
 0x1d5   : > { %v694_v40 = vadd.f32 %v693_v37, %v8146_v59  ;;  %1913 = vmatpush1.bf16.msra.mxu0 %v7013_v23  ;;  %2139 = vmatpush1.bf16.msra.mxu1 %v7016_v24  ;;  %v7031_v23 = vld [vmem:[#allocation7 + $0x2e0] ss:$16 sps:$4 sm:$0xff]   ;;  %v7034_v24 = vld [vmem:[#allocation7 + $0x2e8] ss:$16 sps:$4 sm:$0xff]   ;;  %v8198_v25 = vpack.c.bf16 %v927_v15, %v923_v1  ;;  %v852_v39 = vpop.f32.mrb[14].mxu1  ;;  %v932_v50 = vmax.f32 %v849_v33, 0.0 }
 0x1d6   : > { %v933_v47 = vmax.f32 %v692_v36, 0.0  ;;  %1914 = vmatprep.subr.bf16.mxu0 %v7021_v29  ;;  %2140 = vmatprep.subr.bf16.mxu1 %v7024_v30  ;;  %v7039_v30 = vld [vmem:[#allocation7 + $0x304] ss:$16 sps:$4 sm:$0xff]   ;;  %v8201_v32 = vpack.c.bf16 %v928_v19, %v924_v10  ;;  %v853_v45 = vadd.f32 %v852_v39, %v8157_v16  ;;  %v7043_v1 = vld [vmem:[#allocation7 + $0x320] ss:$16 sps:$4 sm:$0xff]  }
 0x1d7   : > { %v934_v52 = vmax.f32 %v694_v40, 0.0  ;;  %v697_v53 = vpop.f32.mrb[16].mxu0  ;;  %v7049_v26 = vld [vmem:[#allocation7 + $0x340] ss:$16 sps:$4 sm:$0xff]   ;;  %v7052_v27 = vld [vmem:[#allocation7 + $0x348] ss:$16 sps:$4 sm:$0xff]  }
 0x1d8   : > { %v981_v55 = vpack.c.bf16 %v933_v47, %v929_v46  ;;  %v699_v58 = vpop.f32.mrb[17].mxu0  ;;  %v698_v6 = vadd.f32 %v697_v53, %v8143_v57  ;;  %v854_v46 = vpop.f32.mrb[15].mxu1  ;;  %v7057_v33 = vld [vmem:[#allocation7 + $0x364] ss:$16 sps:$4 sm:$0xff]  }
 0x1d9   : > { %v982_v61 = vpack.c.bf16 %v934_v52, %v930_v51  ;;  %1915 = vmatpush1.bf16.msra.mxu0 %v7019_v41  ;;  %2141 = vmatpush1.bf16.msra.mxu1 %v7022_v42  ;;  %v700_v13 = vadd.f32 %v699_v58, %v8146_v59  ;;  %v7037_v41 = vld [vmem:[#allocation7 + $0x300] ss:$16 sps:$4 sm:$0xff]   ;;  %v7040_v42 = vld [vmem:[#allocation7 + $0x308] ss:$16 sps:$4 sm:$0xff]   ;;  %v855_v51 = vadd.f32 %v854_v46, %v8161_v20 }
 0x1da   : > { %1916 = vmatprep.subr.bf16.mxu0 %v7027_v48  ;;  %2142 = vmatprep.subr.bf16.mxu1 %v7030_v0  ;;  %v937_v28 = vmax.f32 %v698_v6, 0.0  ;;  %v7045_v48 = vld [vmem:[#allocation7 + $0x324] ss:$16 sps:$4 sm:$0xff]   ;;  %v7048_v0 = vld [vmem:[#allocation7 + $0x32c] ss:$16 sps:$4 sm:$0xff]  }
 0x1db   : > { %v703_v14 = vpop.f32.mrb[18].mxu0  ;;  %1853 = vmatprep.mubr.bf16.mxu0 %v982_v61  ;;  %2079 = vmatprep.mubr.bf16.mxu1 %v982_v61  ;;  %v938_v34 = vmax.f32 %v700_v13, 0.0  ;;  %v936_v61 = vmax.f32 %v855_v51, 0.0  ;;  %v7054_v13 = vld [vmem:[#allocation7 + $0x34c] ss:$16 sps:$4 sm:$0xff]  }
 0x1dc   : > { %v704_v17 = vadd.f32 %v703_v14, %v8143_v57  ;;  %v705_v18 = vpop.f32.mrb[19].mxu0  ;;  %1854 = vmatmul.mubr.bf16.gmra.mrb[44].mxu0 %v981_v55  ;;  %2080 = vmatmul.mubr.bf16.gmra.mrb[44].mxu1 %v981_v55  ;;  %v935_v55 = vmax.f32 %v853_v45, 0.0  ;;  %v7055_v46 = vld [vmem:[#allocation7 + $0x360] ss:$16 sps:$4 sm:$0xff]  }
 0x1dd   : > { %v706_v22 = vadd.f32 %v705_v18, %v8146_v59  ;;  %1917 = vmatpush1.bf16.msra.mxu0 %v7025_v62  ;;  %2143 = vmatpush1.bf16.msra.mxu1 %v7028_v63  ;;  %v858_v62 = vpop.f32.mrb[16].mxu1  ;;  %v8213_v14 = vpack.c.bf16 %v936_v61, %v932_v50 }
 0x1de   : > { %v941_v29 = vmax.f32 %v704_v17, 0.0  ;;  %1918 = vmatprep.subr.bf16.mxu0 %v7033_v8  ;;  %2144 = vmatprep.subr.bf16.mxu1 %v7036_v9  ;;  %v8210_v5 = vpack.c.bf16 %v935_v55, %v931_v44  ;;  %v859_v6 = vadd.f32 %v858_v62, %v8157_v16  ;;  %v860_v8 = vpop.f32.mrb[17].mxu1  ;;  %v7066_v55 = vld [vmem:[#allocation7 + $0x38c] ss:$16 sps:$4 sm:$0xff]  }
 0x1df   : > { %v942_v35 = vmax.f32 %v706_v22, 0.0  ;;  %v709_v36 = vpop.f32.mrb[20].mxu0  ;;  %v861_v15 = vadd.f32 %v860_v8, %v8161_v20 }
 0x1e0   : > { %v985_v37 = vpack.c.bf16 %v941_v29, %v937_v28  ;;  %v711_v38 = vpop.f32.mrb[21].mxu0  ;;  %v710_v47 = vadd.f32 %v709_v36, %v8143_v57  ;;  %v939_v28 = vmax.f32 %v859_v6, 0.0 }
 0x1e1   : > { %v986_v40 = vpack.c.bf16 %v942_v35, %v938_v34  ;;  %1919 = vmatpush1.bf16.msra.mxu0 %v7031_v23  ;;  %2145 = vmatpush1.bf16.msra.mxu1 %v7034_v24  ;;  %v712_v52 = vadd.f32 %v711_v38, %v8146_v59  ;;  %v864_v23 = vpop.f32.mrb[18].mxu1  ;;  %v7060_v34 = vld [vmem:[#allocation7 + $0x36c] ss:$16 sps:$4 sm:$0xff]   ;;  %v940_v35 = vmax.f32 %v861_v15, 0.0 }
 0x1e2   : > { %1920 = vmatprep.subr.bf16.mxu0 %v7039_v30  ;;  %2146 = vmatprep.subr.bf16.mxu1 %v7042_v31  ;;  %v945_v9 = vmax.f32 %v710_v47, 0.0  ;;  %v865_v29 = vadd.f32 %v864_v23, %v8157_v16  ;;  %v866_v30 = vpop.f32.mrb[19].mxu1  ;;  %v7058_v47 = vld [vmem:[#allocation7 + $0x368] ss:$16 sps:$4 sm:$0xff]  }
 0x1e3   : > { %v715_v53 = vpop.f32.mrb[22].mxu0  ;;  %1863 = vmatprep.mubr.bf16.mxu0 %v986_v40  ;;  %2089 = vmatprep.mubr.bf16.mxu1 %v986_v40  ;;  %v946_v17 = vmax.f32 %v712_v52, 0.0  ;;  %v867_v36 = vadd.f32 %v866_v30, %v8161_v20  ;;  %v870_v44 = vpop.f32.mrb[20].mxu1 }
 0x1e4   : > { %v716_v58 = vadd.f32 %v715_v53, %v8143_v57  ;;  %v717_v60 = vpop.f32.mrb[23].mxu0  ;;  %1864 = vmatmul.mubr.bf16.gmra.mrb[48].mxu0 %v985_v37  ;;  %2090 = vmatmul.mubr.bf16.gmra.mrb[48].mxu1 %v985_v37  ;;  %v943_v39 = vmax.f32 %v865_v29, 0.0  ;;  %v872_v50 = vpop.f32.mrb[21].mxu1  ;;  %v7063_v53 = vld [vmem:[#allocation7 + $0x384] ss:$16 sps:$4 sm:$0xff]  }
 0x1e5   : > { %v718_v63 = vadd.f32 %v717_v60, %v8146_v59  ;;  %1921 = vmatpush1.bf16.msra.mxu0 %v7037_v41  ;;  %2147 = vmatpush1.bf16.msra.mxu1 %v7040_v42  ;;  %v944_v42 = vmax.f32 %v867_v36, 0.0  ;;  %v873_v60 = vadd.f32 %v872_v50, %v8161_v20  ;;  %v876_v6 = vpop.f32.mrb[22].mxu1  ;;  %v7076_v50 = vld [vmem:[#allocation7 + $0x3c8] ss:$16 sps:$4 sm:$0xff]  }
 0x1e6   : > { %v949_v10 = vmax.f32 %v716_v58, 0.0  ;;  %1922 = vmatprep.subr.bf16.mxu0 %v7045_v48  ;;  %2148 = vmatprep.subr.bf16.mxu1 %v7048_v0  ;;  %v8222_v48 = vpack.c.bf16 %v943_v39, %v939_v28  ;;  %v871_v0 = vadd.f32 %v870_v44, %v8157_v16  ;;  %v878_v15 = vpop.f32.mrb[23].mxu1 }
 0x1e7   : > { %v950_v18 = vmax.f32 %v718_v63, 0.0  ;;  %v721_v19 = vpop.f32.mrb[24].mxu0  ;;  %v8225_v58 = vpack.c.bf16 %v944_v42, %v940_v35 }
 0x1e8   : > { %v989_v21 = vpack.c.bf16 %v949_v10, %v945_v9  ;;  %v723_v22 = vpop.f32.mrb[25].mxu0  ;;  %v722_v31 = vadd.f32 %v721_v19, %v8143_v57  ;;  %v7061_v9 = vld [vmem:[#allocation7 + $0x380] ss:$16 sps:$4 sm:$0xff]   ;;  %v7064_v10 = vld [vmem:[#allocation7 + $0x388] ss:$16 sps:$4 sm:$0xff]  }
 0x1e9   : > { %v990_v24 = vpack.c.bf16 %v950_v18, %v946_v17  ;;  %1923 = vmatpush1.bf16.msra.mxu0 %v7043_v1  ;;  %2149 = vmatpush1.bf16.msra.mxu1 %v7046_v2  ;;  %v724_v37 = vadd.f32 %v723_v22, %v8146_v59  ;;  %v7069_v18 = vld [vmem:[#allocation7 + $0x3a4] ss:$16 sps:$4 sm:$0xff]   ;;  %v7072_v19 = vld [vmem:[#allocation7 + $0x3ac] ss:$16 sps:$4 sm:$0xff]   ;;  %v879_v22 = vadd.f32 %v878_v15, %v8161_v20  ;;  %v882_v30 = vpop.f32.mrb[24].mxu1 }
 0x1ea   : > { %1924 = vmatprep.subr.bf16.mxu0 %v7051_v11  ;;  %2150 = vmatprep.subr.bf16.mxu1 %v7054_v13  ;;  %v953_v51 = vmax.f32 %v722_v31, 0.0  ;;  %v947_v11 = vmax.f32 %v871_v0, 0.0  ;;  %v877_v13 = vadd.f32 %v876_v6, %v8157_v16  ;;  %v883_v36 = vadd.f32 %v882_v30, %v8157_v16  ;;  %v7073_v0 = vld [vmem:[#allocation7 + $0x3c0] ss:$16 sps:$4 sm:$0xff]   ;;  %v7096_v30 = vld [vmem:[#allocation8 + $0x2c] ss:$16 sps:$4 sm:$0xff]  }
 0x1eb   : > { %v727_v38 = vpop.f32.mrb[26].mxu0  ;;  %1873 = vmatprep.mubr.bf16.mxu0 %v990_v24  ;;  %2099 = vmatprep.mubr.bf16.mxu1 %v990_v24  ;;  %v954_v61 = vmax.f32 %v724_v37, 0.0  ;;  %v952_v29 = vmax.f32 %v879_v22, 0.0  ;;  %v884_v37 = vpop.f32.mrb[25].mxu1  ;;  %v7079_v6 = vld [vmem:[#allocation7 + $0x3e0] ss:$16 sps:$4 sm:$0xff]  }
 0x1ec   : > { %v728_v40 = vadd.f32 %v727_v38, %v8143_v57  ;;  %v729_v41 = vpop.f32.mrb[27].mxu0  ;;  %1874 = vmatmul.mubr.bf16.gmra.mrb[52].mxu0 %v989_v21  ;;  %2100 = vmatmul.mubr.bf16.gmra.mrb[52].mxu1 %v989_v21  ;;  %v948_v21 = vmax.f32 %v873_v60, 0.0  ;;  %v885_v42 = vadd.f32 %v884_v37, %v8161_v20  ;;  %v7102_v37 = vld [vmem:[#allocation8 + $0x4c] ss:$16 sps:$4 sm:$0xff]  }
 0x1ed   : > { %v730_v45 = vadd.f32 %v729_v41, %v8146_v59  ;;  %1925 = vmatpush1.bf16.msra.mxu0 %v7049_v26  ;;  %2151 = vmatpush1.bf16.msra.mxu1 %v7052_v27  ;;  %v951_v26 = vmax.f32 %v877_v13, 0.0 }
 0x1ee   : > { %v957_v52 = vmax.f32 %v728_v40, 0.0  ;;  %1926 = vmatprep.subr.bf16.mxu0 %v7057_v33  ;;  %2152 = vmatprep.subr.bf16.mxu1 %v7060_v34  ;;  %v7067_v33 = vld [vmem:[#allocation7 + $0x3a0] ss:$16 sps:$4 sm:$0xff]   ;;  %v7070_v34 = vld [vmem:[#allocation7 + $0x3a8] ss:$16 sps:$4 sm:$0xff]   ;;  %v8237_v41 = vpack.c.bf16 %v952_v29, %v948_v21 }
 0x1ef   : > { %v958_v62 = vmax.f32 %v730_v45, 0.0  ;;  %v733_v63 = vpop.f32.mrb[28].mxu0  ;;  %v8234_v35 = vpack.c.bf16 %v951_v26, %v947_v11  ;;  %v7078_v40 = vld [vmem:[#allocation7 + $0x3cc] ss:$16 sps:$4 sm:$0xff]   ;;  %v7093_v29 = vld [vmem:[#allocation8 + $0x24] ss:$16 sps:$4 sm:$0xff]  }
 0x1f0   : > { %v993_v1 = vpack.c.bf16 %v957_v52, %v953_v51  ;;  %v735_v2 = vpop.f32.mrb[29].mxu0  ;;  %v734_v17 = vadd.f32 %v733_v63, %v8143_v57  ;;  %v955_v51 = vmax.f32 %v883_v36, 0.0  ;;  %v7099_v36 = vld [vmem:[#allocation8 + $0x44] ss:$16 sps:$4 sm:$0xff]  }
 0x1f1   : > { %v994_v8 = vpack.c.bf16 %v958_v62, %v954_v61  ;;  %1927 = vmatpush1.bf16.msra.mxu0 %v7055_v46  ;;  %2153 = vmatpush1.bf16.msra.mxu1 %v7058_v47  ;;  %v736_v23 = vadd.f32 %v735_v2, %v8146_v59  ;;  %v888_v46 = vpop.f32.mrb[26].mxu1  ;;  %v7081_v61 = vld [vmem:[#allocation7 + $0x3e4] ss:$16 sps:$4 sm:$0xff]   ;;  %v7084_v62 = vld [vmem:[#allocation7 + $0x3ec] ss:$16 sps:$4 sm:$0xff]  }
 0x1f2   : > { %1928 = vmatprep.subr.bf16.mxu0 %v7063_v53  ;;  %2154 = vmatprep.subr.bf16.mxu1 %v7066_v55  ;;  %v961_v38 = vmax.f32 %v734_v17, 0.0  ;;  %v889_v52 = vadd.f32 %v888_v46, %v8157_v16  ;;  %v890_v53 = vpop.f32.mrb[27].mxu1  ;;  %v956_v55 = vmax.f32 %v885_v42, 0.0  ;;  %v7087_v17 = vld [vmem:[#allocation8 + $0x4] ss:$16 sps:$4 sm:$0xff]  }
 0x1f3   : > { %v739_v24 = vpop.f32.mrb[30].mxu0  ;;  %1883 = vmatprep.mubr.bf16.mxu0 %v994_v8  ;;  %2109 = vmatprep.mubr.bf16.mxu1 %v994_v8  ;;  %v891_v60 = vadd.f32 %v890_v53, %v8161_v20  ;;  %v894_v2 = vpop.f32.mrb[28].mxu1  ;;  %v7082_v8 = vld [vmem:[#allocation7 + $0x3e8] ss:$16 sps:$4 sm:$0xff]   ;;  %v7111_v42 = vld [vmem:[#allocation8 + $0x84] ss:$16 sps:$4 sm:$0xff]  }
 0x1f4   : > { %v740_v27 = vadd.f32 %v739_v24, %v8143_v57  ;;  %v741_v28 = vpop.f32.mrb[31].mxu0  ;;  %1884 = vmatmul.mubr.bf16.gmra.mrb[56].mxu0 %v993_v1  ;;  %2110 = vmatmul.mubr.bf16.gmra.mrb[56].mxu1 %v993_v1  ;;  %v7075_v57 = vld [vmem:[#allocation7 + $0x3c4] ss:$16 sps:$4 sm:$0xff]   ;;  %v959_v63 = vmax.f32 %v889_v52, 0.0  ;;  %v896_v11 = vpop.f32.mrb[29].mxu1 }
 0x1f5   : > { %v742_v31 = vadd.f32 %v741_v28, %v8146_v59  ;;  %1929 = vmatpush1.bf16.msra.mxu0 %v7061_v9  ;;  %2155 = vmatpush1.bf16.msra.mxu1 %v7064_v10  ;;  %v962_v59 = vmax.f32 %v736_v23, 0.0  ;;  %v960_v1 = vmax.f32 %v891_v60, 0.0  ;;  %v895_v10 = vadd.f32 %v894_v2, %v8157_v16  ;;  %v7117_v46 = vld [vmem:[#allocation8 + $0xa4] ss:$16 sps:$4 sm:$0xff]   ;;  %v7124_v52 = vld [vmem:[#allocation8 + $0xc8] ss:$16 sps:$4 sm:$0xff]  }
 0x1f6   : > { %v965_v39 = vmax.f32 %v740_v27, 0.0  ;;  %1930 = vmatprep.subr.bf16.mxu0 %v7069_v18  ;;  %2156 = vmatprep.subr.bf16.mxu1 %v7072_v19  ;;  %v8242_v9 = vpack.c.bf16 %v959_v63, %v955_v51  ;;  %v897_v15 = vadd.f32 %v896_v11, %v8161_v20  ;;  %v7090_v18 = vld [vmem:[#allocation8 + $0xc] ss:$16 sps:$4 sm:$0xff]   ;;  %v900_v19 = vpop.f32.mrb[30].mxu1  ;;  %v7085_v27 = vld [vmem:[#allocation8] ss:$16 sps:$4 sm:$0xff]  }
 0x1f7   : > { %v966_v44 = vmax.f32 %v742_v31, 0.0  ;;  %v8247_v13 = vpack.c.bf16 %v960_v1, %v956_v55  ;;  %v963_v21 = vmax.f32 %v895_v10, 0.0  ;;  %v901_v22 = vadd.f32 %v900_v19, %v8157_v16  ;;  %v902_v23 = vpop.f32.mrb[31].mxu1  ;;  %v7121_v51 = vld [vmem:[#allocation8 + $0xc0] ss:$16 sps:$4 sm:$0xff]  }
 0x1f8   : > { %v997_v45 = vpack.c.bf16 %v965_v39, %v961_v38  ;;  %v964_v24 = vmax.f32 %v897_v15, 0.0  ;;  %v903_v26 = vadd.f32 %v902_v23, %v8161_v20  ;;  %v7091_v20 = vld [vmem:[#allocation8 + $0x20] ss:$16 sps:$4 sm:$0xff]   ;;  %v7100_v38 = vld [vmem:[#allocation8 + $0x48] ss:$16 sps:$4 sm:$0xff]  }
 0x1f9   : > { %v998_v47 = vpack.c.bf16 %v966_v44, %v962_v59  ;;  %1931 = vmatpush1.bf16.msra.mxu0 %v7067_v33  ;;  %2157 = vmatpush1.bf16.msra.mxu1 %v7070_v34  ;;  %v967_v28 = vmax.f32 %v901_v22, 0.0  ;;  %v7094_v34 = vld [vmem:[#allocation8 + $0x28] ss:$16 sps:$4 sm:$0xff]   ;;  %v7105_v39 = vld [vmem:[#allocation8 + $0x64] ss:$16 sps:$4 sm:$0xff]  }
 0x1fa   : > { %1932 = vmatprep.subr.bf16.mxu0 %v7075_v57  ;;  %2158 = vmatprep.subr.bf16.mxu1 %v7078_v40  ;;  %v968_v31 = vmax.f32 %v903_v26, 0.0  ;;  %v7103_v57 = vld [vmem:[#allocation8 + $0x60] ss:$16 sps:$4 sm:$0xff]   ;;  %v7106_v40 = vld [vmem:[#allocation8 + $0x68] ss:$16 sps:$4 sm:$0xff]  }
 0x1fb   : > { %1893 = vmatprep.mubr.bf16.mxu0 %v998_v47  ;;  %2119 = vmatprep.mubr.bf16.mxu1 %v998_v47  ;;  %v8256_v16 = vpack.c.bf16 %v967_v28, %v963_v21  ;;  %v7114_v59 = vld [vmem:[#allocation8 + $0x8c] ss:$16 sps:$4 sm:$0xff]   ;;  %v7109_v44 = vld [vmem:[#allocation8 + $0x80] ss:$16 sps:$4 sm:$0xff]   ;;  %v7118_v47 = vld [vmem:[#allocation8 + $0xa8] ss:$16 sps:$4 sm:$0xff]  }
 0x1fc   : > { %1894 = vmatmul.mubr.bf16.gmra.mrb[60].mxu0 %v997_v45  ;;  %2120 = vmatmul.mubr.bf16.gmra.mrb[60].mxu1 %v997_v45  ;;  %v8258_v33 = vpack.c.bf16 %v968_v31, %v964_v24  ;;  %v7112_v45 = vld [vmem:[#allocation8 + $0x88] ss:$16 sps:$4 sm:$0xff]   ;;  %v7129_v53 = vld [vmem:[#allocation8 + $0xe4] ss:$16 sps:$4 sm:$0xff]   ;;  %v7145_v10 = vld [vmem:[#allocation8 + $0x140] ss:$16 sps:$4 sm:$0xff]  }
 0x1fd   : > { %1933 = vmatpush1.bf16.msra.mxu0 %v7073_v0  ;;  %2159 = vmatpush1.bf16.msra.mxu1 %v7076_v50  ;;  %v7123_v0 = vld [vmem:[#allocation8 + $0xc4] ss:$16 sps:$4 sm:$0xff]   ;;  %v7126_v50 = vld [vmem:[#allocation8 + $0xcc] ss:$16 sps:$4 sm:$0xff]   ;;  %v7130_v55 = vld [vmem:[#allocation8 + $0xe8] ss:$16 sps:$4 sm:$0xff]  }
 0x1fe   : > { %1936 = vmatprep.mubr.bf16.mxu0 %v8177_v12  ;;  %2162 = vmatprep.mubr.bf16.mxu1 %v8177_v12  ;;  %v7088_v12 = vld [vmem:[#allocation8 + $0x8] ss:$16 sps:$4 sm:$0xff]   ;;  %v7135_v60 = vld [vmem:[#allocation8 + $0x104] ss:$16 sps:$4 sm:$0xff]   ;;  %v7162_v19 = vld [vmem:[#allocation8 + $0x18c] ss:$16 sps:$4 sm:$0xff]  }
 0x1ff   : > { %1934 = vmatprep.subr.bf16.mxu0 %v7081_v61  ;;  %2160 = vmatprep.subr.bf16.mxu1 %v7084_v62  ;;  %v7138_v61 = vld [vmem:[#allocation8 + $0x10c] ss:$16 sps:$4 sm:$0xff]   ;;  %v7133_v62 = vld [vmem:[#allocation8 + $0x100] ss:$16 sps:$4 sm:$0xff]   ;;  %v7136_v63 = vld [vmem:[#allocation8 + $0x108] ss:$16 sps:$4 sm:$0xff]  }
 0x200   : > { %v7141_v1 = vld [vmem:[#allocation8 + $0x124] ss:$16 sps:$4 sm:$0xff]   ;;  %v7142_v2 = vld [vmem:[#allocation8 + $0x128] ss:$16 sps:$4 sm:$0xff]   ;;  %v7157_v21 = vld [vmem:[#allocation8 + $0x180] ss:$16 sps:$4 sm:$0xff]  }
 0x201   : > { %1935 = vmatpush1.bf16.msra.mxu0 %v7079_v6  ;;  %2161 = vmatpush1.bf16.msra.mxu1 %v7082_v8  ;;  %v7147_v6 = vld [vmem:[#allocation8 + $0x144] ss:$16 sps:$4 sm:$0xff]   ;;  %v7150_v8 = vld [vmem:[#allocation8 + $0x14c] ss:$16 sps:$4 sm:$0xff]   ;;  %v7148_v11 = vld [vmem:[#allocation8 + $0x148] ss:$16 sps:$4 sm:$0xff]  }
 0x202   : > { %3129 = vmatprep.subr.bf16.mxu0 %v7087_v17  ;;  %3355 = vmatprep.subr.bf16.mxu1 %v7090_v18  ;;  %v7153_v15 = vld [vmem:[#allocation8 + $0x164] ss:$16 sps:$4 sm:$0xff]   ;;  %v7154_v17 = vld [vmem:[#allocation8 + $0x168] ss:$16 sps:$4 sm:$0xff]  }
 0x203   : > { %v7159_v18 = vld [vmem:[#allocation8 + $0x184] ss:$16 sps:$4 sm:$0xff]   ;;  %v7160_v22 = vld [vmem:[#allocation8 + $0x188] ss:$16 sps:$4 sm:$0xff]  }
 0x204   : > { %1937 = vmatmul.mubr.bf16.vlgmr.msra.gmra.mrb[32].mxu0 %v8174_v3  ;;  %2163 = vmatmul.mubr.bf16.vlgmr.msra.gmra.mrb[32].mxu1 %v8174_v3  ;;  %v7097_v3 = vld [vmem:[#allocation8 + $0x40] ss:$16 sps:$4 sm:$0xff]   ;;  %v7165_v23 = vld [vmem:[#allocation8 + $0x1a4] ss:$16 sps:$4 sm:$0xff]   ;;  %v7166_v24 = vld [vmem:[#allocation8 + $0x1a8] ss:$16 sps:$4 sm:$0xff]  }
 0x205   : > { %1946 = vmatprep.mubr.bf16.mxu0 %v8189_v49  ;;  %2172 = vmatprep.mubr.bf16.mxu1 %v8189_v49  ;;  %v7108_v49 = vld [vmem:[#allocation8 + $0x6c] ss:$16 sps:$4 sm:$0xff]   ;;  %v7171_v26 = vld [vmem:[#allocation8 + $0x1c4] ss:$16 sps:$4 sm:$0xff]   ;;  %v7178_v31 = vld [vmem:[#allocation8 + $0x1e8] ss:$16 sps:$4 sm:$0xff]  }
 0x206   : > { %3130 = vmatpush1.bf16.msra.mxu0 %v7085_v27  ;;  %3356 = vmatpush1.bf16.msra.mxu1 %v7088_v12  ;;  %v7174_v27 = vld [vmem:[#allocation8 + $0x1cc] ss:$16 sps:$4 sm:$0xff]   ;;  %v7169_v12 = vld [vmem:[#allocation8 + $0x1c0] ss:$16 sps:$4 sm:$0xff]   ;;  %v7177_v28 = vld [vmem:[#allocation8 + $0x1e4] ss:$16 sps:$4 sm:$0xff]  }
 0x207   : > { %3131 = vmatprep.subr.bf16.mxu0 %v7093_v29  ;;  %3357 = vmatprep.subr.bf16.mxu1 %v7096_v30  ;;  %v7180_v29 = vld [vmem:[#allocation8 + $0x1ec] ss:$16 sps:$4 sm:$0xff]   ;;  %v7175_v30 = vld [vmem:[#allocation8 + $0x1e0] ss:$16 sps:$4 sm:$0xff]  }
 0x20a   : > { %3132 = vmatpush1.bf16.msra.mxu0 %v7091_v20  ;;  %3358 = vmatpush1.bf16.msra.mxu1 %v7094_v34  ;;  %v7186_v20 = vld [vmem:[#allocation8 + $0x20c] ss:$16 sps:$4 sm:$0xff]  }
 0x20b   : > { %3133 = vmatprep.subr.bf16.mxu0 %v7099_v36  ;;  %3359 = vmatprep.subr.bf16.mxu1 %v7102_v37 }
 0x20c   : > { %1947 = vmatmul.mubr.bf16.gmra.mrb[36].mxu0 %v8186_v43  ;;  %2173 = vmatmul.mubr.bf16.gmra.mrb[36].mxu1 %v8186_v43  ;;  %v7120_v43 = vld [vmem:[#allocation8 + $0xac] ss:$16 sps:$4 sm:$0xff]  }
 0x20d   : > { %1956 = vmatprep.mubr.bf16.mxu0 %v8201_v32  ;;  %2182 = vmatprep.mubr.bf16.mxu1 %v8201_v32  ;;  %v7115_v32 = vld [vmem:[#allocation8 + $0xa0] ss:$16 sps:$4 sm:$0xff]  }
 0x20e   : > { %3134 = vmatpush1.bf16.msra.mxu0 %v7097_v3  ;;  %3360 = vmatpush1.bf16.msra.mxu1 %v7100_v38 }
 0x20f   : > { %3135 = vmatprep.subr.bf16.mxu0 %v7105_v39  ;;  %3361 = vmatprep.subr.bf16.mxu1 %v7108_v49 }
 0x212   : > { %3136 = vmatpush1.bf16.msra.mxu0 %v7103_v57  ;;  %3362 = vmatpush1.bf16.msra.mxu1 %v7106_v40 }
 0x213   : > { %3137 = vmatprep.subr.bf16.mxu0 %v7111_v42  ;;  %3363 = vmatprep.subr.bf16.mxu1 %v7114_v59 }
 0x214   : > { %1957 = vmatmul.mubr.bf16.gmra.mrb[40].mxu0 %v8198_v25  ;;  %2183 = vmatmul.mubr.bf16.gmra.mrb[40].mxu1 %v8198_v25  ;;  %v7132_v25 = vld [vmem:[#allocation8 + $0xec] ss:$16 sps:$4 sm:$0xff]  }
 0x215   : > { %1966 = vmatprep.mubr.bf16.mxu0 %v8213_v14  ;;  %2192 = vmatprep.mubr.bf16.mxu1 %v8213_v14  ;;  %v7127_v14 = vld [vmem:[#allocation8 + $0xe0] ss:$16 sps:$4 sm:$0xff]  }
 0x216   : > { %3138 = vmatpush1.bf16.msra.mxu0 %v7109_v44  ;;  %3364 = vmatpush1.bf16.msra.mxu1 %v7112_v45 }
 0x217   : > { %3139 = vmatprep.subr.bf16.mxu0 %v7117_v46  ;;  %3365 = vmatprep.subr.bf16.mxu1 %v7120_v43 }
 0x21a   : > { %3140 = vmatpush1.bf16.msra.mxu0 %v7115_v32  ;;  %3366 = vmatpush1.bf16.msra.mxu1 %v7118_v47 }
 0x21b   : > { %3141 = vmatprep.subr.bf16.mxu0 %v7123_v0  ;;  %3367 = vmatprep.subr.bf16.mxu1 %v7126_v50 }
 0x21c   : > { %1967 = vmatmul.mubr.bf16.gmra.mrb[44].mxu0 %v8210_v5  ;;  %2193 = vmatmul.mubr.bf16.gmra.mrb[44].mxu1 %v8210_v5  ;;  %v7144_v5 = vld [vmem:[#allocation8 + $0x12c] ss:$16 sps:$4 sm:$0xff]  }
 0x21d   : > { %1976 = vmatprep.mubr.bf16.mxu0 %v8225_v58  ;;  %2202 = vmatprep.mubr.bf16.mxu1 %v8225_v58  ;;  %v7139_v58 = vld [vmem:[#allocation8 + $0x120] ss:$16 sps:$4 sm:$0xff]  }
 0x21e   : > { %3142 = vmatpush1.bf16.msra.mxu0 %v7121_v51  ;;  %3368 = vmatpush1.bf16.msra.mxu1 %v7124_v52 }
 0x21f   : > { %3143 = vmatprep.subr.bf16.mxu0 %v7129_v53  ;;  %3369 = vmatprep.subr.bf16.mxu1 %v7132_v25 }
 0x222   : > { %3144 = vmatpush1.bf16.msra.mxu0 %v7127_v14  ;;  %3370 = vmatpush1.bf16.msra.mxu1 %v7130_v55 }
 0x223   : > { %3145 = vmatprep.subr.bf16.mxu0 %v7135_v60  ;;  %3371 = vmatprep.subr.bf16.mxu1 %v7138_v61 }
 0x224   : > { %1977 = vmatmul.mubr.bf16.gmra.mrb[48].mxu0 %v8222_v48  ;;  %2203 = vmatmul.mubr.bf16.gmra.mrb[48].mxu1 %v8222_v48  ;;  %v7156_v48 = vld [vmem:[#allocation8 + $0x16c] ss:$16 sps:$4 sm:$0xff]  }
 0x225   : > { %1986 = vmatprep.mubr.bf16.mxu0 %v8237_v41  ;;  %2212 = vmatprep.mubr.bf16.mxu1 %v8237_v41  ;;  %v7151_v41 = vld [vmem:[#allocation8 + $0x160] ss:$16 sps:$4 sm:$0xff]  }
 0x226   : > { %3146 = vmatpush1.bf16.msra.mxu0 %v7133_v62  ;;  %3372 = vmatpush1.bf16.msra.mxu1 %v7136_v63 }
 0x227   : > { %3147 = vmatprep.subr.bf16.mxu0 %v7141_v1  ;;  %3373 = vmatprep.subr.bf16.mxu1 %v7144_v5 }
 0x22a   : > { %3148 = vmatpush1.bf16.msra.mxu0 %v7139_v58  ;;  %3374 = vmatpush1.bf16.msra.mxu1 %v7142_v2 }
 0x22b   : > { %3149 = vmatprep.subr.bf16.mxu0 %v7147_v6  ;;  %3375 = vmatprep.subr.bf16.mxu1 %v7150_v8  ;;  %v7181_v8 = vld [vmem:[#allocation8 + $0x200] ss:$16 sps:$4 sm:$0xff]  }
 0x22c   : > { %1987 = vmatmul.mubr.bf16.gmra.mrb[52].mxu0 %v8234_v35  ;;  %2213 = vmatmul.mubr.bf16.gmra.mrb[52].mxu1 %v8234_v35  ;;  %v7168_v35 = vld [vmem:[#allocation8 + $0x1ac] ss:$16 sps:$4 sm:$0xff]  }
 0x22d   : > { %1996 = vmatprep.mubr.bf16.mxu0 %v8247_v13  ;;  %2222 = vmatprep.mubr.bf16.mxu1 %v8247_v13  ;;  %v7163_v13 = vld [vmem:[#allocation8 + $0x1a0] ss:$16 sps:$4 sm:$0xff]  }
 0x22e   : > { %3150 = vmatpush1.bf16.msra.mxu0 %v7145_v10  ;;  %3376 = vmatpush1.bf16.msra.mxu1 %v7148_v11  ;;  %v7184_v10 = vld [vmem:[#allocation8 + $0x208] ss:$16 sps:$4 sm:$0xff]  }
 0x22f   : > { %3151 = vmatprep.subr.bf16.mxu0 %v7153_v15  ;;  %3377 = vmatprep.subr.bf16.mxu1 %v7156_v48 }
 0x232   : > { %3152 = vmatpush1.bf16.msra.mxu0 %v7151_v41  ;;  %3378 = vmatpush1.bf16.msra.mxu1 %v7154_v17  ;;  %v7189_v17 = vld [vmem:[#allocation8 + $0x224] ss:$16 sps:$4 sm:$0xff]  }
 0x233   : > { %3153 = vmatprep.subr.bf16.mxu0 %v7159_v18  ;;  %3379 = vmatprep.subr.bf16.mxu1 %v7162_v19  ;;  %v7192_v18 = vld [vmem:[#allocation8 + $0x22c] ss:$16 sps:$4 sm:$0xff]  }
 0x234   : > { %1997 = vmatmul.mubr.bf16.gmra.mrb[56].mxu0 %v8242_v9  ;;  %2223 = vmatmul.mubr.bf16.gmra.mrb[56].mxu1 %v8242_v9  ;;  %v7172_v9 = vld [vmem:[#allocation8 + $0x1c8] ss:$16 sps:$4 sm:$0xff]  }
 0x235   : > { %2006 = vmatprep.mubr.bf16.mxu0 %v8258_v33  ;;  %2232 = vmatprep.mubr.bf16.mxu1 %v8258_v33  ;;  %v7183_v33 = vld [vmem:[#allocation8 + $0x204] ss:$16 sps:$4 sm:$0xff]  }
 0x236   : > { %3154 = vmatpush1.bf16.msra.mxu0 %v7157_v21  ;;  %3380 = vmatpush1.bf16.msra.mxu1 %v7160_v22 }
 0x237   : > { %3155 = vmatprep.subr.bf16.mxu0 %v7165_v23  ;;  %3381 = vmatprep.subr.bf16.mxu1 %v7168_v35 }
 0x23a   : > { %3156 = vmatpush1.bf16.msra.mxu0 %v7163_v13  ;;  %3382 = vmatpush1.bf16.msra.mxu1 %v7166_v24 }
 0x23b   : > { %3157 = vmatprep.subr.bf16.mxu0 %v7171_v26  ;;  %3383 = vmatprep.subr.bf16.mxu1 %v7174_v27 }
 0x23c   : > { %2007 = vmatmul.mubr.bf16.gmra.mrb[60].mxu0 %v8256_v16  ;;  %2233 = vmatmul.mubr.bf16.gmra.mrb[60].mxu1 %v8256_v16  ;;  %v1129_v16 = vld [vmem:[%s8738_s4] sm:$0xf] }
 0x23d   : > { %v8290_v34 = vrot.slane %v1129_v16, %v8135_v54  ;;  %v8293_v36 = vrot.slane %v1129_v16, %v8152_v4  ;;  %v8296_v37 = vrot.slane %v1129_v16, %v8140_v56  ;;  %v8299_v3 = vrot.slane %v1129_v16, %v8154_v7  ;;  %v7198_v16 = vld [vmem:[#allocation8 + $0x24c] ss:$16 sps:$4 sm:$0xff]  }
 0x23e   : > { %3158 = vmatpush1.bf16.msra.mxu0 %v7169_v12  ;;  %3384 = vmatpush1.bf16.msra.mxu1 %v7172_v9  ;;  %v7187_v9 = vld [vmem:[#allocation8 + $0x220] ss:$16 sps:$4 sm:$0xff]  }
 0x23f   : > { %3159 = vmatprep.subr.bf16.mxu0 %v7177_v28  ;;  %3385 = vmatprep.subr.bf16.mxu1 %v7180_v29  ;;  %v7190_v28 = vld [vmem:[#allocation8 + $0x228] ss:$16 sps:$4 sm:$0xff]   ;;  %v7195_v29 = vld [vmem:[#allocation8 + $0x244] ss:$16 sps:$4 sm:$0xff]  }
 0x242   : > { %3160 = vmatpush1.bf16.msra.mxu0 %v7175_v30  ;;  %3386 = vmatpush1.bf16.msra.mxu1 %v7178_v31 }
 0x243   : > { %3242 = vmatprep.subr.bf16.mxu0 %v7183_v33  ;;  %3468 = vmatprep.subr.bf16.mxu1 %v7186_v20 }
 0x2d7   : > { %v1938_v38 = vpop.f32.mrb[32].mxu0  ;;  %v2164_v39 = vpop.f32.mrb[32].mxu1 }
 0x2d8   : > { %v6401_v49 = vadd.f32 %v1938_v38, %v8290_v34  ;;  %v6433_v57 = vadd.f32 %v2164_v39, %v8293_v36  ;;  %v1940_v40 = vpop.f32.mrb[33].mxu0  ;;  %v2166_v42 = vpop.f32.mrb[33].mxu1 }
 0x2d9   : > { %v6402_v59 = vadd.f32 %v1940_v40, %v8296_v37  ;;  %v6434_v44 = vadd.f32 %v2166_v42, %v8299_v3  ;;  %v1942_v45 = vpop.f32.mrb[34].mxu0  ;;  %v2168_v46 = vpop.f32.mrb[34].mxu1 }
 0x2da   : > { %v6403_v43 = vadd.f32 %v1942_v45, %v8290_v34  ;;  %v6435_v32 = vadd.f32 %v2168_v46, %v8293_v36  ;;  %v1944_v47 = vpop.f32.mrb[35].mxu0  ;;  %v2170_v0 = vpop.f32.mrb[35].mxu1  ;;  %v2243_v52 = vmax.f32 %v6401_v49, 0.0  ;;  %v2245_v53 = vmax.f32 %v6433_v57, 0.0 }
 0x2db   : > { %v6404_v50 = vadd.f32 %v1944_v47, %v8296_v37  ;;  %v6436_v51 = vadd.f32 %v2170_v0, %v8299_v3  ;;  %v2244_v55 = vmax.f32 %v6402_v59, 0.0  ;;  %v2246_v60 = vmax.f32 %v6434_v44, 0.0 }
 0x2dc   : > { %v2247_v25 = vmax.f32 %v6403_v43, 0.0  ;;  %v2249_v14 = vmax.f32 %v6435_v32, 0.0  ;;  %v7193_v43 = vld [vmem:[#allocation8 + $0x240] ss:$16 sps:$4 sm:$0xff]   ;;  %v7196_v32 = vld [vmem:[#allocation8 + $0x248] ss:$16 sps:$4 sm:$0xff]  }
 0x2dd   : > { %v2248_v61 = vmax.f32 %v6404_v50, 0.0  ;;  %v2250_v62 = vmax.f32 %v6436_v51, 0.0 }
 0x2de   : > { %v2307_v63 = vpack.c.bf16 %v2247_v25, %v2243_v52  ;;  %v8309_v1 = vpack.c.bf16 %v2249_v14, %v2245_v53  ;;  %v7201_v52 = vld [vmem:[#allocation8 + $0x264] ss:$16 sps:$4 sm:$0xff]   ;;  %v7204_v53 = vld [vmem:[#allocation8 + $0x26c] ss:$16 sps:$4 sm:$0xff]  }
 0x2df   : > { %v2308_v5 = vpack.c.bf16 %v2248_v61, %v2244_v55  ;;  %v8311_v58 = vpack.c.bf16 %v2250_v62, %v2246_v60  ;;  %v1948_v2 = vpop.f32.mrb[36].mxu0  ;;  %v2174_v6 = vpop.f32.mrb[36].mxu1 }
 0x2e0   : > { %v6405_v11 = vadd.f32 %v1948_v2, %v8290_v34  ;;  %v6437_v15 = vadd.f32 %v2174_v6, %v8293_v36  ;;  %v1950_v48 = vpop.f32.mrb[37].mxu0  ;;  %v2176_v41 = vpop.f32.mrb[37].mxu1 }
 0x2e1   : > { %v6406_v19 = vadd.f32 %v1950_v48, %v8296_v37  ;;  %v6438_v21 = vadd.f32 %v2176_v41, %v8299_v3  ;;  %v1952_v22 = vpop.f32.mrb[38].mxu0  ;;  %v2178_v23 = vpop.f32.mrb[38].mxu1  ;;  %3161 = vmatprep.mubr.bf16.mxu0 %v2308_v5  ;;  %3387 = vmatprep.mubr.bf16.mxu1 %v2308_v5 }
 0x2e2   : > { %v6407_v35 = vadd.f32 %v1952_v22, %v8290_v34  ;;  %v6439_v13 = vadd.f32 %v2178_v23, %v8293_v36  ;;  %v1954_v24 = vpop.f32.mrb[39].mxu0  ;;  %v2180_v26 = vpop.f32.mrb[39].mxu1  ;;  %3162 = vmatmul.mubr.bf16.vlgmr.msra.gmra.mrb[64].mxu0 %v2307_v63  ;;  %3388 = vmatmul.mubr.bf16.vlgmr.msra.gmra.mrb[64].mxu1 %v2307_v63  ;;  %v2251_v30 = vmax.f32 %v6405_v11, 0.0  ;;  %v2253_v31 = vmax.f32 %v6437_v15, 0.0  ;;  %v7207_v11 = vld [vmem:[#allocation8 + $0x284] ss:$16 sps:$4 sm:$0xff]  }
 0x2e3   : > { %v6408_v27 = vadd.f32 %v1954_v24, %v8296_v37  ;;  %v6440_v12 = vadd.f32 %v2180_v26, %v8299_v3  ;;  %3243 = vmatpush1.bf16.msra.mxu0 %v7181_v8  ;;  %3469 = vmatpush1.bf16.msra.mxu1 %v7184_v10  ;;  %v2252_v38 = vmax.f32 %v6406_v19, 0.0  ;;  %v2254_v39 = vmax.f32 %v6438_v21, 0.0  ;;  %v7199_v8 = vld [vmem:[#allocation8 + $0x260] ss:$16 sps:$4 sm:$0xff]   ;;  %v7202_v10 = vld [vmem:[#allocation8 + $0x268] ss:$16 sps:$4 sm:$0xff]  }
 0x2e4   : > { %v2255_v33 = vmax.f32 %v6407_v35, 0.0  ;;  %v2257_v20 = vmax.f32 %v6439_v13, 0.0  ;;  %3244 = vmatprep.subr.bf16.mxu0 %v7189_v17  ;;  %3470 = vmatprep.subr.bf16.mxu1 %v7192_v18  ;;  %v7210_v18 = vld [vmem:[#allocation8 + $0x28c] ss:$16 sps:$4 sm:$0xff]  }
 0x2e5   : > { %v2256_v49 = vmax.f32 %v6408_v27, 0.0  ;;  %v2258_v57 = vmax.f32 %v6440_v12, 0.0 }
 0x2e6   : > { %v2311_v40 = vpack.c.bf16 %v2255_v33, %v2251_v30  ;;  %v8321_v42 = vpack.c.bf16 %v2257_v20, %v2253_v31  ;;  %v7213_v20 = vld [vmem:[#allocation8 + $0x2a4] ss:$16 sps:$4 sm:$0xff]  }
 0x2e7   : > { %v2312_v59 = vpack.c.bf16 %v2256_v49, %v2252_v38  ;;  %v8323_v44 = vpack.c.bf16 %v2258_v57, %v2254_v39  ;;  %3245 = vmatpush1.bf16.msra.mxu0 %v7187_v9  ;;  %v1958_v45 = vpop.f32.mrb[40].mxu0  ;;  %v2184_v46 = vpop.f32.mrb[40].mxu1  ;;  %3471 = vmatpush1.bf16.msra.mxu1 %v7190_v28  ;;  %v7205_v9 = vld [vmem:[#allocation8 + $0x280] ss:$16 sps:$4 sm:$0xff]   ;;  %v7208_v28 = vld [vmem:[#allocation8 + $0x288] ss:$16 sps:$4 sm:$0xff]  }
 0x2e8   : > { %v6409_v47 = vadd.f32 %v1958_v45, %v8290_v34  ;;  %v6441_v0 = vadd.f32 %v2184_v46, %v8293_v36  ;;  %v1960_v50 = vpop.f32.mrb[41].mxu0  ;;  %v2186_v51 = vpop.f32.mrb[41].mxu1  ;;  %3246 = vmatprep.subr.bf16.mxu0 %v7195_v29  ;;  %3472 = vmatprep.subr.bf16.mxu1 %v7198_v16  ;;  %v7216_v16 = vld [vmem:[#allocation8 + $0x2ac] ss:$16 sps:$4 sm:$0xff]  }
 0x2e9   : > { %v6410_v25 = vadd.f32 %v1960_v50, %v8296_v37  ;;  %v6442_v14 = vadd.f32 %v2186_v51, %v8299_v3  ;;  %v1962_v55 = vpop.f32.mrb[42].mxu0  ;;  %v2188_v60 = vpop.f32.mrb[42].mxu1  ;;  %3171 = vmatprep.mubr.bf16.mxu0 %v2312_v59  ;;  %3397 = vmatprep.mubr.bf16.mxu1 %v2312_v59  ;;  %v7219_v50 = vld [vmem:[#allocation8 + $0x2c4] ss:$16 sps:$4 sm:$0xff]  }
 0x2ea   : > { %v6411_v61 = vadd.f32 %v1962_v55, %v8290_v34  ;;  %v6443_v62 = vadd.f32 %v2188_v60, %v8293_v36  ;;  %v1964_v63 = vpop.f32.mrb[43].mxu0  ;;  %v2190_v5 = vpop.f32.mrb[43].mxu1  ;;  %3172 = vmatmul.mubr.bf16.gmra.mrb[68].mxu0 %v2311_v40  ;;  %3398 = vmatmul.mubr.bf16.gmra.mrb[68].mxu1 %v2311_v40  ;;  %v2259_v15 = vmax.f32 %v6409_v47, 0.0  ;;  %v2261_v48 = vmax.f32 %v6441_v0, 0.0  ;;  %v7211_v47 = vld [vmem:[#allocation8 + $0x2a0] ss:$16 sps:$4 sm:$0xff]  }
 0x2eb   : > { %v6412_v2 = vadd.f32 %v1964_v63, %v8296_v37  ;;  %v6444_v6 = vadd.f32 %v2190_v5, %v8299_v3  ;;  %3247 = vmatpush1.bf16.msra.mxu0 %v7193_v43  ;;  %3473 = vmatpush1.bf16.msra.mxu1 %v7196_v32  ;;  %v2260_v19 = vmax.f32 %v6410_v25, 0.0  ;;  %v2262_v21 = vmax.f32 %v6442_v14, 0.0  ;;  %v7214_v0 = vld [vmem:[#allocation8 + $0x2a8] ss:$16 sps:$4 sm:$0xff]   ;;  %v7222_v14 = vld [vmem:[#allocation8 + $0x2cc] ss:$16 sps:$4 sm:$0xff]  }
 0x2ec   : > { %v2263_v41 = vmax.f32 %v6411_v61, 0.0  ;;  %v2265_v17 = vmax.f32 %v6443_v62, 0.0  ;;  %3248 = vmatprep.subr.bf16.mxu0 %v7201_v52  ;;  %3474 = vmatprep.subr.bf16.mxu1 %v7204_v53 }
 0x2ed   : > { %v2264_v22 = vmax.f32 %v6412_v2, 0.0  ;;  %v2266_v23 = vmax.f32 %v6444_v6, 0.0 }
 0x2ee   : > { %v2315_v35 = vpack.c.bf16 %v2263_v41, %v2259_v15  ;;  %v8333_v13 = vpack.c.bf16 %v2265_v17, %v2261_v48  ;;  %v7220_v15 = vld [vmem:[#allocation8 + $0x2c8] ss:$16 sps:$4 sm:$0xff]  }
 0x2ef   : > { %v2316_v24 = vpack.c.bf16 %v2264_v22, %v2260_v19  ;;  %v8335_v26 = vpack.c.bf16 %v2266_v23, %v2262_v21  ;;  %3249 = vmatpush1.bf16.msra.mxu0 %v7199_v8  ;;  %v1968_v27 = vpop.f32.mrb[44].mxu0  ;;  %v2194_v12 = vpop.f32.mrb[44].mxu1  ;;  %3475 = vmatpush1.bf16.msra.mxu1 %v7202_v10  ;;  %v7225_v19 = vld [vmem:[#allocation8 + $0x2e4] ss:$16 sps:$4 sm:$0xff]   ;;  %v7228_v21 = vld [vmem:[#allocation8 + $0x2ec] ss:$16 sps:$4 sm:$0xff]  }
 0x2f0   : > { %v6413_v29 = vadd.f32 %v1968_v27, %v8290_v34  ;;  %v6445_v30 = vadd.f32 %v2194_v12, %v8293_v36  ;;  %v1970_v31 = vpop.f32.mrb[45].mxu0  ;;  %v2196_v33 = vpop.f32.mrb[45].mxu1  ;;  %3250 = vmatprep.subr.bf16.mxu0 %v7207_v11  ;;  %3476 = vmatprep.subr.bf16.mxu1 %v7210_v18  ;;  %v7217_v11 = vld [vmem:[#allocation8 + $0x2c0] ss:$16 sps:$4 sm:$0xff]  }
 0x2f1   : > { %v6414_v38 = vadd.f32 %v1970_v31, %v8296_v37  ;;  %v6446_v39 = vadd.f32 %v2196_v33, %v8299_v3  ;;  %v1972_v49 = vpop.f32.mrb[46].mxu0  ;;  %v2198_v57 = vpop.f32.mrb[46].mxu1  ;;  %3181 = vmatprep.mubr.bf16.mxu0 %v2316_v24  ;;  %3407 = vmatprep.mubr.bf16.mxu1 %v2316_v24  ;;  %v7223_v31 = vld [vmem:[#allocation8 + $0x2e0] ss:$16 sps:$4 sm:$0xff]   ;;  %v7226_v33 = vld [vmem:[#allocation8 + $0x2e8] ss:$16 sps:$4 sm:$0xff]  }
 0x2f2   : > { %v6415_v40 = vadd.f32 %v1972_v49, %v8290_v34  ;;  %v6447_v59 = vadd.f32 %v2198_v57, %v8293_v36  ;;  %v1974_v45 = vpop.f32.mrb[47].mxu0  ;;  %v2200_v46 = vpop.f32.mrb[47].mxu1  ;;  %3182 = vmatmul.mubr.bf16.gmra.mrb[72].mxu0 %v2315_v35  ;;  %3408 = vmatmul.mubr.bf16.gmra.mrb[72].mxu1 %v2315_v35  ;;  %v2267_v51 = vmax.f32 %v6413_v29, 0.0  ;;  %v2269_v52 = vmax.f32 %v6445_v30, 0.0  ;;  %v7234_v57 = vld [vmem:[#allocation8 + $0x30c] ss:$16 sps:$4 sm:$0xff]  }
 0x2f3   : > { %v6416_v43 = vadd.f32 %v1974_v45, %v8296_v37  ;;  %v6448_v32 = vadd.f32 %v2200_v46, %v8299_v3  ;;  %3251 = vmatpush1.bf16.msra.mxu0 %v7205_v9  ;;  %3477 = vmatpush1.bf16.msra.mxu1 %v7208_v28  ;;  %v2268_v55 = vmax.f32 %v6414_v38, 0.0  ;;  %v2270_v60 = vmax.f32 %v6446_v39, 0.0 }
 0x2f4   : > { %v2271_v53 = vmax.f32 %v6415_v40, 0.0  ;;  %v2273_v25 = vmax.f32 %v6447_v59, 0.0  ;;  %3252 = vmatprep.subr.bf16.mxu0 %v7213_v20  ;;  %3478 = vmatprep.subr.bf16.mxu1 %v7216_v16  ;;  %v7231_v20 = vld [vmem:[#allocation8 + $0x304] ss:$16 sps:$4 sm:$0xff]  }
 0x2f5   : > { %v2272_v61 = vmax.f32 %v6416_v43, 0.0  ;;  %v2274_v62 = vmax.f32 %v6448_v32, 0.0 }
 0x2f6   : > { %v2319_v63 = vpack.c.bf16 %v2271_v53, %v2267_v51  ;;  %v8345_v5 = vpack.c.bf16 %v2273_v25, %v2269_v52  ;;  %v7229_v52 = vld [vmem:[#allocation8 + $0x300] ss:$16 sps:$4 sm:$0xff]   ;;  %v7232_v53 = vld [vmem:[#allocation8 + $0x308] ss:$16 sps:$4 sm:$0xff]  }
 0x2f7   : > { %v2320_v2 = vpack.c.bf16 %v2272_v61, %v2268_v55  ;;  %v8347_v6 = vpack.c.bf16 %v2274_v62, %v2270_v60  ;;  %3253 = vmatpush1.bf16.msra.mxu0 %v7211_v47  ;;  %v1978_v8 = vpop.f32.mrb[48].mxu0  ;;  %v2204_v10 = vpop.f32.mrb[48].mxu1  ;;  %3479 = vmatpush1.bf16.msra.mxu1 %v7214_v0  ;;  %v7237_v61 = vld [vmem:[#allocation8 + $0x324] ss:$16 sps:$4 sm:$0xff]   ;;  %v7240_v62 = vld [vmem:[#allocation8 + $0x32c] ss:$16 sps:$4 sm:$0xff]  }
 0x2f8   : > { %v6417_v48 = vadd.f32 %v1978_v8, %v8290_v34  ;;  %v6449_v41 = vadd.f32 %v2204_v10, %v8293_v36  ;;  %v1980_v17 = vpop.f32.mrb[49].mxu0  ;;  %v2206_v18 = vpop.f32.mrb[49].mxu1  ;;  %3254 = vmatprep.subr.bf16.mxu0 %v7219_v50  ;;  %3480 = vmatprep.subr.bf16.mxu1 %v7222_v14 }
 0x2f9   : > { %v6418_v22 = vadd.f32 %v1980_v17, %v8296_v37  ;;  %v6450_v23 = vadd.f32 %v2206_v18, %v8299_v3  ;;  %v1982_v35 = vpop.f32.mrb[50].mxu0  ;;  %v2208_v24 = vpop.f32.mrb[50].mxu1  ;;  %3191 = vmatprep.mubr.bf16.mxu0 %v2320_v2  ;;  %3417 = vmatprep.mubr.bf16.mxu1 %v2320_v2 }
 0x2fa   : > { %v6419_v27 = vadd.f32 %v1982_v35, %v8290_v34  ;;  %v6451_v12 = vadd.f32 %v2208_v24, %v8293_v36  ;;  %v1984_v9 = vpop.f32.mrb[51].mxu0  ;;  %v2210_v28 = vpop.f32.mrb[51].mxu1  ;;  %3192 = vmatmul.mubr.bf16.gmra.mrb[76].mxu0 %v2319_v63  ;;  %3418 = vmatmul.mubr.bf16.gmra.mrb[76].mxu1 %v2319_v63  ;;  %v2275_v16 = vmax.f32 %v6417_v48, 0.0  ;;  %v2277_v38 = vmax.f32 %v6449_v41, 0.0 }
 0x2fb   : > { %v6420_v29 = vadd.f32 %v1984_v9, %v8296_v37  ;;  %v6452_v30 = vadd.f32 %v2210_v28, %v8299_v3  ;;  %3255 = vmatpush1.bf16.msra.mxu0 %v7217_v11  ;;  %3481 = vmatpush1.bf16.msra.mxu1 %v7220_v15  ;;  %v2276_v40 = vmax.f32 %v6418_v22, 0.0  ;;  %v2278_v59 = vmax.f32 %v6450_v23, 0.0  ;;  %v7243_v22 = vld [vmem:[#allocation8 + $0x344] ss:$16 sps:$4 sm:$0xff]  }
 0x2fc   : > { %v2279_v39 = vmax.f32 %v6419_v27, 0.0  ;;  %v2281_v49 = vmax.f32 %v6451_v12, 0.0  ;;  %3256 = vmatprep.subr.bf16.mxu0 %v7225_v19  ;;  %3482 = vmatprep.subr.bf16.mxu1 %v7228_v21  ;;  %v7235_v19 = vld [vmem:[#allocation8 + $0x320] ss:$16 sps:$4 sm:$0xff]   ;;  %v7238_v21 = vld [vmem:[#allocation8 + $0x328] ss:$16 sps:$4 sm:$0xff]  }
 0x2fd   : > { %v2280_v45 = vmax.f32 %v6420_v29, 0.0  ;;  %v2282_v46 = vmax.f32 %v6452_v30, 0.0  ;;  %v7246_v12 = vld [vmem:[#allocation8 + $0x34c] ss:$16 sps:$4 sm:$0xff]  }
 0x2fe   : > { %v2323_v43 = vpack.c.bf16 %v2279_v39, %v2275_v16  ;;  %v8357_v32 = vpack.c.bf16 %v2281_v49, %v2277_v38  ;;  %v7241_v49 = vld [vmem:[#allocation8 + $0x340] ss:$16 sps:$4 sm:$0xff]  }
 0x2ff   : > { %v2324_v47 = vpack.c.bf16 %v2280_v45, %v2276_v40  ;;  %v8359_v0 = vpack.c.bf16 %v2282_v46, %v2278_v59  ;;  %3257 = vmatpush1.bf16.msra.mxu0 %v7223_v31  ;;  %v1988_v50 = vpop.f32.mrb[52].mxu0  ;;  %v2214_v51 = vpop.f32.mrb[52].mxu1  ;;  %3483 = vmatpush1.bf16.msra.mxu1 %v7226_v33 }
 0x300   : > { %v6421_v25 = vadd.f32 %v1988_v50, %v8290_v34  ;;  %v6453_v14 = vadd.f32 %v2214_v51, %v8293_v36  ;;  %v1990_v55 = vpop.f32.mrb[53].mxu0  ;;  %v2216_v60 = vpop.f32.mrb[53].mxu1  ;;  %3258 = vmatprep.subr.bf16.mxu0 %v7231_v20  ;;  %3484 = vmatprep.subr.bf16.mxu1 %v7234_v57  ;;  %v7244_v57 = vld [vmem:[#allocation8 + $0x348] ss:$16 sps:$4 sm:$0xff]  }
 0x301   : > { %v6422_v63 = vadd.f32 %v1990_v55, %v8296_v37  ;;  %v6454_v2 = vadd.f32 %v2216_v60, %v8299_v3  ;;  %v1992_v8 = vpop.f32.mrb[54].mxu0  ;;  %v2218_v10 = vpop.f32.mrb[54].mxu1  ;;  %3201 = vmatprep.mubr.bf16.mxu0 %v2324_v47  ;;  %3427 = vmatprep.mubr.bf16.mxu1 %v2324_v47  ;;  %v7252_v47 = vld [vmem:[#allocation8 + $0x36c] ss:$16 sps:$4 sm:$0xff]  }
 0x302   : > { %v6423_v11 = vadd.f32 %v1992_v8, %v8290_v34  ;;  %v6455_v15 = vadd.f32 %v2218_v10, %v8293_v36  ;;  %v1994_v48 = vpop.f32.mrb[55].mxu0  ;;  %v2220_v41 = vpop.f32.mrb[55].mxu1  ;;  %3202 = vmatmul.mubr.bf16.gmra.mrb[80].mxu0 %v2323_v43  ;;  %3428 = vmatmul.mubr.bf16.gmra.mrb[80].mxu1 %v2323_v43  ;;  %v2283_v23 = vmax.f32 %v6421_v25, 0.0  ;;  %v2285_v35 = vmax.f32 %v6453_v14, 0.0  ;;  %v7249_v43 = vld [vmem:[#allocation8 + $0x364] ss:$16 sps:$4 sm:$0xff]  }
 0x303   : > { %v6424_v17 = vadd.f32 %v1994_v48, %v8296_v37  ;;  %v6456_v18 = vadd.f32 %v2220_v41, %v8299_v3  ;;  %3259 = vmatpush1.bf16.msra.mxu0 %v7229_v52  ;;  %3485 = vmatpush1.bf16.msra.mxu1 %v7232_v53  ;;  %v2284_v9 = vmax.f32 %v6422_v63, 0.0  ;;  %v2286_v28 = vmax.f32 %v6454_v2, 0.0  ;;  %v7247_v63 = vld [vmem:[#allocation8 + $0x360] ss:$16 sps:$4 sm:$0xff]   ;;  %v7250_v2 = vld [vmem:[#allocation8 + $0x368] ss:$16 sps:$4 sm:$0xff]  }
 0x304   : > { %v2287_v24 = vmax.f32 %v6423_v11, 0.0  ;;  %v2289_v27 = vmax.f32 %v6455_v15, 0.0  ;;  %3260 = vmatprep.subr.bf16.mxu0 %v7237_v61  ;;  %3486 = vmatprep.subr.bf16.mxu1 %v7240_v62  ;;  %v7255_v8 = vld [vmem:[#allocation8 + $0x384] ss:$16 sps:$4 sm:$0xff]   ;;  %v7258_v41 = vld [vmem:[#allocation8 + $0x38c] ss:$16 sps:$4 sm:$0xff]  }
 0x305   : > { %v2288_v29 = vmax.f32 %v6424_v17, 0.0  ;;  %v2290_v30 = vmax.f32 %v6456_v18, 0.0 }
 0x306   : > { %v2327_v31 = vpack.c.bf16 %v2287_v24, %v2283_v23  ;;  %v8369_v33 = vpack.c.bf16 %v2289_v27, %v2285_v35 }
 0x307   : > { %v2328_v20 = vpack.c.bf16 %v2288_v29, %v2284_v9  ;;  %v8371_v16 = vpack.c.bf16 %v2290_v30, %v2286_v28  ;;  %3261 = vmatpush1.bf16.msra.mxu0 %v7235_v19  ;;  %v1998_v38 = vpop.f32.mrb[56].mxu0  ;;  %v2224_v39 = vpop.f32.mrb[56].mxu1  ;;  %3487 = vmatpush1.bf16.msra.mxu1 %v7238_v21  ;;  %v7253_v9 = vld [vmem:[#allocation8 + $0x380] ss:$16 sps:$4 sm:$0xff]   ;;  %v7256_v28 = vld [vmem:[#allocation8 + $0x388] ss:$16 sps:$4 sm:$0xff]  }
 0x308   : > { %v6425_v40 = vadd.f32 %v1998_v38, %v8290_v34  ;;  %v6457_v59 = vadd.f32 %v2224_v39, %v8293_v36  ;;  %v2000_v45 = vpop.f32.mrb[57].mxu0  ;;  %v2226_v46 = vpop.f32.mrb[57].mxu1  ;;  %3262 = vmatprep.subr.bf16.mxu0 %v7243_v22  ;;  %3488 = vmatprep.subr.bf16.mxu1 %v7246_v12  ;;  %v7261_v38 = vld [vmem:[#allocation8 + $0x3a4] ss:$16 sps:$4 sm:$0xff]   ;;  %v7264_v39 = vld [vmem:[#allocation8 + $0x3ac] ss:$16 sps:$4 sm:$0xff]  }
 0x309   : > { %v6426_v50 = vadd.f32 %v2000_v45, %v8296_v37  ;;  %v6458_v51 = vadd.f32 %v2226_v46, %v8299_v3  ;;  %v2002_v52 = vpop.f32.mrb[58].mxu0  ;;  %v2228_v53 = vpop.f32.mrb[58].mxu1  ;;  %3211 = vmatprep.mubr.bf16.mxu0 %v2328_v20  ;;  %3437 = vmatprep.mubr.bf16.mxu1 %v2328_v20 }
 0x30a   : > { %v6427_v25 = vadd.f32 %v2002_v52, %v8290_v34  ;;  %v6459_v14 = vadd.f32 %v2228_v53, %v8293_v36  ;;  %v2004_v55 = vpop.f32.mrb[59].mxu0  ;;  %v2230_v60 = vpop.f32.mrb[59].mxu1  ;;  %3212 = vmatmul.mubr.bf16.gmra.mrb[84].mxu0 %v2327_v31  ;;  %3438 = vmatmul.mubr.bf16.gmra.mrb[84].mxu1 %v2327_v31  ;;  %v2291_v10 = vmax.f32 %v6425_v40, 0.0  ;;  %v2293_v11 = vmax.f32 %v6457_v59, 0.0  ;;  %v7259_v52 = vld [vmem:[#allocation8 + $0x3a0] ss:$16 sps:$4 sm:$0xff]  }
 0x30b   : > { %v6428_v61 = vadd.f32 %v2004_v55, %v8296_v37  ;;  %v6460_v62 = vadd.f32 %v2230_v60, %v8299_v3  ;;  %3263 = vmatpush1.bf16.msra.mxu0 %v7241_v49  ;;  %3489 = vmatpush1.bf16.msra.mxu1 %v7244_v57  ;;  %v2292_v17 = vmax.f32 %v6426_v50, 0.0  ;;  %v2294_v18 = vmax.f32 %v6458_v51, 0.0  ;;  %v7262_v53 = vld [vmem:[#allocation8 + $0x3a8] ss:$16 sps:$4 sm:$0xff]  }
 0x30c   : > { %v2295_v15 = vmax.f32 %v6427_v25, 0.0  ;;  %v2297_v48 = vmax.f32 %v6459_v14, 0.0  ;;  %3264 = vmatprep.subr.bf16.mxu0 %v7249_v43  ;;  %3490 = vmatprep.subr.bf16.mxu1 %v7252_v47  ;;  %v7267_v25 = vld [vmem:[#allocation8 + $0x3c4] ss:$16 sps:$4 sm:$0xff]  }
 0x30d   : > { %v2296_v19 = vmax.f32 %v6428_v61, 0.0  ;;  %v2298_v21 = vmax.f32 %v6460_v62, 0.0 }
 0x30e   : > { %v2331_v22 = vpack.c.bf16 %v2295_v15, %v2291_v10  ;;  %v8381_v23 = vpack.c.bf16 %v2297_v48, %v2293_v11  ;;  %v7265_v11 = vld [vmem:[#allocation8 + $0x3c0] ss:$16 sps:$4 sm:$0xff]   ;;  %v7268_v15 = vld [vmem:[#allocation8 + $0x3c8] ss:$16 sps:$4 sm:$0xff]   ;;  %v7273_v48 = vld [vmem:[#allocation8 + $0x3e4] ss:$16 sps:$4 sm:$0xff]  }
 0x30f   : > { %v2332_v35 = vpack.c.bf16 %v2296_v19, %v2292_v17  ;;  %v8383_v24 = vpack.c.bf16 %v2298_v21, %v2294_v18  ;;  %3265 = vmatpush1.bf16.msra.mxu0 %v7247_v63  ;;  %v2008_v27 = vpop.f32.mrb[60].mxu0  ;;  %v2234_v12 = vpop.f32.mrb[60].mxu1  ;;  %3491 = vmatpush1.bf16.msra.mxu1 %v7250_v2  ;;  %v7271_v17 = vld [vmem:[#allocation8 + $0x3e0] ss:$16 sps:$4 sm:$0xff]   ;;  %v7274_v18 = vld [vmem:[#allocation8 + $0x3e8] ss:$16 sps:$4 sm:$0xff]  }
 0x310   : > { %v6429_v29 = vadd.f32 %v2008_v27, %v8290_v34  ;;  %v6461_v30 = vadd.f32 %v2234_v12, %v8293_v36  ;;  %v2010_v31 = vpop.f32.mrb[61].mxu0  ;;  %v2236_v20 = vpop.f32.mrb[61].mxu1  ;;  %3266 = vmatprep.subr.bf16.mxu0 %v7255_v8  ;;  %3492 = vmatprep.subr.bf16.mxu1 %v7258_v41  ;;  %v7276_v41 = vld [vmem:[#allocation8 + $0x3ec] ss:$16 sps:$4 sm:$0xff]   ;;  %v7279_v19 = vld [vmem:[#allocation10 + $0x4] ss:$16 sps:$4 sm:$0xff]  }
 0x311   : > { %v6430_v49 = vadd.f32 %v2010_v31, %v8296_v37  ;;  %v6462_v57 = vadd.f32 %v2236_v20, %v8299_v3  ;;  %v2012_v40 = vpop.f32.mrb[62].mxu0  ;;  %v2238_v59 = vpop.f32.mrb[62].mxu1  ;;  %3221 = vmatprep.mubr.bf16.mxu0 %v2332_v35  ;;  %3447 = vmatprep.mubr.bf16.mxu1 %v2332_v35  ;;  %v7282_v21 = vld [vmem:[#allocation10 + $0xc] ss:$16 sps:$4 sm:$0xff]   ;;  %v7280_v35 = vld [vmem:[#allocation10 + $0x8] ss:$16 sps:$4 sm:$0xff]  }
 0x312   : > { %v6431_v45 = vadd.f32 %v2012_v40, %v8290_v34  ;;  %v6463_v46 = vadd.f32 %v2238_v59, %v8293_v36  ;;  %v2014_v43 = vpop.f32.mrb[63].mxu0  ;;  %v2240_v47 = vpop.f32.mrb[63].mxu1  ;;  %3222 = vmatmul.mubr.bf16.gmra.mrb[88].mxu0 %v2331_v22  ;;  %3448 = vmatmul.mubr.bf16.gmra.mrb[88].mxu1 %v2331_v22  ;;  %v2299_v14 = vmax.f32 %v6429_v29, 0.0  ;;  %v2301_v55 = vmax.f32 %v6461_v30, 0.0  ;;  %v7270_v34 = vld [vmem:[#allocation8 + $0x3cc] ss:$16 sps:$4 sm:$0xff]  }
 0x313   : > { %v6432_v50 = vadd.f32 %v2014_v43, %v8296_v37  ;;  %v6464_v51 = vadd.f32 %v2240_v47, %v8299_v3  ;;  %3267 = vmatpush1.bf16.msra.mxu0 %v7253_v9  ;;  %3493 = vmatpush1.bf16.msra.mxu1 %v7256_v28  ;;  %v2300_v36 = vmax.f32 %v6430_v49, 0.0  ;;  %v2302_v62 = vmax.f32 %v6462_v57, 0.0  ;;  %v7277_v22 = vld [vmem:[#allocation10] ss:$16 sps:$4 sm:$0xff]   ;;  %v7285_v27 = vld [vmem:[#allocation10 + $0x24] ss:$16 sps:$4 sm:$0xff]  }
 0x314   : > { %v2303_v60 = vmax.f32 %v6431_v45, 0.0  ;;  %v2305_v61 = vmax.f32 %v6463_v46, 0.0  ;;  %3268 = vmatprep.subr.bf16.mxu0 %v7261_v38  ;;  %3494 = vmatprep.subr.bf16.mxu1 %v7264_v39  ;;  %v7288_v12 = vld [vmem:[#allocation10 + $0x2c] ss:$16 sps:$4 sm:$0xff]   ;;  %v7286_v9 = vld [vmem:[#allocation10 + $0x28] ss:$16 sps:$4 sm:$0xff]  }
 0x315   : > { %v2304_v63 = vmax.f32 %v6432_v50, 0.0  ;;  %v2306_v2 = vmax.f32 %v6464_v51, 0.0  ;;  %v7291_v28 = vld [vmem:[#allocation10 + $0x44] ss:$16 sps:$4 sm:$0xff]   ;;  %v7294_v29 = vld [vmem:[#allocation10 + $0x4c] ss:$16 sps:$4 sm:$0xff]  }
 0x316   : > { %v2335_v8 = vpack.c.bf16 %v2303_v60, %v2299_v14  ;;  %v8393_v37 = vpack.c.bf16 %v2305_v61, %v2301_v55  ;;  %v7289_v30 = vld [vmem:[#allocation10 + $0x40] ss:$16 sps:$4 sm:$0xff]   ;;  %v7292_v31 = vld [vmem:[#allocation10 + $0x48] ss:$16 sps:$4 sm:$0xff]   ;;  %v7297_v20 = vld [vmem:[#allocation10 + $0x64] ss:$16 sps:$4 sm:$0xff]  }
 0x317   : > { %v2336_v3 = vpack.c.bf16 %v2304_v63, %v2300_v36  ;;  %v8395_v10 = vpack.c.bf16 %v2306_v2, %v2302_v62  ;;  %3269 = vmatpush1.bf16.msra.mxu0 %v7259_v52  ;;  %3495 = vmatpush1.bf16.msra.mxu1 %v7262_v53  ;;  %v7298_v38 = vld [vmem:[#allocation10 + $0x68] ss:$16 sps:$4 sm:$0xff]   ;;  %v7303_v39 = vld [vmem:[#allocation10 + $0x84] ss:$16 sps:$4 sm:$0xff]   ;;  %v7306_v49 = vld [vmem:[#allocation10 + $0x8c] ss:$16 sps:$4 sm:$0xff]  }
 0x318   : > { %3270 = vmatprep.subr.bf16.mxu0 %v7267_v25  ;;  %3496 = vmatprep.subr.bf16.mxu1 %v7270_v34  ;;  %v7301_v57 = vld [vmem:[#allocation10 + $0x80] ss:$16 sps:$4 sm:$0xff]   ;;  %v7304_v40 = vld [vmem:[#allocation10 + $0x88] ss:$16 sps:$4 sm:$0xff]   ;;  %v7309_v59 = vld [vmem:[#allocation10 + $0xa4] ss:$16 sps:$4 sm:$0xff]  }
 0x319   : > { %3231 = vmatprep.mubr.bf16.mxu0 %v2336_v3  ;;  %3457 = vmatprep.mubr.bf16.mxu1 %v2336_v3  ;;  %v7310_v45 = vld [vmem:[#allocation10 + $0xa8] ss:$16 sps:$4 sm:$0xff]   ;;  %v7315_v46 = vld [vmem:[#allocation10 + $0xc4] ss:$16 sps:$4 sm:$0xff]   ;;  %v7318_v43 = vld [vmem:[#allocation10 + $0xcc] ss:$16 sps:$4 sm:$0xff]  }
 0x31a   : > { %3232 = vmatmul.mubr.bf16.gmra.mrb[92].mxu0 %v2335_v8  ;;  %3458 = vmatmul.mubr.bf16.gmra.mrb[92].mxu1 %v2335_v8  ;;  %v7313_v47 = vld [vmem:[#allocation10 + $0xc0] ss:$16 sps:$4 sm:$0xff]   ;;  %v7316_v50 = vld [vmem:[#allocation10 + $0xc8] ss:$16 sps:$4 sm:$0xff]   ;;  %v7321_v51 = vld [vmem:[#allocation10 + $0xe4] ss:$16 sps:$4 sm:$0xff]  }
 0x31b   : > { %3271 = vmatpush1.bf16.msra.mxu0 %v7265_v11  ;;  %3274 = vmatprep.mubr.bf16.mxu0 %v8311_v58  ;;  %v7322_v52 = vld [vmem:[#allocation10 + $0xe8] ss:$16 sps:$4 sm:$0xff]   ;;  %v7327_v53 = vld [vmem:[#allocation10 + $0x104] ss:$16 sps:$4 sm:$0xff]   ;;  %v7330_v25 = vld [vmem:[#allocation10 + $0x10c] ss:$16 sps:$4 sm:$0xff]  }
 0x31c   : > { %3497 = vmatpush1.bf16.msra.mxu1 %v7268_v15  ;;  %3500 = vmatprep.mubr.bf16.mxu1 %v8311_v58  ;;  %v7283_v58 = vld [vmem:[#allocation10 + $0x20] ss:$16 sps:$4 sm:$0xff]   ;;  %v7328_v55 = vld [vmem:[#allocation10 + $0x108] ss:$16 sps:$4 sm:$0xff]   ;;  %v7333_v60 = vld [vmem:[#allocation10 + $0x124] ss:$16 sps:$4 sm:$0xff]  }
 0x31d   : > { %3272 = vmatprep.subr.bf16.mxu0 %v7273_v48  ;;  %3498 = vmatprep.subr.bf16.mxu1 %v7276_v41  ;;  %v7325_v14 = vld [vmem:[#allocation10 + $0x100] ss:$16 sps:$4 sm:$0xff]   ;;  %v7334_v61 = vld [vmem:[#allocation10 + $0x128] ss:$16 sps:$4 sm:$0xff]   ;;  %v7339_v34 = vld [vmem:[#allocation10 + $0x144] ss:$16 sps:$4 sm:$0xff]  }
 0x31e   : > { %v7342_v36 = vld [vmem:[#allocation10 + $0x14c] ss:$16 sps:$4 sm:$0xff]   ;;  %v7337_v62 = vld [vmem:[#allocation10 + $0x140] ss:$16 sps:$4 sm:$0xff]   ;;  %v7340_v63 = vld [vmem:[#allocation10 + $0x148] ss:$16 sps:$4 sm:$0xff]  }
 0x31f   : > { %3273 = vmatpush1.bf16.msra.mxu0 %v7271_v17  ;;  %v7345_v2 = vld [vmem:[#allocation10 + $0x164] ss:$16 sps:$4 sm:$0xff]   ;;  %v7346_v8 = vld [vmem:[#allocation10 + $0x168] ss:$16 sps:$4 sm:$0xff]   ;;  %v7354_v11 = vld [vmem:[#allocation10 + $0x18c] ss:$16 sps:$4 sm:$0xff]  }
 0x320   : > { %3499 = vmatpush1.bf16.msra.mxu1 %v7274_v18  ;;  %4467 = vmatprep.subr.bf16.mxu0 %v7279_v19  ;;  %v7351_v3 = vld [vmem:[#allocation10 + $0x184] ss:$16 sps:$4 sm:$0xff]   ;;  %v7349_v15 = vld [vmem:[#allocation10 + $0x180] ss:$16 sps:$4 sm:$0xff]   ;;  %v7352_v48 = vld [vmem:[#allocation10 + $0x188] ss:$16 sps:$4 sm:$0xff]  }
 0x321   : > { %4693 = vmatprep.subr.bf16.mxu1 %v7282_v21  ;;  %v7357_v41 = vld [vmem:[#allocation10 + $0x1a4] ss:$16 sps:$4 sm:$0xff]   ;;  %v7358_v17 = vld [vmem:[#allocation10 + $0x1a8] ss:$16 sps:$4 sm:$0xff]   ;;  %v7366_v19 = vld [vmem:[#allocation10 + $0x1cc] ss:$16 sps:$4 sm:$0xff]  }
 0x322   : > { %3275 = vmatmul.mubr.bf16.vlgmr.msra.gmra.mrb[64].mxu0 %v8309_v1  ;;  %v7363_v18 = vld [vmem:[#allocation10 + $0x1c4] ss:$16 sps:$4 sm:$0xff]   ;;  %v7361_v21 = vld [vmem:[#allocation10 + $0x1c0] ss:$16 sps:$4 sm:$0xff]  }
 0x323   : > { %3501 = vmatmul.mubr.bf16.vlgmr.msra.gmra.mrb[64].mxu1 %v8309_v1  ;;  %3284 = vmatprep.mubr.bf16.mxu0 %v8323_v44  ;;  %v7300_v1 = vld [vmem:[#allocation10 + $0x6c] ss:$16 sps:$4 sm:$0xff]  }
 0x324   : > { %3510 = vmatprep.mubr.bf16.mxu1 %v8323_v44  ;;  %4468 = vmatpush1.bf16.msra.mxu0 %v7277_v22  ;;  %v7295_v44 = vld [vmem:[#allocation10 + $0x60] ss:$16 sps:$4 sm:$0xff]   ;;  %v7372_v22 = vld [vmem:[#allocation10 + $0x1ec] ss:$16 sps:$4 sm:$0xff]  }
 0x325   : > { %4694 = vmatpush1.bf16.msra.mxu1 %v7280_v35  ;;  %4469 = vmatprep.subr.bf16.mxu0 %v7285_v27  ;;  %v7367_v35 = vld [vmem:[#allocation10 + $0x1e0] ss:$16 sps:$4 sm:$0xff]   ;;  %v7370_v27 = vld [vmem:[#allocation10 + $0x1e8] ss:$16 sps:$4 sm:$0xff]  }
 0x326   : > { %4695 = vmatprep.subr.bf16.mxu1 %v7288_v12  ;;  %v7375_v12 = vld [vmem:[#allocation10 + $0x204] ss:$16 sps:$4 sm:$0xff]  }
 0x328   : > { %4470 = vmatpush1.bf16.msra.mxu0 %v7283_v58  ;;  %v7378_v58 = vld [vmem:[#allocation10 + $0x20c] ss:$16 sps:$4 sm:$0xff]  }
 0x329   : > { %4696 = vmatpush1.bf16.msra.mxu1 %v7286_v9  ;;  %4471 = vmatprep.subr.bf16.mxu0 %v7291_v28 }
 0x32a   : > { %3285 = vmatmul.mubr.bf16.gmra.mrb[68].mxu0 %v8321_v42  ;;  %4697 = vmatprep.subr.bf16.mxu1 %v7294_v29 }
 0x32b   : > { %3511 = vmatmul.mubr.bf16.gmra.mrb[68].mxu1 %v8321_v42  ;;  %3294 = vmatprep.mubr.bf16.mxu0 %v8335_v26  ;;  %v7312_v42 = vld [vmem:[#allocation10 + $0xac] ss:$16 sps:$4 sm:$0xff]  }
 0x32c   : > { %3520 = vmatprep.mubr.bf16.mxu1 %v8335_v26  ;;  %4472 = vmatpush1.bf16.msra.mxu0 %v7289_v30  ;;  %v7307_v26 = vld [vmem:[#allocation10 + $0xa0] ss:$16 sps:$4 sm:$0xff]  }
 0x32d   : > { %4698 = vmatpush1.bf16.msra.mxu1 %v7292_v31  ;;  %4473 = vmatprep.subr.bf16.mxu0 %v7297_v20 }
 0x32e   : > { %4699 = vmatprep.subr.bf16.mxu1 %v7300_v1 }
 0x330   : > { %4474 = vmatpush1.bf16.msra.mxu0 %v7295_v44 }
 0x331   : > { %4700 = vmatpush1.bf16.msra.mxu1 %v7298_v38  ;;  %4475 = vmatprep.subr.bf16.mxu0 %v7303_v39 }
 0x332   : > { %3295 = vmatmul.mubr.bf16.gmra.mrb[72].mxu0 %v8333_v13  ;;  %4701 = vmatprep.subr.bf16.mxu1 %v7306_v49 }
 0x333   : > { %3521 = vmatmul.mubr.bf16.gmra.mrb[72].mxu1 %v8333_v13  ;;  %3304 = vmatprep.mubr.bf16.mxu0 %v8347_v6  ;;  %v7324_v13 = vld [vmem:[#allocation10 + $0xec] ss:$16 sps:$4 sm:$0xff]  }
 0x334   : > { %3530 = vmatprep.mubr.bf16.mxu1 %v8347_v6  ;;  %4476 = vmatpush1.bf16.msra.mxu0 %v7301_v57  ;;  %v7319_v6 = vld [vmem:[#allocation10 + $0xe0] ss:$16 sps:$4 sm:$0xff]  }
 0x335   : > { %4702 = vmatpush1.bf16.msra.mxu1 %v7304_v40  ;;  %4477 = vmatprep.subr.bf16.mxu0 %v7309_v59 }
 0x336   : > { %4703 = vmatprep.subr.bf16.mxu1 %v7312_v42 }
 0x338   : > { %4478 = vmatpush1.bf16.msra.mxu0 %v7307_v26 }
 0x339   : > { %4704 = vmatpush1.bf16.msra.mxu1 %v7310_v45  ;;  %4479 = vmatprep.subr.bf16.mxu0 %v7315_v46 }
 0x33a   : > { %3305 = vmatmul.mubr.bf16.gmra.mrb[76].mxu0 %v8345_v5  ;;  %4705 = vmatprep.subr.bf16.mxu1 %v7318_v43 }
 0x33b   : > { %3531 = vmatmul.mubr.bf16.gmra.mrb[76].mxu1 %v8345_v5  ;;  %3314 = vmatprep.mubr.bf16.mxu0 %v8359_v0  ;;  %v7336_v5 = vld [vmem:[#allocation10 + $0x12c] ss:$16 sps:$4 sm:$0xff]  }
 0x33c   : > { %3540 = vmatprep.mubr.bf16.mxu1 %v8359_v0  ;;  %4480 = vmatpush1.bf16.msra.mxu0 %v7313_v47  ;;  %v7331_v0 = vld [vmem:[#allocation10 + $0x120] ss:$16 sps:$4 sm:$0xff]  }
 0x33d   : > { %4706 = vmatpush1.bf16.msra.mxu1 %v7316_v50  ;;  %4481 = vmatprep.subr.bf16.mxu0 %v7321_v51 }
 0x33e   : > { %4707 = vmatprep.subr.bf16.mxu1 %v7324_v13 }
 0x340   : > { %4482 = vmatpush1.bf16.msra.mxu0 %v7319_v6 }
 0x341   : > { %4708 = vmatpush1.bf16.msra.mxu1 %v7322_v52  ;;  %4483 = vmatprep.subr.bf16.mxu0 %v7327_v53 }
 0x342   : > { %3315 = vmatmul.mubr.bf16.gmra.mrb[80].mxu0 %v8357_v32  ;;  %4709 = vmatprep.subr.bf16.mxu1 %v7330_v25 }
 0x343   : > { %3541 = vmatmul.mubr.bf16.gmra.mrb[80].mxu1 %v8357_v32  ;;  %3324 = vmatprep.mubr.bf16.mxu0 %v8371_v16  ;;  %v7348_v32 = vld [vmem:[#allocation10 + $0x16c] ss:$16 sps:$4 sm:$0xff]  }
 0x344   : > { %3550 = vmatprep.mubr.bf16.mxu1 %v8371_v16  ;;  %4484 = vmatpush1.bf16.msra.mxu0 %v7325_v14  ;;  %v7343_v16 = vld [vmem:[#allocation10 + $0x160] ss:$16 sps:$4 sm:$0xff]  }
 0x345   : > { %4710 = vmatpush1.bf16.msra.mxu1 %v7328_v55  ;;  %4485 = vmatprep.subr.bf16.mxu0 %v7333_v60 }
 0x346   : > { %4711 = vmatprep.subr.bf16.mxu1 %v7336_v5 }
 0x348   : > { %4486 = vmatpush1.bf16.msra.mxu0 %v7331_v0 }
 0x349   : > { %4712 = vmatpush1.bf16.msra.mxu1 %v7334_v61  ;;  %4487 = vmatprep.subr.bf16.mxu0 %v7339_v34  ;;  %v7373_v61 = vld [vmem:[#allocation10 + $0x200] ss:$16 sps:$4 sm:$0xff]   ;;  %v7376_v34 = vld [vmem:[#allocation10 + $0x208] ss:$16 sps:$4 sm:$0xff]  }
 0x34a   : > { %3325 = vmatmul.mubr.bf16.gmra.mrb[84].mxu0 %v8369_v33  ;;  %4713 = vmatprep.subr.bf16.mxu1 %v7342_v36 }
 0x34b   : > { %3551 = vmatmul.mubr.bf16.gmra.mrb[84].mxu1 %v8369_v33  ;;  %3334 = vmatprep.mubr.bf16.mxu0 %v8383_v24  ;;  %v7360_v33 = vld [vmem:[#allocation10 + $0x1ac] ss:$16 sps:$4 sm:$0xff]  }
 0x34c   : > { %3560 = vmatprep.mubr.bf16.mxu1 %v8383_v24  ;;  %4488 = vmatpush1.bf16.msra.mxu0 %v7337_v62  ;;  %v7355_v24 = vld [vmem:[#allocation10 + $0x1a0] ss:$16 sps:$4 sm:$0xff]  }
 0x34d   : > { %4714 = vmatpush1.bf16.msra.mxu1 %v7340_v63  ;;  %4489 = vmatprep.subr.bf16.mxu0 %v7345_v2 }
 0x34e   : > { %4715 = vmatprep.subr.bf16.mxu1 %v7348_v32  ;;  %v7381_v32 = vld [vmem:[#allocation10 + $0x224] ss:$16 sps:$4 sm:$0xff]  }
 0x350   : > { %4490 = vmatpush1.bf16.msra.mxu0 %v7343_v16  ;;  %v7384_v16 = vld [vmem:[#allocation10 + $0x22c] ss:$16 sps:$4 sm:$0xff]  }
 0x351   : > { %4716 = vmatpush1.bf16.msra.mxu1 %v7346_v8  ;;  %4491 = vmatprep.subr.bf16.mxu0 %v7351_v3 }
 0x352   : > { %3335 = vmatmul.mubr.bf16.gmra.mrb[88].mxu0 %v8381_v23  ;;  %4717 = vmatprep.subr.bf16.mxu1 %v7354_v11 }
 0x353   : > { %3561 = vmatmul.mubr.bf16.gmra.mrb[88].mxu1 %v8381_v23  ;;  %3344 = vmatprep.mubr.bf16.mxu0 %v8395_v10  ;;  %v7364_v23 = vld [vmem:[#allocation10 + $0x1c8] ss:$16 sps:$4 sm:$0xff]  }
 0x354   : > { %3570 = vmatprep.mubr.bf16.mxu1 %v8395_v10  ;;  %4492 = vmatpush1.bf16.msra.mxu0 %v7349_v15  ;;  %v7369_v10 = vld [vmem:[#allocation10 + $0x1e4] ss:$16 sps:$4 sm:$0xff]  }
 0x355   : > { %4718 = vmatpush1.bf16.msra.mxu1 %v7352_v48  ;;  %4493 = vmatprep.subr.bf16.mxu0 %v7357_v41 }
 0x356   : > { %4719 = vmatprep.subr.bf16.mxu1 %v7360_v33 }
 0x358   : > { %4494 = vmatpush1.bf16.msra.mxu0 %v7355_v24 }
 0x359   : > { %4720 = vmatpush1.bf16.msra.mxu1 %v7358_v17  ;;  %4495 = vmatprep.subr.bf16.mxu0 %v7363_v18 }
 0x35a   : > { %3345 = vmatmul.mubr.bf16.gmra.mrb[92].mxu0 %v8393_v37  ;;  %4721 = vmatprep.subr.bf16.mxu1 %v7366_v19 }
 0x35b   : > { %3571 = vmatmul.mubr.bf16.gmra.mrb[92].mxu1 %v8393_v37  ;;  %v2467_v37 = vld [vmem:[%s8740_s6] sm:$0xf] }
 0x35c   : > { %4496 = vmatpush1.bf16.msra.mxu0 %v7361_v21  ;;  %v8433_v9 = vrot.slane %v2467_v37, %v8135_v54  ;;  %v8436_v28 = vrot.slane %v2467_v37, %v8152_v4  ;;  %v8439_v29 = vrot.slane %v2467_v37, %v8140_v56  ;;  %v8442_v30 = vrot.slane %v2467_v37, %v8154_v7  ;;  %v7379_v21 = vld [vmem:[#allocation10 + $0x220] ss:$16 sps:$4 sm:$0xff]  }
 0x35d   : > { %4722 = vmatpush1.bf16.msra.mxu1 %v7364_v23  ;;  %4497 = vmatprep.subr.bf16.mxu0 %v7369_v10  ;;  %v7382_v23 = vld [vmem:[#allocation10 + $0x228] ss:$16 sps:$4 sm:$0xff]  }
 0x35e   : > { %4723 = vmatprep.subr.bf16.mxu1 %v7372_v22 }
 0x360   : > { %4498 = vmatpush1.bf16.msra.mxu0 %v7367_v35 }
 0x361   : > { %4724 = vmatpush1.bf16.msra.mxu1 %v7370_v27  ;;  %4580 = vmatprep.subr.bf16.mxu0 %v7375_v12  ;;  %v7387_v27 = vld [vmem:[#allocation10 + $0x244] ss:$16 sps:$4 sm:$0xff]   ;;  %v7390_v12 = vld [vmem:[#allocation10 + $0x24c] ss:$16 sps:$4 sm:$0xff]  }
 0x362   : > { %4806 = vmatprep.subr.bf16.mxu1 %v7378_v58 }
 0x3f5   : > { %v3276_v31 = vpop.f32.mrb[64].mxu0 }
 0x3f6   : > { %v6465_v20 = vadd.f32 %v3276_v31, %v8433_v9  ;;  %v3502_v1 = vpop.f32.mrb[64].mxu1  ;;  %v3278_v44 = vpop.f32.mrb[65].mxu0 }
 0x3f7   : > { %v6497_v38 = vadd.f32 %v3502_v1, %v8436_v28  ;;  %v6466_v39 = vadd.f32 %v3278_v44, %v8439_v29  ;;  %v3504_v49 = vpop.f32.mrb[65].mxu1  ;;  %v3280_v57 = vpop.f32.mrb[66].mxu0 }
 0x3f8   : > { %v6498_v40 = vadd.f32 %v3504_v49, %v8442_v30  ;;  %v6467_v59 = vadd.f32 %v3280_v57, %v8433_v9  ;;  %v3506_v42 = vpop.f32.mrb[66].mxu1  ;;  %v3282_v26 = vpop.f32.mrb[67].mxu0  ;;  %v3581_v47 = vmax.f32 %v6465_v20, 0.0 }
 0x3f9   : > { %v6499_v45 = vadd.f32 %v3506_v42, %v8436_v28  ;;  %v6468_v46 = vadd.f32 %v3282_v26, %v8439_v29  ;;  %v3508_v43 = vpop.f32.mrb[67].mxu1  ;;  %v3583_v13 = vmax.f32 %v6497_v38, 0.0  ;;  %v3582_v6 = vmax.f32 %v6466_v39, 0.0 }
 0x3fa   : > { %v3585_v50 = vmax.f32 %v6467_v59, 0.0  ;;  %v6500_v51 = vadd.f32 %v3508_v43, %v8442_v30  ;;  %v3584_v25 = vmax.f32 %v6498_v40, 0.0  ;;  %v7385_v40 = vld [vmem:[#allocation10 + $0x240] ss:$16 sps:$4 sm:$0xff]   ;;  %v7388_v59 = vld [vmem:[#allocation10 + $0x248] ss:$16 sps:$4 sm:$0xff]  }
 0x3fb   : > { %v3587_v52 = vmax.f32 %v6499_v45, 0.0  ;;  %v3586_v53 = vmax.f32 %v6468_v46, 0.0  ;;  %v7393_v43 = vld [vmem:[#allocation10 + $0x264] ss:$16 sps:$4 sm:$0xff]  }
 0x3fc   : > { %v3645_v14 = vpack.c.bf16 %v3585_v50, %v3581_v47  ;;  %v3588_v55 = vmax.f32 %v6500_v51, 0.0  ;;  %v7396_v47 = vld [vmem:[#allocation10 + $0x26c] ss:$16 sps:$4 sm:$0xff]  }
 0x3fd   : > { %v8452_v60 = vpack.c.bf16 %v3587_v52, %v3583_v13  ;;  %v3646_v5 = vpack.c.bf16 %v3586_v53, %v3582_v6  ;;  %v3286_v0 = vpop.f32.mrb[68].mxu0 }
 0x3fe   : > { %v8454_v36 = vpack.c.bf16 %v3588_v55, %v3584_v25  ;;  %v6469_v62 = vadd.f32 %v3286_v0, %v8433_v9  ;;  %v3512_v63 = vpop.f32.mrb[68].mxu1  ;;  %v3288_v2 = vpop.f32.mrb[69].mxu0 }
 0x3ff   : > { %v6501_v8 = vadd.f32 %v3512_v63, %v8436_v28  ;;  %v6470_v3 = vadd.f32 %v3288_v2, %v8439_v29  ;;  %v3514_v11 = vpop.f32.mrb[69].mxu1  ;;  %v3290_v15 = vpop.f32.mrb[70].mxu0  ;;  %4499 = vmatprep.mubr.bf16.mxu0 %v3646_v5  ;;  %4725 = vmatprep.mubr.bf16.mxu1 %v3646_v5 }
 0x400   : > { %v6502_v48 = vadd.f32 %v3514_v11, %v8442_v30  ;;  %v6471_v41 = vadd.f32 %v3290_v15, %v8433_v9  ;;  %v3516_v33 = vpop.f32.mrb[70].mxu1  ;;  %v3292_v24 = vpop.f32.mrb[71].mxu0  ;;  %4500 = vmatmul.mubr.bf16.vlgmr.msra.gmra.mrb[96].mxu0 %v3645_v14  ;;  %4726 = vmatmul.mubr.bf16.vlgmr.msra.gmra.mrb[96].mxu1 %v3645_v14  ;;  %v3589_v10 = vmax.f32 %v6469_v62, 0.0 }
 0x401   : > { %v6503_v17 = vadd.f32 %v3516_v33, %v8436_v28  ;;  %v6472_v18 = vadd.f32 %v3292_v24, %v8439_v29  ;;  %v3518_v19 = vpop.f32.mrb[71].mxu1  ;;  %4581 = vmatpush1.bf16.msra.mxu0 %v7373_v61  ;;  %4807 = vmatpush1.bf16.msra.mxu1 %v7376_v34  ;;  %v3591_v58 = vmax.f32 %v6501_v8, 0.0  ;;  %v3590_v37 = vmax.f32 %v6470_v3, 0.0  ;;  %v7391_v61 = vld [vmem:[#allocation10 + $0x260] ss:$16 sps:$4 sm:$0xff]  }
 0x402   : > { %v3593_v22 = vmax.f32 %v6471_v41, 0.0  ;;  %v6504_v35 = vadd.f32 %v3518_v19, %v8442_v30  ;;  %4582 = vmatprep.subr.bf16.mxu0 %v7381_v32  ;;  %4808 = vmatprep.subr.bf16.mxu1 %v7384_v16  ;;  %v3592_v1 = vmax.f32 %v6502_v48, 0.0  ;;  %v7394_v34 = vld [vmem:[#allocation10 + $0x268] ss:$16 sps:$4 sm:$0xff]   ;;  %v7399_v32 = vld [vmem:[#allocation10 + $0x284] ss:$16 sps:$4 sm:$0xff]  }
 0x403   : > { %v3595_v31 = vmax.f32 %v6503_v17, 0.0  ;;  %v3594_v20 = vmax.f32 %v6472_v18, 0.0  ;;  %v7402_v16 = vld [vmem:[#allocation10 + $0x28c] ss:$16 sps:$4 sm:$0xff]   ;;  %v7397_v19 = vld [vmem:[#allocation10 + $0x280] ss:$16 sps:$4 sm:$0xff]  }
 0x404   : > { %v3649_v44 = vpack.c.bf16 %v3593_v22, %v3589_v10  ;;  %v3596_v38 = vmax.f32 %v6504_v35, 0.0 }
 0x405   : > { %v8464_v39 = vpack.c.bf16 %v3595_v31, %v3591_v58  ;;  %v3650_v49 = vpack.c.bf16 %v3594_v20, %v3590_v37  ;;  %4583 = vmatpush1.bf16.msra.mxu0 %v7379_v21  ;;  %v3296_v57 = vpop.f32.mrb[72].mxu0  ;;  %4809 = vmatpush1.bf16.msra.mxu1 %v7382_v23  ;;  %v7400_v21 = vld [vmem:[#allocation10 + $0x288] ss:$16 sps:$4 sm:$0xff]  }
 0x406   : > { %v8466_v42 = vpack.c.bf16 %v3596_v38, %v3592_v1  ;;  %v6473_v26 = vadd.f32 %v3296_v57, %v8433_v9  ;;  %v3522_v45 = vpop.f32.mrb[72].mxu1  ;;  %v3298_v46 = vpop.f32.mrb[73].mxu0  ;;  %4584 = vmatprep.subr.bf16.mxu0 %v7387_v27  ;;  %4810 = vmatprep.subr.bf16.mxu1 %v7390_v12  ;;  %v7405_v27 = vld [vmem:[#allocation10 + $0x2a4] ss:$16 sps:$4 sm:$0xff]   ;;  %v7408_v12 = vld [vmem:[#allocation10 + $0x2ac] ss:$16 sps:$4 sm:$0xff]  }
 0x407   : > { %v6505_v50 = vadd.f32 %v3522_v45, %v8436_v28  ;;  %v6474_v51 = vadd.f32 %v3298_v46, %v8439_v29  ;;  %v3524_v13 = vpop.f32.mrb[73].mxu1  ;;  %v3300_v6 = vpop.f32.mrb[74].mxu0  ;;  %4509 = vmatprep.mubr.bf16.mxu0 %v3650_v49  ;;  %4735 = vmatprep.mubr.bf16.mxu1 %v3650_v49  ;;  %v7406_v45 = vld [vmem:[#allocation10 + $0x2a8] ss:$16 sps:$4 sm:$0xff]  }
 0x408   : > { %v6506_v52 = vadd.f32 %v3524_v13, %v8442_v30  ;;  %v6475_v53 = vadd.f32 %v3300_v6, %v8433_v9  ;;  %v3526_v25 = vpop.f32.mrb[74].mxu1  ;;  %v3302_v14 = vpop.f32.mrb[75].mxu0  ;;  %4510 = vmatmul.mubr.bf16.gmra.mrb[100].mxu0 %v3649_v44  ;;  %4736 = vmatmul.mubr.bf16.gmra.mrb[100].mxu1 %v3649_v44  ;;  %v3597_v62 = vmax.f32 %v6473_v26, 0.0  ;;  %v7403_v26 = vld [vmem:[#allocation10 + $0x2a0] ss:$16 sps:$4 sm:$0xff]  }
 0x409   : > { %v6507_v55 = vadd.f32 %v3526_v25, %v8436_v28  ;;  %v6476_v5 = vadd.f32 %v3302_v14, %v8439_v29  ;;  %v3528_v0 = vpop.f32.mrb[75].mxu1  ;;  %4585 = vmatpush1.bf16.msra.mxu0 %v7385_v40  ;;  %4811 = vmatpush1.bf16.msra.mxu1 %v7388_v59  ;;  %v3599_v8 = vmax.f32 %v6505_v50, 0.0  ;;  %v3598_v3 = vmax.f32 %v6474_v51, 0.0  ;;  %v7411_v50 = vld [vmem:[#allocation10 + $0x2c4] ss:$16 sps:$4 sm:$0xff]  }
 0x40a   : > { %v3601_v63 = vmax.f32 %v6475_v53, 0.0  ;;  %v6508_v2 = vadd.f32 %v3528_v0, %v8442_v30  ;;  %4586 = vmatprep.subr.bf16.mxu0 %v7393_v43  ;;  %4812 = vmatprep.subr.bf16.mxu1 %v7396_v47  ;;  %v3600_v48 = vmax.f32 %v6506_v52, 0.0  ;;  %v7414_v51 = vld [vmem:[#allocation10 + $0x2cc] ss:$16 sps:$4 sm:$0xff]  }
 0x40b   : > { %v3603_v11 = vmax.f32 %v6507_v55, 0.0  ;;  %v3602_v15 = vmax.f32 %v6476_v5, 0.0 }
 0x40c   : > { %v3653_v41 = vpack.c.bf16 %v3601_v63, %v3597_v62  ;;  %v3604_v33 = vmax.f32 %v6508_v2, 0.0  ;;  %v7412_v62 = vld [vmem:[#allocation10 + $0x2c8] ss:$16 sps:$4 sm:$0xff]  }
 0x40d   : > { %v8476_v24 = vpack.c.bf16 %v3603_v11, %v3599_v8  ;;  %v3654_v17 = vpack.c.bf16 %v3602_v15, %v3598_v3  ;;  %4587 = vmatpush1.bf16.msra.mxu0 %v7391_v61  ;;  %v3306_v18 = vpop.f32.mrb[76].mxu0  ;;  %4813 = vmatpush1.bf16.msra.mxu1 %v7394_v34  ;;  %v7409_v34 = vld [vmem:[#allocation10 + $0x2c0] ss:$16 sps:$4 sm:$0xff]   ;;  %v7417_v8 = vld [vmem:[#allocation10 + $0x2e4] ss:$16 sps:$4 sm:$0xff]  }
 0x40e   : > { %v8478_v23 = vpack.c.bf16 %v3604_v33, %v3600_v48  ;;  %v6477_v10 = vadd.f32 %v3306_v18, %v8433_v9  ;;  %v3532_v22 = vpop.f32.mrb[76].mxu1  ;;  %v3308_v35 = vpop.f32.mrb[77].mxu0  ;;  %4588 = vmatprep.subr.bf16.mxu0 %v7399_v32  ;;  %4814 = vmatprep.subr.bf16.mxu1 %v7402_v16  ;;  %v7420_v3 = vld [vmem:[#allocation10 + $0x2ec] ss:$16 sps:$4 sm:$0xff]  }
 0x40f   : > { %v6509_v58 = vadd.f32 %v3532_v22, %v8436_v28  ;;  %v6478_v37 = vadd.f32 %v3308_v35, %v8439_v29  ;;  %v3534_v31 = vpop.f32.mrb[77].mxu1  ;;  %v3310_v20 = vpop.f32.mrb[78].mxu0  ;;  %4519 = vmatprep.mubr.bf16.mxu0 %v3654_v17  ;;  %4745 = vmatprep.mubr.bf16.mxu1 %v3654_v17  ;;  %v7415_v35 = vld [vmem:[#allocation10 + $0x2e0] ss:$16 sps:$4 sm:$0xff]  }
 0x410   : > { %v6510_v1 = vadd.f32 %v3534_v31, %v8442_v30  ;;  %v6479_v44 = vadd.f32 %v3310_v20, %v8433_v9  ;;  %v3536_v38 = vpop.f32.mrb[78].mxu1  ;;  %v3312_v49 = vpop.f32.mrb[79].mxu0  ;;  %4520 = vmatmul.mubr.bf16.gmra.mrb[104].mxu0 %v3653_v41  ;;  %4746 = vmatmul.mubr.bf16.gmra.mrb[104].mxu1 %v3653_v41  ;;  %v3605_v46 = vmax.f32 %v6477_v10, 0.0  ;;  %v7423_v31 = vld [vmem:[#allocation10 + $0x304] ss:$16 sps:$4 sm:$0xff]  }
 0x411   : > { %v6511_v57 = vadd.f32 %v3536_v38, %v8436_v28  ;;  %v6480_v40 = vadd.f32 %v3312_v49, %v8439_v29  ;;  %v3538_v59 = vpop.f32.mrb[79].mxu1  ;;  %4589 = vmatpush1.bf16.msra.mxu0 %v7397_v19  ;;  %4815 = vmatpush1.bf16.msra.mxu1 %v7400_v21  ;;  %v3607_v13 = vmax.f32 %v6509_v58, 0.0  ;;  %v3606_v6 = vmax.f32 %v6478_v37, 0.0  ;;  %v7426_v20 = vld [vmem:[#allocation10 + $0x30c] ss:$16 sps:$4 sm:$0xff]  }
 0x412   : > { %v3609_v43 = vmax.f32 %v6479_v44, 0.0  ;;  %v6512_v47 = vadd.f32 %v3538_v59, %v8442_v30  ;;  %4590 = vmatprep.subr.bf16.mxu0 %v7405_v27  ;;  %4816 = vmatprep.subr.bf16.mxu1 %v7408_v12  ;;  %v3608_v25 = vmax.f32 %v6510_v1, 0.0  ;;  %v7418_v27 = vld [vmem:[#allocation10 + $0x2e8] ss:$16 sps:$4 sm:$0xff]  }
 0x413   : > { %v3611_v52 = vmax.f32 %v6511_v57, 0.0  ;;  %v3610_v53 = vmax.f32 %v6480_v40, 0.0 }
 0x414   : > { %v3657_v14 = vpack.c.bf16 %v3609_v43, %v3605_v46  ;;  %v3612_v55 = vmax.f32 %v6512_v47, 0.0  ;;  %v7421_v43 = vld [vmem:[#allocation10 + $0x300] ss:$16 sps:$4 sm:$0xff]   ;;  %v7424_v47 = vld [vmem:[#allocation10 + $0x308] ss:$16 sps:$4 sm:$0xff]  }
 0x415   : > { %v8488_v5 = vpack.c.bf16 %v3611_v52, %v3607_v13  ;;  %v3658_v0 = vpack.c.bf16 %v3610_v53, %v3606_v6  ;;  %4591 = vmatpush1.bf16.msra.mxu0 %v7403_v26  ;;  %v3316_v61 = vpop.f32.mrb[80].mxu0  ;;  %4817 = vmatpush1.bf16.msra.mxu1 %v7406_v45  ;;  %v7429_v52 = vld [vmem:[#allocation10 + $0x324] ss:$16 sps:$4 sm:$0xff]   ;;  %v7432_v53 = vld [vmem:[#allocation10 + $0x32c] ss:$16 sps:$4 sm:$0xff]  }
 0x416   : > { %v8490_v63 = vpack.c.bf16 %v3612_v55, %v3608_v25  ;;  %v6481_v2 = vadd.f32 %v3316_v61, %v8433_v9  ;;  %v3542_v32 = vpop.f32.mrb[80].mxu1  ;;  %v3318_v16 = vpop.f32.mrb[81].mxu0  ;;  %4592 = vmatprep.subr.bf16.mxu0 %v7411_v50  ;;  %4818 = vmatprep.subr.bf16.mxu1 %v7414_v51 }
 0x417   : > { %v6513_v11 = vadd.f32 %v3542_v32, %v8436_v28  ;;  %v6482_v15 = vadd.f32 %v3318_v16, %v8439_v29  ;;  %v3544_v48 = vpop.f32.mrb[81].mxu1  ;;  %v3320_v41 = vpop.f32.mrb[82].mxu0  ;;  %4529 = vmatprep.mubr.bf16.mxu0 %v3658_v0  ;;  %4755 = vmatprep.mubr.bf16.mxu1 %v3658_v0 }
 0x418   : > { %v6514_v33 = vadd.f32 %v3544_v48, %v8442_v30  ;;  %v6483_v17 = vadd.f32 %v3320_v41, %v8433_v9  ;;  %v3546_v18 = vpop.f32.mrb[82].mxu1  ;;  %v3322_v19 = vpop.f32.mrb[83].mxu0  ;;  %4530 = vmatmul.mubr.bf16.gmra.mrb[108].mxu0 %v3657_v14  ;;  %4756 = vmatmul.mubr.bf16.gmra.mrb[108].mxu1 %v3657_v14  ;;  %v3613_v12 = vmax.f32 %v6481_v2, 0.0 }
 0x419   : > { %v6515_v21 = vadd.f32 %v3546_v18, %v8436_v28  ;;  %v6484_v10 = vadd.f32 %v3322_v19, %v8439_v29  ;;  %v3548_v22 = vpop.f32.mrb[83].mxu1  ;;  %4593 = vmatpush1.bf16.msra.mxu0 %v7409_v34  ;;  %4819 = vmatpush1.bf16.msra.mxu1 %v7412_v62  ;;  %v3615_v1 = vmax.f32 %v6513_v11, 0.0  ;;  %v3614_v44 = vmax.f32 %v6482_v15, 0.0  ;;  %v7430_v11 = vld [vmem:[#allocation10 + $0x328] ss:$16 sps:$4 sm:$0xff]  }
 0x41a   : > { %v3617_v58 = vmax.f32 %v6483_v17, 0.0  ;;  %v6516_v37 = vadd.f32 %v3548_v22, %v8442_v30  ;;  %4594 = vmatprep.subr.bf16.mxu0 %v7417_v8  ;;  %4820 = vmatprep.subr.bf16.mxu1 %v7420_v3  ;;  %v3616_v57 = vmax.f32 %v6514_v33, 0.0  ;;  %v7427_v3 = vld [vmem:[#allocation10 + $0x320] ss:$16 sps:$4 sm:$0xff]   ;;  %v7435_v33 = vld [vmem:[#allocation10 + $0x344] ss:$16 sps:$4 sm:$0xff]  }
 0x41b   : > { %v3619_v38 = vmax.f32 %v6515_v21, 0.0  ;;  %v3618_v49 = vmax.f32 %v6484_v10, 0.0  ;;  %v7438_v17 = vld [vmem:[#allocation10 + $0x34c] ss:$16 sps:$4 sm:$0xff]  }
 0x41c   : > { %v3661_v40 = vpack.c.bf16 %v3617_v58, %v3613_v12  ;;  %v3620_v59 = vmax.f32 %v6516_v37, 0.0 }
 0x41d   : > { %v8500_v26 = vpack.c.bf16 %v3619_v38, %v3615_v1  ;;  %v3662_v45 = vpack.c.bf16 %v3618_v49, %v3614_v44  ;;  %4595 = vmatpush1.bf16.msra.mxu0 %v7415_v35  ;;  %v3326_v46 = vpop.f32.mrb[84].mxu0  ;;  %4821 = vmatpush1.bf16.msra.mxu1 %v7418_v27 }
 0x41e   : > { %v8502_v50 = vpack.c.bf16 %v3620_v59, %v3616_v57  ;;  %v6485_v51 = vadd.f32 %v3326_v46, %v8433_v9  ;;  %v3552_v13 = vpop.f32.mrb[84].mxu1  ;;  %v3328_v6 = vpop.f32.mrb[85].mxu0  ;;  %4596 = vmatprep.subr.bf16.mxu0 %v7423_v31  ;;  %4822 = vmatprep.subr.bf16.mxu1 %v7426_v20  ;;  %v7433_v31 = vld [vmem:[#allocation10 + $0x340] ss:$16 sps:$4 sm:$0xff]   ;;  %v7436_v20 = vld [vmem:[#allocation10 + $0x348] ss:$16 sps:$4 sm:$0xff]  }
 0x41f   : > { %v6517_v25 = vadd.f32 %v3552_v13, %v8436_v28  ;;  %v6486_v14 = vadd.f32 %v3328_v6, %v8439_v29  ;;  %v3554_v55 = vpop.f32.mrb[85].mxu1  ;;  %v3330_v0 = vpop.f32.mrb[86].mxu0  ;;  %4539 = vmatprep.mubr.bf16.mxu0 %v3662_v45  ;;  %4765 = vmatprep.mubr.bf16.mxu1 %v3662_v45  ;;  %v7441_v57 = vld [vmem:[#allocation10 + $0x364] ss:$16 sps:$4 sm:$0xff]  }
 0x420   : > { %v6518_v61 = vadd.f32 %v3554_v55, %v8442_v30  ;;  %v6487_v34 = vadd.f32 %v3330_v0, %v8433_v9  ;;  %v3556_v62 = vpop.f32.mrb[86].mxu1  ;;  %v3332_v2 = vpop.f32.mrb[87].mxu0  ;;  %4540 = vmatmul.mubr.bf16.gmra.mrb[112].mxu0 %v3661_v40  ;;  %4766 = vmatmul.mubr.bf16.gmra.mrb[112].mxu1 %v3661_v40  ;;  %v3621_v15 = vmax.f32 %v6485_v51, 0.0  ;;  %v7444_v40 = vld [vmem:[#allocation10 + $0x36c] ss:$16 sps:$4 sm:$0xff]  }
 0x421   : > { %v6519_v32 = vadd.f32 %v3556_v62, %v8436_v28  ;;  %v6488_v16 = vadd.f32 %v3332_v2, %v8439_v29  ;;  %v3558_v8 = vpop.f32.mrb[87].mxu1  ;;  %4597 = vmatpush1.bf16.msra.mxu0 %v7421_v43  ;;  %4823 = vmatpush1.bf16.msra.mxu1 %v7424_v47  ;;  %v3623_v18 = vmax.f32 %v6517_v25, 0.0  ;;  %v3622_v19 = vmax.f32 %v6486_v14, 0.0  ;;  %v7439_v14 = vld [vmem:[#allocation10 + $0x360] ss:$16 sps:$4 sm:$0xff]  }
 0x422   : > { %v3625_v48 = vmax.f32 %v6487_v34, 0.0  ;;  %v6520_v41 = vadd.f32 %v3558_v8, %v8442_v30  ;;  %4598 = vmatprep.subr.bf16.mxu0 %v7429_v52  ;;  %4824 = vmatprep.subr.bf16.mxu1 %v7432_v53  ;;  %v3624_v22 = vmax.f32 %v6518_v61, 0.0  ;;  %v7442_v55 = vld [vmem:[#allocation10 + $0x368] ss:$16 sps:$4 sm:$0xff]   ;;  %v7447_v62 = vld [vmem:[#allocation10 + $0x384] ss:$16 sps:$4 sm:$0xff]  }
 0x423   : > { %v3627_v21 = vmax.f32 %v6519_v32, 0.0  ;;  %v3626_v10 = vmax.f32 %v6488_v16, 0.0  ;;  %v7450_v2 = vld [vmem:[#allocation10 + $0x38c] ss:$16 sps:$4 sm:$0xff]  }
 0x424   : > { %v3665_v35 = vpack.c.bf16 %v3625_v48, %v3621_v15  ;;  %v3628_v27 = vmax.f32 %v6520_v41, 0.0 }
 0x425   : > { %v8512_v12 = vpack.c.bf16 %v3627_v21, %v3623_v18  ;;  %v3666_v58 = vpack.c.bf16 %v3626_v10, %v3622_v19  ;;  %4599 = vmatpush1.bf16.msra.mxu0 %v7427_v3  ;;  %v3336_v37 = vpop.f32.mrb[88].mxu0  ;;  %4825 = vmatpush1.bf16.msra.mxu1 %v7430_v11  ;;  %v7445_v18 = vld [vmem:[#allocation10 + $0x380] ss:$16 sps:$4 sm:$0xff]   ;;  %v7448_v19 = vld [vmem:[#allocation10 + $0x388] ss:$16 sps:$4 sm:$0xff]  }
 0x426   : > { %v8514_v1 = vpack.c.bf16 %v3628_v27, %v3624_v22  ;;  %v6489_v44 = vadd.f32 %v3336_v37, %v8433_v9  ;;  %v3562_v38 = vpop.f32.mrb[88].mxu1  ;;  %v3338_v49 = vpop.f32.mrb[89].mxu0  ;;  %4600 = vmatprep.subr.bf16.mxu0 %v7435_v33  ;;  %4826 = vmatprep.subr.bf16.mxu1 %v7438_v17  ;;  %v7453_v27 = vld [vmem:[#allocation10 + $0x3a4] ss:$16 sps:$4 sm:$0xff]  }
 0x427   : > { %v6521_v59 = vadd.f32 %v3562_v38, %v8436_v28  ;;  %v6490_v45 = vadd.f32 %v3338_v49, %v8439_v29  ;;  %v3564_v46 = vpop.f32.mrb[89].mxu1  ;;  %v3340_v43 = vpop.f32.mrb[90].mxu0  ;;  %4549 = vmatprep.mubr.bf16.mxu0 %v3666_v58  ;;  %4775 = vmatprep.mubr.bf16.mxu1 %v3666_v58  ;;  %v7456_v58 = vld [vmem:[#allocation10 + $0x3ac] ss:$16 sps:$4 sm:$0xff]  }
 0x428   : > { %v6522_v47 = vadd.f32 %v3564_v46, %v8442_v30  ;;  %v6491_v51 = vadd.f32 %v3340_v43, %v8433_v9  ;;  %v3566_v13 = vpop.f32.mrb[90].mxu1  ;;  %v3342_v6 = vpop.f32.mrb[91].mxu0  ;;  %4550 = vmatmul.mubr.bf16.gmra.mrb[116].mxu0 %v3665_v35  ;;  %4776 = vmatmul.mubr.bf16.gmra.mrb[116].mxu1 %v3665_v35  ;;  %v3629_v0 = vmax.f32 %v6489_v44, 0.0  ;;  %v7451_v43 = vld [vmem:[#allocation10 + $0x3a0] ss:$16 sps:$4 sm:$0xff]  }
 0x429   : > { %v6523_v52 = vadd.f32 %v3566_v13, %v8436_v28  ;;  %v6492_v53 = vadd.f32 %v3342_v6, %v8439_v29  ;;  %v3568_v25 = vpop.f32.mrb[91].mxu1  ;;  %4601 = vmatpush1.bf16.msra.mxu0 %v7433_v31  ;;  %4827 = vmatpush1.bf16.msra.mxu1 %v7436_v20  ;;  %v3631_v32 = vmax.f32 %v6521_v59, 0.0  ;;  %v3630_v16 = vmax.f32 %v6490_v45, 0.0 }
 0x42a   : > { %v3633_v61 = vmax.f32 %v6491_v51, 0.0  ;;  %v6524_v34 = vadd.f32 %v3568_v25, %v8442_v30  ;;  %4602 = vmatprep.subr.bf16.mxu0 %v7441_v57  ;;  %4828 = vmatprep.subr.bf16.mxu1 %v7444_v40  ;;  %v3632_v11 = vmax.f32 %v6522_v47, 0.0  ;;  %v7454_v47 = vld [vmem:[#allocation10 + $0x3a8] ss:$16 sps:$4 sm:$0xff]  }
 0x42b   : > { %v3635_v8 = vmax.f32 %v6523_v52, 0.0  ;;  %v3634_v3 = vmax.f32 %v6492_v53, 0.0  ;;  %v7462_v52 = vld [vmem:[#allocation10 + $0x3cc] ss:$16 sps:$4 sm:$0xff]  }
 0x42c   : > { %v3669_v15 = vpack.c.bf16 %v3633_v61, %v3629_v0  ;;  %v3636_v48 = vmax.f32 %v6524_v34, 0.0 }
 0x42d   : > { %v8524_v41 = vpack.c.bf16 %v3635_v8, %v3631_v32  ;;  %v3670_v33 = vpack.c.bf16 %v3634_v3, %v3630_v16  ;;  %4603 = vmatpush1.bf16.msra.mxu0 %v7439_v14  ;;  %v3346_v17 = vpop.f32.mrb[92].mxu0  ;;  %4829 = vmatpush1.bf16.msra.mxu1 %v7442_v55  ;;  %v7465_v32 = vld [vmem:[#allocation10 + $0x3e4] ss:$16 sps:$4 sm:$0xff]   ;;  %v7468_v16 = vld [vmem:[#allocation10 + $0x3ec] ss:$16 sps:$4 sm:$0xff]  }
 0x42e   : > { %v8526_v21 = vpack.c.bf16 %v3636_v48, %v3632_v11  ;;  %v6493_v10 = vadd.f32 %v3346_v17, %v8433_v9  ;;  %v3572_v22 = vpop.f32.mrb[92].mxu1  ;;  %v3348_v35 = vpop.f32.mrb[93].mxu0  ;;  %4604 = vmatprep.subr.bf16.mxu0 %v7447_v62  ;;  %4830 = vmatprep.subr.bf16.mxu1 %v7450_v2  ;;  %v7457_v62 = vld [vmem:[#allocation10 + $0x3c0] ss:$16 sps:$4 sm:$0xff]   ;;  %v7466_v3 = vld [vmem:[#allocation10 + $0x3e8] ss:$16 sps:$4 sm:$0xff]  }
 0x42f   : > { %v6525_v37 = vadd.f32 %v3572_v22, %v8436_v28  ;;  %v6494_v31 = vadd.f32 %v3348_v35, %v8439_v29  ;;  %v3574_v20 = vpop.f32.mrb[93].mxu1  ;;  %v3350_v44 = vpop.f32.mrb[94].mxu0  ;;  %4559 = vmatprep.mubr.bf16.mxu0 %v3670_v33  ;;  %4785 = vmatprep.mubr.bf16.mxu1 %v3670_v33  ;;  %v7463_v8 = vld [vmem:[#allocation10 + $0x3e0] ss:$16 sps:$4 sm:$0xff]   ;;  %v7473_v17 = vld [vmem:[#allocation11 + $0x48] sm:$0xff]  }
 0x430   : > { %v6526_v38 = vadd.f32 %v3574_v20, %v8442_v30  ;;  %v6495_v49 = vadd.f32 %v3350_v44, %v8433_v9  ;;  %v3576_v57 = vpop.f32.mrb[94].mxu1  ;;  %v3352_v40 = vpop.f32.mrb[95].mxu0  ;;  %4560 = vmatmul.mubr.bf16.gmra.mrb[120].mxu0 %v3669_v15  ;;  %4786 = vmatmul.mubr.bf16.gmra.mrb[120].mxu1 %v3669_v15  ;;  %v3637_v51 = vmax.f32 %v6493_v10, 0.0  ;;  %v7459_v9 = vld [vmem:[#allocation10 + $0x3c4] ss:$16 sps:$4 sm:$0xff]  }
 0x431   : > { %v6527_v59 = vadd.f32 %v3576_v57, %v8436_v28  ;;  %v6496_v45 = vadd.f32 %v3352_v40, %v8439_v29  ;;  %v3578_v46 = vpop.f32.mrb[95].mxu1  ;;  %4605 = vmatpush1.bf16.msra.mxu0 %v7445_v18  ;;  %4831 = vmatpush1.bf16.msra.mxu1 %v7448_v19  ;;  %v3639_v53 = vmax.f32 %v6525_v37, 0.0  ;;  %v3638_v25 = vmax.f32 %v6494_v31, 0.0  ;;  %v7469_v11 = vld [vmem:[#allocation11 + $0x40] sm:$0xff]   ;;  %v7475_v18 = vld [vmem:[#allocation11 + $0xc8] sm:$0xff]   ;;  %v7477_v10 = vld [vmem:[#allocation11 + $0x50] sm:$0xff]  }
 0x432   : > { %v3641_v13 = vmax.f32 %v6495_v49, 0.0  ;;  %v6528_v6 = vadd.f32 %v3578_v46, %v8442_v30  ;;  %4606 = vmatprep.subr.bf16.mxu0 %v7453_v27  ;;  %4832 = vmatprep.subr.bf16.mxu1 %v7456_v58  ;;  %v3640_v28 = vmax.f32 %v6526_v38, 0.0  ;;  %v7460_v30 = vld [vmem:[#allocation10 + $0x3c8] ss:$16 sps:$4 sm:$0xff]   ;;  %v7471_v15 = vld [vmem:[#allocation11 + $0xc0] sm:$0xff]   ;;  %v7479_v22 = vld [vmem:[#allocation11 + $0xd0] sm:$0xff]  }
 0x433   : > { %v3643_v14 = vmax.f32 %v6527_v59, 0.0  ;;  %v3642_v55 = vmax.f32 %v6496_v45, 0.0  ;;  %v7470_v48 = vld [vmem:[#allocation11] sm:$0xff]   ;;  %v7476_v19 = vld [vmem:[#allocation11 + $0x88] sm:$0xff]   ;;  %v7478_v35 = vld [vmem:[#allocation11 + $0x10] sm:$0xff]  }
 0x434   : > { %v3673_v0 = vpack.c.bf16 %v3641_v13, %v3637_v51  ;;  %v3644_v29 = vmax.f32 %v6528_v6, 0.0  ;;  %v7472_v33 = vld [vmem:[#allocation11 + $0x80] sm:$0xff]   ;;  %v7480_v27 = vld [vmem:[#allocation11 + $0x90] sm:$0xff]   ;;  %v7481_v58 = vld [vmem:[#allocation11 + $0x58] sm:$0xff]  }
 0x435   : > { %v8536_v61 = vpack.c.bf16 %v3643_v14, %v3639_v53  ;;  %v3674_v34 = vpack.c.bf16 %v3642_v55, %v3638_v25  ;;  %4607 = vmatpush1.bf16.msra.mxu0 %v7451_v43  ;;  %4833 = vmatpush1.bf16.msra.mxu1 %v7454_v47  ;;  %v7484_v37 = vld [vmem:[#allocation11 + $0x98] sm:$0xff]   ;;  %v7485_v31 = vld [vmem:[#allocation11 + $0x60] sm:$0xff]   ;;  %v7489_v49 = vld [vmem:[#allocation11 + $0x68] sm:$0xff]  }
 0x436   : > { %v8538_v2 = vpack.c.bf16 %v3644_v29, %v3640_v28  ;;  %4608 = vmatprep.subr.bf16.mxu0 %v7459_v9  ;;  %4834 = vmatprep.subr.bf16.mxu1 %v7462_v52  ;;  %v7487_v20 = vld [vmem:[#allocation11 + $0xe0] sm:$0xff]   ;;  %v7492_v57 = vld [vmem:[#allocation11 + $0xa8] sm:$0xff]   ;;  %v7493_v40 = vld [vmem:[#allocation11 + $0x70] sm:$0xff]  }
 0x437   : > { %4569 = vmatprep.mubr.bf16.mxu0 %v3674_v34  ;;  %4795 = vmatprep.mubr.bf16.mxu1 %v3674_v34  ;;  %v7486_v44 = vld [vmem:[#allocation11 + $0x20] sm:$0xff]   ;;  %v7495_v59 = vld [vmem:[#allocation11 + $0xf0] sm:$0xff]  }
 0x438   : > { %4570 = vmatmul.mubr.bf16.gmra.mrb[124].mxu0 %v3673_v0  ;;  %4796 = vmatmul.mubr.bf16.gmra.mrb[124].mxu1 %v3673_v0  ;;  %v7488_v38 = vld [vmem:[#allocation11 + $0xa0] sm:$0xff]   ;;  %v7494_v45 = vld [vmem:[#allocation11 + $0x30] sm:$0xff]  }
 0x439   : > { %4609 = vmatpush1.bf16.msra.mxu0 %v7457_v62  ;;  %4612 = vmatprep.mubr.bf16.mxu0 %v8454_v36  ;;  %v7496_v46 = vld [vmem:[#allocation11 + $0xb0] sm:$0xff]  }
 0x43a   : > { %4835 = vmatpush1.bf16.msra.mxu1 %v7460_v30  ;;  %4838 = vmatprep.mubr.bf16.mxu1 %v8454_v36  ;;  %v7474_v36 = vld [vmem:[#allocation11 + $0x8] sm:$0xff]  }
 0x43b   : > { %4610 = vmatprep.subr.bf16.mxu0 %v7465_v32  ;;  %4836 = vmatprep.subr.bf16.mxu1 %v7468_v16 }
 0x43d   : > { %4611 = vmatpush1.bf16.msra.mxu0 %v7463_v8 }
 0x43e   : > { %4837 = vmatpush1.bf16.msra.mxu1 %v7466_v3  ;;  %6209 = vmatprep.subr.bf16.mxu0 %v7469_v11 }
 0x43f   : > { %6273 = vmatprep.subr.bf16.mxu1 %v7471_v15 }
 0x440   : > { %4613 = vmatmul.mubr.bf16.vlgmr.msra.gmra.mrb[96].mxu0 %v8452_v60 }
 0x441   : > { %4839 = vmatmul.mubr.bf16.vlgmr.msra.gmra.mrb[96].mxu1 %v8452_v60  ;;  %4622 = vmatprep.mubr.bf16.mxu0 %v8466_v42  ;;  %v7483_v60 = vld [vmem:[#allocation11 + $0xd8] sm:$0xff]  }
 0x442   : > { %4848 = vmatprep.mubr.bf16.mxu1 %v8466_v42  ;;  %6210 = vmatpush3.bf16.msra.mxu0 %v7470_v48  ;;  %v7482_v42 = vld [vmem:[#allocation11 + $0x18] sm:$0xff]  }
 0x443   : > { %6274 = vmatpush3.bf16.msra.mxu1 %v7472_v33  ;;  %6211 = vmatprep.subr.bf16.mxu0 %v7473_v17 }
 0x444   : > { %6275 = vmatprep.subr.bf16.mxu1 %v7475_v18 }
 0x446   : > { %6212 = vmatpush3.bf16.msra.mxu0 %v7474_v36 }
 0x447   : > { %6276 = vmatpush3.bf16.msra.mxu1 %v7476_v19  ;;  %6213 = vmatprep.subr.bf16.mxu0 %v7477_v10 }
 0x448   : > { %4623 = vmatmul.mubr.bf16.gmra.mrb[100].mxu0 %v8464_v39  ;;  %6277 = vmatprep.subr.bf16.mxu1 %v7479_v22 }
 0x449   : > { %4849 = vmatmul.mubr.bf16.gmra.mrb[100].mxu1 %v8464_v39  ;;  %4632 = vmatprep.mubr.bf16.mxu0 %v8478_v23  ;;  %v7491_v39 = vld [vmem:[#allocation11 + $0xe8] sm:$0xff]  }
 0x44a   : > { %4858 = vmatprep.mubr.bf16.mxu1 %v8478_v23  ;;  %6214 = vmatpush3.bf16.msra.mxu0 %v7478_v35  ;;  %v7490_v23 = vld [vmem:[#allocation11 + $0x28] sm:$0xff]  }
 0x44b   : > { %6278 = vmatpush3.bf16.msra.mxu1 %v7480_v27  ;;  %6215 = vmatprep.subr.bf16.mxu0 %v7481_v58 }
 0x44c   : > { %6279 = vmatprep.subr.bf16.mxu1 %v7483_v60 }
 0x44e   : > { %6216 = vmatpush3.bf16.msra.mxu0 %v7482_v42 }
 0x44f   : > { %6280 = vmatpush3.bf16.msra.mxu1 %v7484_v37  ;;  %6217 = vmatprep.subr.bf16.mxu0 %v7485_v31 }
 0x450   : > { %4633 = vmatmul.mubr.bf16.gmra.mrb[104].mxu0 %v8476_v24  ;;  %6281 = vmatprep.subr.bf16.mxu1 %v7487_v20 }
 0x451   : > { %4859 = vmatmul.mubr.bf16.gmra.mrb[104].mxu1 %v8476_v24  ;;  %4642 = vmatprep.mubr.bf16.mxu0 %v8490_v63  ;;  %v7497_v24 = vld [vmem:[#allocation11 + $0x78] sm:$0xff]  }
 0x452   : > { %4868 = vmatprep.mubr.bf16.mxu1 %v8490_v63  ;;  %6218 = vmatpush3.bf16.msra.mxu0 %v7486_v44  ;;  %v7498_v63 = vld [vmem:[#allocation11 + $0x38] sm:$0xff]  }
 0x453   : > { %6282 = vmatpush3.bf16.msra.mxu1 %v7488_v38  ;;  %6219 = vmatprep.subr.bf16.mxu0 %v7489_v49 }
 0x454   : > { %6283 = vmatprep.subr.bf16.mxu1 %v7491_v39 }
 0x456   : > { %6220 = vmatpush3.bf16.msra.mxu0 %v7490_v23 }
 0x457   : > { %6284 = vmatpush3.bf16.msra.mxu1 %v7492_v57  ;;  %6221 = vmatprep.subr.bf16.mxu0 %v7493_v40 }
 0x458   : > { %4643 = vmatmul.mubr.bf16.gmra.mrb[108].mxu0 %v8488_v5  ;;  %6285 = vmatprep.subr.bf16.mxu1 %v7495_v59 }
 0x459   : > { %4869 = vmatmul.mubr.bf16.gmra.mrb[108].mxu1 %v8488_v5  ;;  %4652 = vmatprep.mubr.bf16.mxu0 %v8502_v50  ;;  %v7499_v5 = vld [vmem:[#allocation11 + $0xf8] sm:$0xff]  }
 0x45a   : > { %4878 = vmatprep.mubr.bf16.mxu1 %v8502_v50  ;;  %6222 = vmatpush3.bf16.msra.mxu0 %v7494_v45  ;;  %v3805_v50 = vld [vmem:[%s8770_s11] sm:$0xf]  ;;  %s7671_s11 = scalar_lea.vmem %s8689_s10, 1024 }
 0x45b   : > { %6286 = vmatpush3.bf16.msra.mxu1 %v7496_v46  ;;  %6223 = vmatprep.subr.bf16.mxu0 %v7497_v24  ;;  %p7672_p2 = scmp.ne.s32.totalorder %s8689_s10, %s7671_s11  ;;  %p7679_p12 = scmp.lt.s32.totalorder %s7677_s27, %s7671_s11 }
 0x45c   : > { %6287 = vmatprep.subr.bf16.mxu1 %v7499_v5 }
 0x45d   : > { %p7673_p10 = pnand %p7672_p2, %p8773_p7  ;;  %p7680_p13 = por %p7679_p12, %p7678_p11 }
 0x45e   : > { %6224 = vmatpush3.bf16.msra.mxu0 %v7498_v63 }
 0x45f   : > { %p7674_p1 = pneg %p7673_p10 }
 0x460   : > { %4653 = vmatmul.mubr.bf16.gmra.mrb[112].mxu0 %v8500_v26 }
 0x461   : > { %4879 = vmatmul.mubr.bf16.gmra.mrb[112].mxu1 %v8500_v26  ;;  %4662 = vmatprep.mubr.bf16.mxu0 %v8514_v1  ;;  %v7500_v26 = vld [vmem:[#allocation11 + $0xb8] sm:$0xff]   ;;  %p7681_p8 = pnand %p7680_p13, %p7674_p1 }
 0x462   : > { %4888 = vmatprep.mubr.bf16.mxu1 %v8514_v1  ;;  %6288 = vmatpush3.bf16.msra.mxu1 %v7500_v26  ;;  %v8579_v1 = vrot.slane %v3805_v50, %v8152_v4 }
 0x468   : > { %4663 = vmatmul.mubr.bf16.gmra.mrb[116].mxu0 %v8512_v12 }
 0x469   : > { %4889 = vmatmul.mubr.bf16.gmra.mrb[116].mxu1 %v8512_v12  ;;  %4672 = vmatprep.mubr.bf16.mxu0 %v8526_v21  ;;  %v8576_v12 = vrot.slane %v3805_v50, %v8135_v54 }
 0x46a   : > { %4898 = vmatprep.mubr.bf16.mxu1 %v8526_v21  ;;  %v8585_v21 = vrot.slane %v3805_v50, %v8154_v7 }
 0x470   : > { %4673 = vmatmul.mubr.bf16.gmra.mrb[120].mxu0 %v8524_v41 }
 0x471   : > { %4899 = vmatmul.mubr.bf16.gmra.mrb[120].mxu1 %v8524_v41  ;;  %4682 = vmatprep.mubr.bf16.mxu0 %v8538_v2  ;;  %v8582_v41 = vrot.slane %v3805_v50, %v8140_v56 }
 0x472   : > { %4908 = vmatprep.mubr.bf16.mxu1 %v8538_v2 }
 0x478   : > { %4683 = vmatmul.mubr.bf16.gmra.mrb[124].mxu0 %v8536_v61 }
 0x479   : > { %4909 = vmatmul.mubr.bf16.gmra.mrb[124].mxu1 %v8536_v61 }
 0x513   : > { %v4614_v43 = vpop.f32.mrb[96].mxu0 }
 0x514   : > { %v6529_v47 = vadd.f32 %v4614_v43, %v8576_v12  ;;  %v4840_v51 = vpop.f32.mrb[96].mxu1  ;;  %v4616_v13 = vpop.f32.mrb[97].mxu0 }
 0x515   : > { %v6561_v6 = vadd.f32 %v4840_v51, %v8579_v1  ;;  %v6530_v9 = vadd.f32 %v4616_v13, %v8582_v41  ;;  %v4842_v54 = vpop.f32.mrb[97].mxu1  ;;  %v4618_v52 = vpop.f32.mrb[98].mxu0 }
 0x516   : > { %v6562_v4 = vadd.f32 %v4842_v54, %v8585_v21  ;;  %v6531_v53 = vadd.f32 %v4618_v52, %v8576_v12  ;;  %v4844_v56 = vpop.f32.mrb[98].mxu1  ;;  %v4620_v25 = vpop.f32.mrb[99].mxu0  ;;  %v4919_v28 = vmax.f32 %v6529_v47, 0.0 }
 0x517   : > { %v6563_v7 = vadd.f32 %v4844_v56, %v8579_v1  ;;  %v6532_v14 = vadd.f32 %v4620_v25, %v8582_v41  ;;  %v4846_v55 = vpop.f32.mrb[99].mxu1  ;;  %v4921_v61 = vmax.f32 %v6561_v6, 0.0  ;;  %v4920_v34 = vmax.f32 %v6530_v9, 0.0 }
 0x518   : > { %v4923_v0 = vmax.f32 %v6531_v53, 0.0  ;;  %v6564_v29 = vadd.f32 %v4846_v55, %v8585_v21  ;;  %v4922_v30 = vmax.f32 %v6562_v4, 0.0 }
 0x519   : > { %v4925_v62 = vmax.f32 %v6563_v7, 0.0  ;;  %v4924_v2 = vmax.f32 %v6532_v14, 0.0 }
 0x51a   : > { %v4983_v32 = vpack.c.bf16 %v4923_v0, %v4919_v28  ;;  %v4926_v16 = vmax.f32 %v6564_v29, 0.0 }
 0x51b   : > { %v4985_v8 = vpack.c.bf16 %v4925_v62, %v4921_v61  ;;  %v4984_v3 = vpack.c.bf16 %v4924_v2, %v4920_v34  ;;  %v4624_v11 = vpop.f32.mrb[100].mxu0 }
 0x51c   : > { %v4986_v15 = vpack.c.bf16 %v4926_v16, %v4922_v30  ;;  %v6533_v48 = vadd.f32 %v4624_v11, %v8576_v12  ;;  %v4850_v33 = vpop.f32.mrb[100].mxu1  ;;  %v4626_v17 = vpop.f32.mrb[101].mxu0 }
 0x51d   : > { %v6565_v18 = vadd.f32 %v4850_v33, %v8579_v1  ;;  %v6534_v36 = vadd.f32 %v4626_v17, %v8582_v41  ;;  %v4852_v19 = vpop.f32.mrb[101].mxu1  ;;  %v4628_v10 = vpop.f32.mrb[102].mxu0  ;;  %5310 = vmatprep.mubr.bf16.mxu0 %v4984_v3 }
 0x51e   : > { %v6566_v22 = vadd.f32 %v4852_v19, %v8585_v21  ;;  %v6535_v35 = vadd.f32 %v4628_v10, %v8576_v12  ;;  %v4854_v27 = vpop.f32.mrb[102].mxu1  ;;  %5407 = vmatprep.mubr.bf16.mxu1 %v4986_v15  ;;  %v4630_v58 = vpop.f32.mrb[103].mxu0  ;;  %5311 = vmatmul.mubr.bf16.vlgmr.msra.gmra.mrb[128].mxu0 %v4983_v32  ;;  %v4927_v31 = vmax.f32 %v6533_v48, 0.0 }
 0x51f   : > { %v6567_v60 = vadd.f32 %v4854_v27, %v8579_v1  ;;  %v6536_v42 = vadd.f32 %v4630_v58, %v8582_v41  ;;  %v4856_v37 = vpop.f32.mrb[103].mxu1  ;;  %5408 = vmatmul.mubr.bf16.vlgmr.msra.gmra.mrb[128].mxu1 %v4985_v8  ;;  %v4929_v38 = vmax.f32 %v6565_v18, 0.0  ;;  %v4928_v49 = vmax.f32 %v6534_v36, 0.0 }
 0x520   : > { %v4931_v20 = vmax.f32 %v6535_v35, 0.0  ;;  %v6568_v44 = vadd.f32 %v4856_v37, %v8585_v21  ;;  %v4930_v57 = vmax.f32 %v6566_v22, 0.0 }
 0x521   : > { %v4933_v39 = vmax.f32 %v6567_v60, 0.0  ;;  %v4932_v23 = vmax.f32 %v6536_v42, 0.0 }
 0x522   : > { %v4987_v40 = vpack.c.bf16 %v4931_v20, %v4927_v31  ;;  %v4934_v59 = vmax.f32 %v6568_v44, 0.0 }
 0x523   : > { %v4989_v45 = vpack.c.bf16 %v4933_v39, %v4929_v38  ;;  %v4988_v46 = vpack.c.bf16 %v4932_v23, %v4928_v49  ;;  %v4634_v24 = vpop.f32.mrb[104].mxu0 }
 0x524   : > { %v4990_v5 = vpack.c.bf16 %v4934_v59, %v4930_v57  ;;  %v6537_v63 = vadd.f32 %v4634_v24, %v8576_v12  ;;  %v4860_v26 = vpop.f32.mrb[104].mxu1  ;;  %v4636_v50 = vpop.f32.mrb[105].mxu0 }
 0x525   : > { %v6569_v43 = vadd.f32 %v4860_v26, %v8579_v1  ;;  %v6538_v47 = vadd.f32 %v4636_v50, %v8582_v41  ;;  %v4862_v51 = vpop.f32.mrb[105].mxu1  ;;  %v4638_v13 = vpop.f32.mrb[106].mxu0  ;;  %5318 = vmatprep.mubr.bf16.mxu0 %v4988_v46 }
 0x526   : > { %v6570_v6 = vadd.f32 %v4862_v51, %v8585_v21  ;;  %v6539_v9 = vadd.f32 %v4638_v13, %v8576_v12  ;;  %v4864_v54 = vpop.f32.mrb[106].mxu1  ;;  %5415 = vmatprep.mubr.bf16.mxu1 %v4990_v5  ;;  %v4640_v52 = vpop.f32.mrb[107].mxu0  ;;  %5319 = vmatmul.mubr.bf16.gmra.mrb[132].mxu0 %v4987_v40  ;;  %v4935_v25 = vmax.f32 %v6537_v63, 0.0 }
 0x527   : > { %v6571_v4 = vadd.f32 %v4864_v54, %v8579_v1  ;;  %v6540_v53 = vadd.f32 %v4640_v52, %v8582_v41  ;;  %v4866_v56 = vpop.f32.mrb[107].mxu1  ;;  %5416 = vmatmul.mubr.bf16.gmra.mrb[132].mxu1 %v4989_v45  ;;  %v4937_v55 = vmax.f32 %v6569_v43, 0.0  ;;  %v4936_v28 = vmax.f32 %v6538_v47, 0.0 }
 0x528   : > { %v4939_v7 = vmax.f32 %v6539_v9, 0.0  ;;  %v6572_v14 = vadd.f32 %v4866_v56, %v8585_v21  ;;  %v4938_v61 = vmax.f32 %v6570_v6, 0.0 }
 0x529   : > { %v4941_v0 = vmax.f32 %v6571_v4, 0.0  ;;  %v4940_v29 = vmax.f32 %v6540_v53, 0.0 }
 0x52a   : > { %v4991_v34 = vpack.c.bf16 %v4939_v7, %v4935_v25  ;;  %v4942_v62 = vmax.f32 %v6572_v14, 0.0 }
 0x52b   : > { %v4993_v2 = vpack.c.bf16 %v4941_v0, %v4937_v55  ;;  %v4992_v30 = vpack.c.bf16 %v4940_v29, %v4936_v28  ;;  %v4644_v32 = vpop.f32.mrb[108].mxu0 }
 0x52c   : > { %v4994_v16 = vpack.c.bf16 %v4942_v62, %v4938_v61  ;;  %v6541_v8 = vadd.f32 %v4644_v32, %v8576_v12  ;;  %v4870_v3 = vpop.f32.mrb[108].mxu1  ;;  %v4646_v11 = vpop.f32.mrb[109].mxu0 }
 0x52d   : > { %v6573_v15 = vadd.f32 %v4870_v3, %v8579_v1  ;;  %v6542_v48 = vadd.f32 %v4646_v11, %v8582_v41  ;;  %v4872_v33 = vpop.f32.mrb[109].mxu1  ;;  %v4648_v17 = vpop.f32.mrb[110].mxu0  ;;  %5326 = vmatprep.mubr.bf16.mxu0 %v4992_v30 }
 0x52e   : > { %v6574_v18 = vadd.f32 %v4872_v33, %v8585_v21  ;;  %v6543_v36 = vadd.f32 %v4648_v17, %v8576_v12  ;;  %v4874_v19 = vpop.f32.mrb[110].mxu1  ;;  %5423 = vmatprep.mubr.bf16.mxu1 %v4994_v16  ;;  %v4650_v10 = vpop.f32.mrb[111].mxu0  ;;  %5327 = vmatmul.mubr.bf16.gmra.mrb[136].mxu0 %v4991_v34  ;;  %v4943_v58 = vmax.f32 %v6541_v8, 0.0 }
 0x52f   : > { %v6575_v22 = vadd.f32 %v4874_v19, %v8579_v1  ;;  %v6544_v35 = vadd.f32 %v4650_v10, %v8582_v41  ;;  %v4876_v27 = vpop.f32.mrb[111].mxu1  ;;  %5424 = vmatmul.mubr.bf16.gmra.mrb[136].mxu1 %v4993_v2  ;;  %v4945_v37 = vmax.f32 %v6573_v15, 0.0  ;;  %v4944_v31 = vmax.f32 %v6542_v48, 0.0 }
 0x530   : > { %v4947_v60 = vmax.f32 %v6543_v36, 0.0  ;;  %v6576_v42 = vadd.f32 %v4876_v27, %v8585_v21  ;;  %v4946_v38 = vmax.f32 %v6574_v18, 0.0 }
 0x531   : > { %v4949_v20 = vmax.f32 %v6575_v22, 0.0  ;;  %v4948_v44 = vmax.f32 %v6544_v35, 0.0 }
 0x532   : > { %v4995_v49 = vpack.c.bf16 %v4947_v60, %v4943_v58  ;;  %v4950_v39 = vmax.f32 %v6576_v42, 0.0 }
 0x533   : > { %v4997_v23 = vpack.c.bf16 %v4949_v20, %v4945_v37  ;;  %v4996_v57 = vpack.c.bf16 %v4948_v44, %v4944_v31  ;;  %v4654_v40 = vpop.f32.mrb[112].mxu0 }
 0x534   : > { %v4998_v59 = vpack.c.bf16 %v4950_v39, %v4946_v38  ;;  %v6545_v45 = vadd.f32 %v4654_v40, %v8576_v12  ;;  %v4880_v46 = vpop.f32.mrb[112].mxu1  ;;  %v4656_v24 = vpop.f32.mrb[113].mxu0 }
 0x535   : > { %v6577_v5 = vadd.f32 %v4880_v46, %v8579_v1  ;;  %v6546_v63 = vadd.f32 %v4656_v24, %v8582_v41  ;;  %v4882_v26 = vpop.f32.mrb[113].mxu1  ;;  %v4658_v50 = vpop.f32.mrb[114].mxu0  ;;  %5334 = vmatprep.mubr.bf16.mxu0 %v4996_v57 }
 0x536   : > { %v6578_v43 = vadd.f32 %v4882_v26, %v8585_v21  ;;  %v6547_v47 = vadd.f32 %v4658_v50, %v8576_v12  ;;  %v4884_v51 = vpop.f32.mrb[114].mxu1  ;;  %5431 = vmatprep.mubr.bf16.mxu1 %v4998_v59  ;;  %v4660_v13 = vpop.f32.mrb[115].mxu0  ;;  %5335 = vmatmul.mubr.bf16.gmra.mrb[140].mxu0 %v4995_v49  ;;  %v4951_v52 = vmax.f32 %v6545_v45, 0.0 }
 0x537   : > { %v6579_v6 = vadd.f32 %v4884_v51, %v8579_v1  ;;  %v6548_v9 = vadd.f32 %v4660_v13, %v8582_v41  ;;  %v4886_v54 = vpop.f32.mrb[115].mxu1  ;;  %5432 = vmatmul.mubr.bf16.gmra.mrb[140].mxu1 %v4997_v23  ;;  %v4953_v56 = vmax.f32 %v6577_v5, 0.0  ;;  %v4952_v25 = vmax.f32 %v6546_v63, 0.0 }
 0x538   : > { %v4955_v4 = vmax.f32 %v6547_v47, 0.0  ;;  %v6580_v53 = vadd.f32 %v4886_v54, %v8585_v21  ;;  %v4954_v55 = vmax.f32 %v6578_v43, 0.0 }
 0x539   : > { %v4957_v7 = vmax.f32 %v6579_v6, 0.0  ;;  %v4956_v14 = vmax.f32 %v6548_v9, 0.0 }
 0x53a   : > { %v4999_v28 = vpack.c.bf16 %v4955_v4, %v4951_v52  ;;  %v4958_v0 = vmax.f32 %v6580_v53, 0.0 }
 0x53b   : > { %v5001_v29 = vpack.c.bf16 %v4957_v7, %v4953_v56  ;;  %v5000_v61 = vpack.c.bf16 %v4956_v14, %v4952_v25  ;;  %v4664_v34 = vpop.f32.mrb[116].mxu0 }
 0x53c   : > { %v5002_v62 = vpack.c.bf16 %v4958_v0, %v4954_v55  ;;  %v6549_v2 = vadd.f32 %v4664_v34, %v8576_v12  ;;  %v4890_v30 = vpop.f32.mrb[116].mxu1  ;;  %v4666_v32 = vpop.f32.mrb[117].mxu0 }
 0x53d   : > { %v6581_v16 = vadd.f32 %v4890_v30, %v8579_v1  ;;  %v6550_v8 = vadd.f32 %v4666_v32, %v8582_v41  ;;  %v4892_v3 = vpop.f32.mrb[117].mxu1  ;;  %v4668_v11 = vpop.f32.mrb[118].mxu0  ;;  %5342 = vmatprep.mubr.bf16.mxu0 %v5000_v61 }
 0x53e   : > { %v6582_v15 = vadd.f32 %v4892_v3, %v8585_v21  ;;  %v6551_v48 = vadd.f32 %v4668_v11, %v8576_v12  ;;  %v4894_v33 = vpop.f32.mrb[118].mxu1  ;;  %5439 = vmatprep.mubr.bf16.mxu1 %v5002_v62  ;;  %v4670_v17 = vpop.f32.mrb[119].mxu0  ;;  %5343 = vmatmul.mubr.bf16.gmra.mrb[144].mxu0 %v4999_v28  ;;  %v4959_v10 = vmax.f32 %v6549_v2, 0.0 }
 0x53f   : > { %v6583_v18 = vadd.f32 %v4894_v33, %v8579_v1  ;;  %v6552_v36 = vadd.f32 %v4670_v17, %v8582_v41  ;;  %v4896_v19 = vpop.f32.mrb[119].mxu1  ;;  %5440 = vmatmul.mubr.bf16.gmra.mrb[144].mxu1 %v5001_v29  ;;  %v4961_v27 = vmax.f32 %v6581_v16, 0.0  ;;  %v4960_v58 = vmax.f32 %v6550_v8, 0.0 }
 0x540   : > { %v4963_v22 = vmax.f32 %v6551_v48, 0.0  ;;  %v6584_v35 = vadd.f32 %v4896_v19, %v8585_v21  ;;  %v4962_v37 = vmax.f32 %v6582_v15, 0.0 }
 0x541   : > { %v4965_v60 = vmax.f32 %v6583_v18, 0.0  ;;  %v4964_v42 = vmax.f32 %v6552_v36, 0.0 }
 0x542   : > { %v5003_v31 = vpack.c.bf16 %v4963_v22, %v4959_v10  ;;  %v4966_v20 = vmax.f32 %v6584_v35, 0.0 }
 0x543   : > { %v5005_v44 = vpack.c.bf16 %v4965_v60, %v4961_v27  ;;  %v5004_v38 = vpack.c.bf16 %v4964_v42, %v4960_v58  ;;  %v4674_v49 = vpop.f32.mrb[120].mxu0 }
 0x544   : > { %v5006_v39 = vpack.c.bf16 %v4966_v20, %v4962_v37  ;;  %v6553_v23 = vadd.f32 %v4674_v49, %v8576_v12  ;;  %v4900_v57 = vpop.f32.mrb[120].mxu1  ;;  %v4676_v40 = vpop.f32.mrb[121].mxu0 }
 0x545   : > { %v6585_v59 = vadd.f32 %v4900_v57, %v8579_v1  ;;  %v6554_v45 = vadd.f32 %v4676_v40, %v8582_v41  ;;  %v4902_v46 = vpop.f32.mrb[121].mxu1  ;;  %v4678_v24 = vpop.f32.mrb[122].mxu0  ;;  %5350 = vmatprep.mubr.bf16.mxu0 %v5004_v38 }
 0x546   : > { %v6586_v5 = vadd.f32 %v4902_v46, %v8585_v21  ;;  %v6555_v63 = vadd.f32 %v4678_v24, %v8576_v12  ;;  %v4904_v26 = vpop.f32.mrb[122].mxu1  ;;  %5447 = vmatprep.mubr.bf16.mxu1 %v5006_v39  ;;  %v4680_v50 = vpop.f32.mrb[123].mxu0  ;;  %5351 = vmatmul.mubr.bf16.gmra.mrb[148].mxu0 %v5003_v31  ;;  %v4967_v13 = vmax.f32 %v6553_v23, 0.0 }
 0x547   : > { %v6587_v43 = vadd.f32 %v4904_v26, %v8579_v1  ;;  %v6556_v47 = vadd.f32 %v4680_v50, %v8582_v41  ;;  %v4906_v51 = vpop.f32.mrb[123].mxu1  ;;  %5448 = vmatmul.mubr.bf16.gmra.mrb[148].mxu1 %v5005_v44  ;;  %v4969_v54 = vmax.f32 %v6585_v59, 0.0  ;;  %v4968_v52 = vmax.f32 %v6554_v45, 0.0 }
 0x548   : > { %v4971_v6 = vmax.f32 %v6555_v63, 0.0  ;;  %v6588_v9 = vadd.f32 %v4906_v51, %v8585_v21  ;;  %v4970_v56 = vmax.f32 %v6586_v5, 0.0 }
 0x549   : > { %v4973_v4 = vmax.f32 %v6587_v43, 0.0  ;;  %v4972_v53 = vmax.f32 %v6556_v47, 0.0 }
 0x54a   : > { %v5007_v25 = vpack.c.bf16 %v4971_v6, %v4967_v13  ;;  %v4974_v7 = vmax.f32 %v6588_v9, 0.0 }
 0x54b   : > { %v5009_v14 = vpack.c.bf16 %v4973_v4, %v4969_v54  ;;  %v5008_v55 = vpack.c.bf16 %v4972_v53, %v4968_v52  ;;  %v4684_v28 = vpop.f32.mrb[124].mxu0 }
 0x54c   : > { %v5010_v0 = vpack.c.bf16 %v4974_v7, %v4970_v56  ;;  %v6557_v29 = vadd.f32 %v4684_v28, %v8576_v12  ;;  %v4910_v61 = vpop.f32.mrb[124].mxu1  ;;  %v4686_v34 = vpop.f32.mrb[125].mxu0 }
 0x54d   : > { %v6589_v62 = vadd.f32 %v4910_v61, %v8579_v1  ;;  %v6558_v2 = vadd.f32 %v4686_v34, %v8582_v41  ;;  %v4912_v30 = vpop.f32.mrb[125].mxu1  ;;  %v4688_v32 = vpop.f32.mrb[126].mxu0  ;;  %5358 = vmatprep.mubr.bf16.mxu0 %v5008_v55 }
 0x54e   : > { %v6590_v16 = vadd.f32 %v4912_v30, %v8585_v21  ;;  %v6559_v8 = vadd.f32 %v4688_v32, %v8576_v12  ;;  %v4914_v3 = vpop.f32.mrb[126].mxu1  ;;  %5455 = vmatprep.mubr.bf16.mxu1 %v5010_v0  ;;  %v4690_v11 = vpop.f32.mrb[127].mxu0  ;;  %5359 = vmatmul.mubr.bf16.gmra.mrb[152].mxu0 %v5007_v25  ;;  %v4975_v17 = vmax.f32 %v6557_v29, 0.0 }
 0x54f   : > { %v6591_v15 = vadd.f32 %v4914_v3, %v8579_v1  ;;  %v6560_v48 = vadd.f32 %v4690_v11, %v8582_v41  ;;  %v4916_v33 = vpop.f32.mrb[127].mxu1  ;;  %5456 = vmatmul.mubr.bf16.gmra.mrb[152].mxu1 %v5009_v14  ;;  %v4977_v19 = vmax.f32 %v6589_v62, 0.0  ;;  %v4976_v10 = vmax.f32 %v6558_v2, 0.0 }
 0x550   : > { %v4979_v18 = vmax.f32 %v6559_v8, 0.0  ;;  %v6592_v36 = vadd.f32 %v4916_v33, %v8585_v21  ;;  %v4978_v27 = vmax.f32 %v6590_v16, 0.0  ;;  %v8654_v21 = vld [vmem:[%s8771_s15] ss:$0 sm:$0xff] }
 0x551   : > { %v4981_v22 = vmax.f32 %v6591_v15, 0.0  ;;  %v4980_v35 = vmax.f32 %v6560_v48, 0.0 }
 0x552   : > { %v5011_v12 = vpack.c.bf16 %v4979_v18, %v4975_v17  ;;  %v4982_v58 = vmax.f32 %v6592_v36, 0.0 }
 0x553   : > { %v5013_v60 = vpack.c.bf16 %v4981_v22, %v4977_v19  ;;  %v5012_v42 = vpack.c.bf16 %v4980_v35, %v4976_v10 }
 0x554   : > { %v5014_v37 = vpack.c.bf16 %v4982_v58, %v4978_v27 }
 0x555   : > { %5366 = vmatprep.mubr.bf16.mxu0 %v5012_v42 }
 0x556   : > { %5463 = vmatprep.mubr.bf16.mxu1 %v5014_v37  ;;  %5367 = vmatmul.mubr.bf16.gmra.mrb[156].mxu0 %v5011_v12 }
 0x557   : > { %5464 = vmatmul.mubr.bf16.gmra.mrb[156].mxu1 %v5013_v60 }
 0x5f1   : > { %v6225_v1 = vpop.f32.mrb[128].mxu0 }
 0x5f2   : > { %v6289_v41 = vpop.f32.mrb[128].mxu1  ;;  %v6226_v31 = vpop.f32.mrb[129].mxu0 }
 0x5f3   : > { %v6227_v20 = vadd.f32 %v6226_v31, %v6225_v1  ;;  %v6290_v44 = vpop.f32.mrb[129].mxu1  ;;  %v6228_v38 = vpop.f32.mrb[130].mxu0 }
 0x5f4   : > { %v6291_v49 = vadd.f32 %v6290_v44, %v6289_v41  ;;  %v6292_v39 = vpop.f32.mrb[130].mxu1  ;;  %v6229_v23 = vpop.f32.mrb[131].mxu0 }
 0x5f5   : > { %v5313_v57 = vadd.f32 %v6227_v20, %v8654_v21  ;;  %v6230_v40 = vadd.f32 %v6229_v23, %v6228_v38  ;;  %v6293_v59 = vpop.f32.mrb[131].mxu1 }
 0x5f6   : > { %v6294_v45 = vadd.f32 %v6293_v59, %v6292_v39 }
 0x5f7   : > { %v5410_v46 = vadd.f32 %v6291_v49, %v5313_v57  ;;  %v5316_v24 = vadd.f32 %v6230_v40, %v8654_v21 }
 0x5f9   : > { %v5413_v5 = vadd.f32 %v6294_v45, %v5316_v24  ;;  %v6231_v63 = vpop.f32.mrb[132].mxu0 }
 0x5fa   : > { %v6295_v26 = vpop.f32.mrb[132].mxu1  ;;  %v6232_v50 = vpop.f32.mrb[133].mxu0 }
 0x5fb   : > { %v6165_v43 = vpack.c.bf16 %v5413_v5, %v5410_v46  ;;  %v6233_v47 = vadd.f32 %v6232_v50, %v6231_v63  ;;  %v6296_v51 = vpop.f32.mrb[133].mxu1  ;;  %v6234_v13 = vpop.f32.mrb[134].mxu0 }
 0x5fc   : > { %v6297_v6 = vadd.f32 %v6296_v51, %v6295_v26  ;;  %v6298_v9 = vpop.f32.mrb[134].mxu1  ;;  %v6235_v54 = vpop.f32.mrb[135].mxu0 }
 0x5fd   : > { %6166 = vst [vmem:[%s8659_s24] sm:$0xff] %v6165_v43   ;;  %v5321_v52 = vadd.f32 %v6233_v47, %v8654_v21  ;;  %v6236_v4 = vadd.f32 %v6235_v54, %v6234_v13  ;;  %v6299_v53 = vpop.f32.mrb[135].mxu1 }
 0x5fe   : > { %v6300_v56 = vadd.f32 %v6299_v53, %v6298_v9 }
 0x5ff   : > { %v5418_v25 = vadd.f32 %v6297_v6, %v5321_v52  ;;  %v5324_v7 = vadd.f32 %v6236_v4, %v8654_v21 }
 0x601   : > { %v5421_v14 = vadd.f32 %v6300_v56, %v5324_v7  ;;  %v6237_v55 = vpop.f32.mrb[136].mxu0 }
 0x602   : > { %v6301_v28 = vpop.f32.mrb[136].mxu1  ;;  %v6238_v0 = vpop.f32.mrb[137].mxu0 }
 0x603   : > { %v6170_v29 = vpack.c.bf16 %v5421_v14, %v5418_v25  ;;  %v6239_v61 = vadd.f32 %v6238_v0, %v6237_v55  ;;  %v6302_v34 = vpop.f32.mrb[137].mxu1  ;;  %v6240_v62 = vpop.f32.mrb[138].mxu0 }
 0x604   : > { %v6303_v2 = vadd.f32 %v6302_v34, %v6301_v28  ;;  %v6304_v30 = vpop.f32.mrb[138].mxu1  ;;  %v6241_v32 = vpop.f32.mrb[139].mxu0 }
 0x605   : > { %6202 = vst [vmem:[%s8659_s24 + $0x8] sm:$0xff] %v6170_v29   ;;  %v5329_v16 = vadd.f32 %v6239_v61, %v8654_v21  ;;  %v6242_v8 = vadd.f32 %v6241_v32, %v6240_v62  ;;  %v6305_v3 = vpop.f32.mrb[139].mxu1 }
 0x606   : > { %v6306_v11 = vadd.f32 %v6305_v3, %v6304_v30 }
 0x607   : > { %v5426_v15 = vadd.f32 %v6303_v2, %v5329_v16  ;;  %v5332_v48 = vadd.f32 %v6242_v8, %v8654_v21 }
 0x609   : > { %v5429_v33 = vadd.f32 %v6306_v11, %v5332_v48  ;;  %v6243_v17 = vpop.f32.mrb[140].mxu0 }
 0x60a   : > { %v6307_v18 = vpop.f32.mrb[140].mxu1  ;;  %v6244_v36 = vpop.f32.mrb[141].mxu0 }
 0x60b   : > { %v6175_v19 = vpack.c.bf16 %v5429_v33, %v5426_v15  ;;  %v6245_v10 = vadd.f32 %v6244_v36, %v6243_v17  ;;  %v6308_v22 = vpop.f32.mrb[141].mxu1  ;;  %v6246_v35 = vpop.f32.mrb[142].mxu0 }
 0x60c   : > { %v6309_v27 = vadd.f32 %v6308_v22, %v6307_v18  ;;  %v6310_v12 = vpop.f32.mrb[142].mxu1  ;;  %v6247_v58 = vpop.f32.mrb[143].mxu0 }
 0x60d   : > { %6203 = vst [vmem:[%s8659_s24 + $0x10] sm:$0xff] %v6175_v19   ;;  %v5337_v60 = vadd.f32 %v6245_v10, %v8654_v21  ;;  %v6248_v42 = vadd.f32 %v6247_v58, %v6246_v35  ;;  %v6311_v37 = vpop.f32.mrb[143].mxu1 }
 0x60e   : > { %v6312_v1 = vadd.f32 %v6311_v37, %v6310_v12 }
 0x60f   : > { %v5434_v41 = vadd.f32 %v6309_v27, %v5337_v60  ;;  %v5340_v31 = vadd.f32 %v6248_v42, %v8654_v21 }
 0x611   : > { %v5437_v20 = vadd.f32 %v6312_v1, %v5340_v31  ;;  %v6249_v44 = vpop.f32.mrb[144].mxu0 }
 0x612   : > { %v6313_v38 = vpop.f32.mrb[144].mxu1  ;;  %v6250_v49 = vpop.f32.mrb[145].mxu0 }
 0x613   : > { %v6180_v39 = vpack.c.bf16 %v5437_v20, %v5434_v41  ;;  %v6251_v23 = vadd.f32 %v6250_v49, %v6249_v44  ;;  %v6314_v57 = vpop.f32.mrb[145].mxu1  ;;  %v6252_v40 = vpop.f32.mrb[146].mxu0 }
 0x614   : > { %v6315_v59 = vadd.f32 %v6314_v57, %v6313_v38  ;;  %v6316_v45 = vpop.f32.mrb[146].mxu1  ;;  %v6253_v46 = vpop.f32.mrb[147].mxu0 }
 0x615   : > { %6204 = vst [vmem:[%s8659_s24 + $0x18] sm:$0xff] %v6180_v39   ;;  %v5345_v24 = vadd.f32 %v6251_v23, %v8654_v21  ;;  %v6254_v5 = vadd.f32 %v6253_v46, %v6252_v40  ;;  %v6317_v63 = vpop.f32.mrb[147].mxu1 }
 0x616   : > { %v6318_v26 = vadd.f32 %v6317_v63, %v6316_v45 }
 0x617   : > { %v5442_v50 = vadd.f32 %v6315_v59, %v5345_v24  ;;  %v5348_v43 = vadd.f32 %v6254_v5, %v8654_v21 }
 0x619   : > { %v5445_v47 = vadd.f32 %v6318_v26, %v5348_v43  ;;  %v6255_v51 = vpop.f32.mrb[148].mxu0 }
 0x61a   : > { %v6319_v13 = vpop.f32.mrb[148].mxu1  ;;  %v6256_v6 = vpop.f32.mrb[149].mxu0 }
 0x61b   : > { %v6185_v9 = vpack.c.bf16 %v5445_v47, %v5442_v50  ;;  %v6257_v54 = vadd.f32 %v6256_v6, %v6255_v51  ;;  %v6320_v52 = vpop.f32.mrb[149].mxu1  ;;  %v6258_v4 = vpop.f32.mrb[150].mxu0 }
 0x61c   : > { %v6321_v53 = vadd.f32 %v6320_v52, %v6319_v13  ;;  %v6322_v56 = vpop.f32.mrb[150].mxu1  ;;  %v6259_v25 = vpop.f32.mrb[151].mxu0 }
 0x61d   : > { %6205 = vst [vmem:[%s8659_s24 + $0x20] sm:$0xff] %v6185_v9   ;;  %v5353_v7 = vadd.f32 %v6257_v54, %v8654_v21  ;;  %v6260_v14 = vadd.f32 %v6259_v25, %v6258_v4  ;;  %v6323_v55 = vpop.f32.mrb[151].mxu1 }
 0x61e   : > { %v6324_v28 = vadd.f32 %v6323_v55, %v6322_v56 }
 0x61f   : > { %v5450_v0 = vadd.f32 %v6321_v53, %v5353_v7  ;;  %v5356_v29 = vadd.f32 %v6260_v14, %v8654_v21 }
 0x621   : > { %v5453_v61 = vadd.f32 %v6324_v28, %v5356_v29  ;;  %v6261_v34 = vpop.f32.mrb[152].mxu0 }
 0x622   : > { %v6325_v62 = vpop.f32.mrb[152].mxu1  ;;  %v6262_v2 = vpop.f32.mrb[153].mxu0 }
 0x623   : > { %v6190_v30 = vpack.c.bf16 %v5453_v61, %v5450_v0  ;;  %v6263_v32 = vadd.f32 %v6262_v2, %v6261_v34  ;;  %v6326_v16 = vpop.f32.mrb[153].mxu1  ;;  %v6264_v8 = vpop.f32.mrb[154].mxu0 }
 0x624   : > { %v6327_v3 = vadd.f32 %v6326_v16, %v6325_v62  ;;  %v6328_v11 = vpop.f32.mrb[154].mxu1  ;;  %v6265_v15 = vpop.f32.mrb[155].mxu0 }
 0x625   : > { %6206 = vst [vmem:[%s8659_s24 + $0x28] sm:$0xff] %v6190_v30   ;;  %v5361_v48 = vadd.f32 %v6263_v32, %v8654_v21  ;;  %v6266_v33 = vadd.f32 %v6265_v15, %v6264_v8  ;;  %v6329_v17 = vpop.f32.mrb[155].mxu1 }
 0x626   : > { %v6330_v18 = vadd.f32 %v6329_v17, %v6328_v11 }
 0x627   : > { %v5458_v36 = vadd.f32 %v6327_v3, %v5361_v48  ;;  %v5364_v19 = vadd.f32 %v6266_v33, %v8654_v21 }
 0x629   : > { %v5461_v10 = vadd.f32 %v6330_v18, %v5364_v19  ;;  %v6267_v22 = vpop.f32.mrb[156].mxu0 }
 0x62a   : > { %v6331_v35 = vpop.f32.mrb[156].mxu1  ;;  %v6268_v27 = vpop.f32.mrb[157].mxu0 }
 0x62b   : > { %v6195_v12 = vpack.c.bf16 %v5461_v10, %v5458_v36  ;;  %v6269_v58 = vadd.f32 %v6268_v27, %v6267_v22  ;;  %v6332_v60 = vpop.f32.mrb[157].mxu1  ;;  %v6270_v42 = vpop.f32.mrb[158].mxu0 }
 0x62c   : > { %v6333_v37 = vadd.f32 %v6332_v60, %v6331_v35  ;;  %v6334_v1 = vpop.f32.mrb[158].mxu1  ;;  %v6271_v41 = vpop.f32.mrb[159].mxu0 }
 0x62d   : > { %6207 = vst [vmem:[%s8659_s24 + $0x30] sm:$0xff] %v6195_v12   ;;  %v5369_v31 = vadd.f32 %v6269_v58, %v8654_v21  ;;  %v6272_v20 = vadd.f32 %v6271_v41, %v6270_v42  ;;  %v6335_v44 = vpop.f32.mrb[159].mxu1 }
 0x62e   : > { %v6336_v38 = vadd.f32 %v6335_v44, %v6334_v1 }
 0x62f   : > { %v5466_v49 = vadd.f32 %v6333_v37, %v5369_v31  ;;  %v5372_v39 = vadd.f32 %v6272_v20, %v8654_v21 }
 0x631   : > { %v5469_v23 = vadd.f32 %v6336_v38, %v5372_v39 }
 0x633   : > { %v6200_v57 = vpack.c.bf16 %v5469_v23, %v5466_v49 }
 0x635   : > { %6208 = vst [vmem:[%s8659_s24 + $0x38] sm:$0xff] %v6200_v57  }
 0x636   : > { %7684 = shalt.err (!%p7681_p8)
}
 0x637   : > { %s7685_s15 = scalar_lea.hbm %s8687_s30, 1024  ;;  %s7689_s25 = scalar_lea.hbm %s8772_s29, 2048 }
 0x638   : > { %p7686_p6 = scmp.ne.s32.totalorder %s8687_s30, %s7685_s15  ;;  %p7690_p3 = scmp.lt.u32.totalorder %s8687_s30, %s8772_s29 }
 0x639   : > { %p7691_p0 = scmp.lt.u32.totalorder %s7689_s25, %s7685_s15  ;;  %p7693_p2 = scmp.lt.u32.totalorder %s7685_s15, %s8687_s30 }
 0x63a   : > { %p7687_p9 = pnand %p7686_p6, %p8773_p7 }
 0x63b   : > { %p7692_p5 = por %p7691_p0, %p7690_p3 }
 0x63c   : > { %p7688_p4 = pneg %p7687_p9 }
 0x63d   : > { %p7694_p10 = por %p7693_p2, %p7692_p5 }
 0x63f   : > { %p7695_p1 = pnand %p7694_p10, %p7688_p4 }
 0x641   : > { %7698 = shalt.err (!%p7695_p1)
}
 0x642   : > { %s7767_s11 = smov 64   ;;  %s7768_s23 = smov 4  }
 0x643   : > { %6807 = dma.vmem_to_hbm [thread:$0]  (%p8773_p7), %s8689_s10, 1024, %s8687_s30, %s5553_s26, %s7767_s11, %s7767_s11, %s7768_s23  }
 0x644 PF: > { %s5581_s28 = sand.u32 1, %s7737_s17   ;;  %p8774_p11 = scmp.ne.s32.totalorder %s8761_s21, 0 }
 0x645   : > { %p8775_p12 = scmp.ge.s32.totalorder %s7749_s20, 2  ;;  %s5582_s27 = scalar_lea.sflag [#allocation4], %s5581_s28 }
 0x647   : > { %p6830_p13 = pnand %p8775_p12, %p8774_p11 }
 0x649   : > { %7732 = dma.done.wait (!%p6830_p13), %s5582_s27, 1024  }
 0x64a   : > { %7734 = vsyncadd (!%p6830_p13), %s5582_s27, 4294966272  ;;  %p27_p8 = scmp.ge.s32.totalorder %s7992_s1, 4   ;;  %s8776_s17 = smov %s7741_s18 }
 0x64b   : > { %s8777_s18 = smov %s7745_s19  ;;  %s8778_s19 = smov %s8004_s13 }
 0x64c   : > { %s8779_s20 = smov %s7992_s1  ;;  %29 = sbr.rel (!%p27_p8) target bundleno = 13 (0xd), region = 129 }
 0x653   :  { %5587 = vsyncpa [#allocation3], 1 }
 0x654   :  { %5589 = vsyncpa [#allocation3 + $0x1], 1 }
 0x655   :  { %5590 = vsyncpa [#allocation6], 1 }
 0x656   :  { %5591 = vsyncpa [#allocation9], 1 }
 0x657   :  { %5592 = vsyncpa [#allocation12], 1 }
 0x658   :  { %5593 = vsyncpa [#allocation4], 1 }
 0x659   :  { %5595 = vsyncpa [#allocation4 + $0x1], 1 }

</bundles_post_ra>
